<compile_context>
chip_gen: v7x
topology: tpu7x:2x2x1
jax: 0.10.0
libtpu: 0.0.40
codegen_flags: <defaults>
</compile_context>

<pallas_src>
import jax
import jax.numpy as jnp
from jax import lax
from jax.experimental import pallas as pl
from jax.experimental.pallas import tpu as pltpu


# ----------------------------------------------------------------------------
# Fused bottleneck kernel: one (n, d) output plane per grid step, D carried.
# ----------------------------------------------------------------------------
def _bottleneck_kernel(xres_ref, xnxt_ref,                 # (1,H,W,Cin) f32 ; (1,Hp2,Wp2,Cin) bf16 (depth d+1)
                       w1_ref, b1_ref,                     # (Cin,P) bf16, (1,P) f32   (bn1 folded)
                       w2_ref, b2_ref,                     # (3,9P,P) bf16, (1,P) f32  (bn2 folded)
                       w3_ref, b3_ref,                     # (P,Cout) bf16, (1,Cout) f32 (bn3 folded)
                       o_ref,                              # (1,H,W,Cout) bf16
                       h1_scr):                            # VMEM (3,Hp2,Wp2,P) bf16 rolling conv1 buffer
    d = pl.program_id(1)
    num_d = pl.num_programs(1)
    _, H, W, Cin = xres_ref.shape
    _, Hp2, Wp2, _ = xnxt_ref.shape
    P = w1_ref.shape[1]
    Cout = w3_ref.shape[1]

    def conv1(x_bf16_2d):
        z = jnp.dot(x_bf16_2d, w1_ref[...], preferred_element_type=jnp.float32)
        return jnp.maximum(z + b1_ref[...], 0.0)           # folded bn1 + relu

    # ---- rolling conv1 buffer: slot 0 = depth d-1, slot 1 = depth d, slot 2 = depth d+1
    @pl.when(d == 0)
    def _prime():
        zero_plane = jnp.zeros((Hp2, Wp2, P), h1_scr.dtype)
        h1_scr[0] = zero_plane                              # depth -1 is zero padding
        h1_scr[1] = zero_plane                              # zero halo for depth 0
        z0 = conv1(xres_ref[0].reshape(H * W, Cin).astype(jnp.bfloat16))
        h1_scr[1, 1:H + 1, 1:W + 1, :] = z0.reshape(H, W, P).astype(h1_scr.dtype)

    @pl.when(d > 0)
    def _shift():                                           # slide the window by one depth plane
        h1_scr[0] = h1_scr[1]
        h1_scr[1] = h1_scr[2]

    @pl.when(d < num_d - 1)
    def _next_plane():
        # conv1 on the full padded plane (aligned load + aligned full-slot store);
        # the 1-wide spatial halo (where relu(b1) != 0) is forced back to zero in-value.
        z = conv1(xnxt_ref[0].reshape(Hp2 * Wp2, Cin)).reshape(Hp2, Wp2, P)
        rows = lax.broadcasted_iota(jnp.int32, (Hp2, Wp2, 1), 0)
        cols = lax.broadcasted_iota(jnp.int32, (Hp2, Wp2, 1), 1)
        interior = (rows >= 1) & (rows <= H) & (cols >= 1) & (cols <= W)
        h1_scr[2] = jnp.where(interior, z, 0.0).astype(h1_scr.dtype)

    @pl.when(d == num_d - 1)
    def _past_end():                                        # depth D is zero padding
        h1_scr[2] = jnp.zeros((Hp2, Wp2, P), h1_scr.dtype)

    # ---- conv2 (3x3x3, pad=1, stride=1): 3 fat matmuls over per-kd im2col strips
    def strip(plane):                                       # (Hp2,Wp2,P) bf16 -> (H*W, 9P) bf16
        wins = [plane[kh:kh + H, kw:kw + W, :] for kh in range(3) for kw in range(3)]
        return jnp.concatenate(wins, axis=-1).reshape(H * W, 9 * P)

    acc = jnp.dot(strip(h1_scr[0]), w2_ref[0], preferred_element_type=jnp.float32)
    acc = acc + jnp.dot(strip(h1_scr[1]), w2_ref[1], preferred_element_type=jnp.float32)
    acc = acc + jnp.dot(strip(h1_scr[2]), w2_ref[2], preferred_element_type=jnp.float32)
    h2 = jnp.maximum(acc + b2_ref[...], 0.0).astype(jnp.bfloat16)   # folded bn2 + relu

    # ---- conv3 (1x1x1) + bn3 + residual (f32, loaded fresh) + relu
    y = jnp.dot(h2, w3_ref[...], preferred_element_type=jnp.float32)
    res = xres_ref[0].reshape(H * W, Cin)                   # f32 residual (Cin == Cout)
    y = jnp.maximum(y + b3_ref[...] + res, 0.0)
    o_ref[0] = y.reshape(H, W, Cout).astype(o_ref.dtype)


# ----------------------------------------------------------------------------
# Host-side glue: BN folding, padding, pallas_call wiring.
# ----------------------------------------------------------------------------
def fold_bn(gamma, beta, mean, var, eps=1e-5):
    scale = gamma / jnp.sqrt(var + eps)
    shift = beta - mean * scale
    return scale, shift


def bottleneck_forward(x, p, eps=1e-5):
    """x: (N, D, H, W, Cin) f32 with Cin == 4 * planes (stride=1, no downsample).
    Returns bf16 (N, D, H, W, Cin)."""
    N, D, H, W, Cin = x.shape
    P = p["w1"].shape[1]          # planes
    Cout = p["w3"].shape[1]       # planes * 4
    assert Cout == Cin, "residual add requires inplanes == 4 * planes"

    # Fold inference-mode BatchNorm into the conv weights and a per-channel bias.
    s1, b1 = fold_bn(p["bn1_gamma"], p["bn1_beta"], p["bn1_mean"], p["bn1_var"], eps)
    s2, b2 = fold_bn(p["bn2_gamma"], p["bn2_beta"], p["bn2_mean"], p["bn2_var"], eps)
    s3, b3 = fold_bn(p["bn3_gamma"], p["bn3_beta"], p["bn3_mean"], p["bn3_var"], eps)
    w1f = (p["w1"] * s1).astype(jnp.bfloat16)                          # (Cin, P)
    w2f = (p["w2"] * s2).reshape(3, 9 * P, P).astype(jnp.bfloat16)     # (3, 9P, P): K order (kh, kw, in)
    w3f = (p["w3"] * s3).astype(jnp.bfloat16)                          # (P, Cout)
    b1 = b1.reshape(1, P).astype(jnp.float32)
    b2 = b2.reshape(1, P).astype(jnp.float32)
    b3 = b3.reshape(1, Cout).astype(jnp.float32)

    # One bf16 zero-padded copy (conv2 halo); only the depth-(d+1) plane is streamed per
    # step — the rolling buffer carries conv1 of depths d-1 and d.  The f32 original x is
    # streamed separately (residual precision + conv1 priming at d == 0).
    Hp2, Wp2 = H + 2, W + 2
    xpad = jnp.pad(x, ((0, 0), (1, 1), (1, 1), (1, 1), (0, 0))).astype(jnp.bfloat16)
    xpad = xpad.reshape(N * (D + 2), Hp2, Wp2, Cin)
    xres = x.reshape(N * D, H, W, Cin)

    grid_spec = pltpu.PrefetchScalarGridSpec(
        num_scalar_prefetch=0,
        grid=(N, D),
        in_specs=[
            pl.BlockSpec((1, H, W, Cin), lambda n, d: (n * D + d, 0, 0, 0)),            # residual / prime (f32)
            pl.BlockSpec((1, Hp2, Wp2, Cin), lambda n, d: (n * (D + 2) + d + 2, 0, 0, 0)),  # padded depth d+1 (bf16)
            # Weights / biases: constant index maps -> resident in VMEM across the grid.
            pl.BlockSpec((Cin, P), lambda n, d: (0, 0)),
            pl.BlockSpec((1, P), lambda n, d: (0, 0)),
            pl.BlockSpec((3, 9 * P, P), lambda n, d: (0, 0, 0)),
            pl.BlockSpec((1, P), lambda n, d: (0, 0)),
            pl.BlockSpec((P, Cout), lambda n, d: (0, 0)),
            pl.BlockSpec((1, Cout), lambda n, d: (0, 0)),
        ],
        out_specs=pl.BlockSpec((1, H, W, Cout), lambda n, d: (n * D + d, 0, 0, 0)),
        scratch_shapes=[pltpu.VMEM((3, Hp2, Wp2, P), jnp.bfloat16)],
    )

    out = pl.pallas_call(
        _bottleneck_kernel,
        out_shape=jax.ShapeDtypeStruct((N * D, H, W, Cout), jnp.bfloat16),
        grid_spec=grid_spec,
        compiler_params=pltpu.CompilerParams(
            # N is truly parallel (megacore / v7x dual-TC); D is the carried axis.
            dimension_semantics=("parallel", "arbitrary"),
            vmem_limit_bytes=48 * 1024 * 1024),
    )(xres, xpad, w1f, b1, w2f, b2, w3f, b3)

    return out.reshape(N, D, H, W, Cout)


# ----------------------------------------------------------------------------
# Pure-JAX reference (correctness check only).
# ----------------------------------------------------------------------------
def bottleneck_ref(x, p, eps=1e-5):
    dn = ("NDHWC", "DHWIO", "NDHWC")

    def bn(y, gamma, beta, mean, var):
        return (y - mean) / jnp.sqrt(var + eps) * gamma + beta

    Cin, P = p["w1"].shape
    _, Cout = p["w3"].shape
    y = lax.conv_general_dilated(x, p["w1"].reshape(1, 1, 1, Cin, P),
                                 (1, 1, 1), "VALID", dimension_numbers=dn)
    y = jax.nn.relu(bn(y, p["bn1_gamma"], p["bn1_beta"], p["bn1_mean"], p["bn1_var"]))
    y = lax.conv_general_dilated(y, p["w2"], (1, 1, 1), "SAME", dimension_numbers=dn)
    y = jax.nn.relu(bn(y, p["bn2_gamma"], p["bn2_beta"], p["bn2_mean"], p["bn2_var"]))
    y = lax.conv_general_dilated(y, p["w3"].reshape(1, 1, 1, P, Cout),
                                 (1, 1, 1), "VALID", dimension_numbers=dn)
    y = bn(y, p["bn3_gamma"], p["bn3_beta"], p["bn3_mean"], p["bn3_var"]) + x
    return jax.nn.relu(y)


# ----------------------------------------------------------------------------
# Deterministic synthetic parameter init (shapes from Bottleneck.__init__).
# ----------------------------------------------------------------------------
def init_params(key, inplanes, planes):
    expansion = 4
    ks = jax.random.split(key, 6)
    p = {}
    # conv1: Conv3d(inplanes, planes, k=1, bias=False) -> (Cin, Cout)
    p["w1"] = 0.1 * jax.random.normal(ks[0], (inplanes, planes), jnp.float32)
    # conv2: Conv3d(planes, planes, k=3, pad=1, bias=False) -> DHWIO
    p["w2"] = 0.05 * jax.random.normal(ks[1], (3, 3, 3, planes, planes), jnp.float32)
    # conv3: Conv3d(planes, planes*4, k=1, bias=False)
    p["w3"] = 0.1 * jax.random.normal(ks[2], (planes, planes * expansion), jnp.float32)

    def bn_params(k, c, tag):
        k1, k2, k3, k4 = jax.random.split(k, 4)
        p[f"bn{tag}_gamma"] = 1.0 + 0.1 * jax.random.normal(k1, (c,), jnp.float32)
        p[f"bn{tag}_beta"] = 0.1 * jax.random.normal(k2, (c,), jnp.float32)
        p[f"bn{tag}_mean"] = 0.05 * jax.random.normal(k3, (c,), jnp.float32)
        p[f"bn{tag}_var"] = 0.5 + jax.random.uniform(k4, (c,), jnp.float32)

    bn_params(ks[3], planes, 1)
    bn_params(ks[4], planes, 2)
    bn_params(ks[5], planes * expansion, 3)
    return p


if __name__ == "__main__":
    key = jax.random.PRNGKey(0)
    kx, kp = jax.random.split(key)

    # Small shapes: batch=2 (keeps a genuine parallel axis for dual-TC chips),
    # (D,H,W)=(4,8,8), planes=128 so inplanes = 4*planes = 512 (residual matches and
    # channel blocks are lane-aligned to 128).
    N, D, H, W = 2, 4, 8, 8
    planes = 128
    inplanes = 4 * planes

    x = jax.random.normal(kx, (N, D, H, W, inplanes), jnp.float32)
    params = init_params(kp, inplanes, planes)

    fwd = jax.jit(bottleneck_forward)
    out = jax.block_until_ready(fwd(x, params))

    ref = bottleneck_ref(x, params)
    assert out.shape == (N, D, H, W, planes * 4)
    out_f32 = out.astype(jnp.float32)
    rel = jnp.linalg.norm((out_f32 - ref).ravel()) / jnp.linalg.norm(ref.ravel())
    # bf16 MXU inputs + bf16 output -> relaxed tolerance vs the f32 reference.
    assert rel < 3e-2, f"relative L2 error too large: {rel}"

    print("KERNEL_OK")
</pallas_src>

<mosaic_0001>
module attributes {stable_mosaic.version = 11 : i64} {
  func.func @_bottleneck_kernel(%arg0: i32, %arg1: i32, %arg2: memref<1x8x8x512xf32, #tpu.memory_space<vmem>>, %arg3: memref<1x10x10x512xbf16, #tpu.memory_space<vmem>>, %arg4: memref<512x128xbf16, #tpu.memory_space<vmem>>, %arg5: memref<1x128xf32, #tpu.memory_space<vmem>>, %arg6: memref<3x1152x128xbf16, #tpu.memory_space<vmem>>, %arg7: memref<1x128xf32, #tpu.memory_space<vmem>>, %arg8: memref<128x512xbf16, #tpu.memory_space<vmem>>, %arg9: memref<1x512xf32, #tpu.memory_space<vmem>>, %arg10: memref<1x8x8x512xbf16, #tpu.memory_space<vmem>>, %arg11: memref<3x10x10x128xbf16, #tpu.memory_space<vmem>>) attributes {dimension_semantics = [#tpu.dimension_semantics<parallel>, #tpu.dimension_semantics<arbitrary>], iteration_bounds = array<i64: 2, 4>, scalar_prefetch = 0 : i64, scratch_operands = 1 : i64, tpu.core_type = #tpu.core_type<tc>, window_params = [{transform_indices = @transform_0, window_bounds = array<i64: 1, 8, 8, 512>}, {transform_indices = @transform_1, window_bounds = array<i64: 1, 10, 10, 512>}, {pipeline_mode = #tpu.pipeline_mode<synchronous>, transform_indices = @transform_2, window_bounds = array<i64: 512, 128>}, {pipeline_mode = #tpu.pipeline_mode<synchronous>, transform_indices = @transform_3, window_bounds = array<i64: 1, 128>}, {pipeline_mode = #tpu.pipeline_mode<synchronous>, transform_indices = @transform_4, window_bounds = array<i64: 3, 1152, 128>}, {pipeline_mode = #tpu.pipeline_mode<synchronous>, transform_indices = @transform_5, window_bounds = array<i64: 1, 128>}, {pipeline_mode = #tpu.pipeline_mode<synchronous>, transform_indices = @transform_6, window_bounds = array<i64: 128, 512>}, {pipeline_mode = #tpu.pipeline_mode<synchronous>, transform_indices = @transform_7, window_bounds = array<i64: 1, 512>}, {transform_indices = @transform_8, window_bounds = array<i64: 1, 8, 8, 512>}]} {
    %c0_i32 = arith.constant 0 : i32
    %0 = arith.cmpi eq, %arg1, %c0_i32 : i32
    %1 = arith.extui %0 : i1 to i32
    %c0_i32_0 = arith.constant 0 : i32
    %2 = arith.cmpi ne, %1, %c0_i32_0 : i32
    scf.if %2 {
      %cst_43 = arith.constant 0.000000e+00 : bf16
      %84 = vector.broadcast %cst_43 : bf16 to vector<10x10x128xbf16>
      %c0_44 = arith.constant 0 : index
      %c0_45 = arith.constant 0 : index
      %c0_46 = arith.constant 0 : index
      %c0_47 = arith.constant 0 : index
      %85 = vector.load %arg11[%c0_44, %c0_45, %c0_46, %c0_47] : memref<3x10x10x128xbf16, #tpu.memory_space<vmem>>, vector<1x10x10x128xbf16>
      %86 = vector.shape_cast %85 : vector<1x10x10x128xbf16> to vector<10x10x128xbf16>
      %87 = vector.shape_cast %84 : vector<10x10x128xbf16> to vector<1x10x10x128xbf16>
      tpu.vector_store %arg11[%c0_44, %c0_45, %c0_46, %c0_47], %87 {strides = array<i32>} : memref<3x10x10x128xbf16, #tpu.memory_space<vmem>>, vector<1x10x10x128xbf16>,
      %c1_48 = arith.constant 1 : index
      %c0_49 = arith.constant 0 : index
      %c0_50 = arith.constant 0 : index
      %c0_51 = arith.constant 0 : index
      %88 = vector.load %arg11[%c1_48, %c0_49, %c0_50, %c0_51] : memref<3x10x10x128xbf16, #tpu.memory_space<vmem>>, vector<1x10x10x128xbf16>
      %89 = vector.shape_cast %88 : vector<1x10x10x128xbf16> to vector<10x10x128xbf16>
      %90 = vector.shape_cast %84 : vector<10x10x128xbf16> to vector<1x10x10x128xbf16>
      tpu.vector_store %arg11[%c1_48, %c0_49, %c0_50, %c0_51], %90 {strides = array<i32>} : memref<3x10x10x128xbf16, #tpu.memory_space<vmem>>, vector<1x10x10x128xbf16>,
      %c0_52 = arith.constant 0 : index
      %c0_53 = arith.constant 0 : index
      %c0_54 = arith.constant 0 : index
      %c0_55 = arith.constant 0 : index
      %91 = vector.load %arg2[%c0_52, %c0_53, %c0_54, %c0_55] : memref<1x8x8x512xf32, #tpu.memory_space<vmem>>, vector<1x8x8x512xf32>
      %92 = vector.shape_cast %91 : vector<1x8x8x512xf32> to vector<8x8x512xf32>
      %93 = vector.shape_cast %92 : vector<8x8x512xf32> to vector<64x512xf32>
      %94 = arith.truncf %93 : vector<64x512xf32> to vector<64x512xbf16>
      %c0_56 = arith.constant 0 : index
      %c0_57 = arith.constant 0 : index
      %95 = vector.load %arg4[%c0_56, %c0_57] : memref<512x128xbf16, #tpu.memory_space<vmem>>, vector<512x128xbf16>
      %cst_58 = arith.constant dense<0.000000e+00> : vector<64x128xf32>
      %96 = tpu.matmul %94, %95, %cst_58 {dimension_numbers = #tpu.dot_dimension_numbers<[1], [0], [0], [1], [0, 0, 1, 1], [], []>} : vector<64x512xbf16>, vector<512x128xbf16>, vector<64x128xf32> -> vector<64x128xf32>
      %c0_59 = arith.constant 0 : index
      %c0_60 = arith.constant 0 : index
      %97 = vector.load %arg5[%c0_59, %c0_60] : memref<1x128xf32, #tpu.memory_space<vmem>>, vector<1x128xf32>
      %98 = vector.broadcast %97 : vector<1x128xf32> to vector<64x128xf32>
      %99 = arith.addf %96, %98 : vector<64x128xf32>
      %cst_61 = arith.constant 0.000000e+00 : f32
      %100 = vector.broadcast %cst_61 : f32 to vector<64x128xf32>
      %101 = arith.maximumf %99, %100 : vector<64x128xf32>
      %102 = vector.shape_cast %101 : vector<64x128xf32> to vector<8x8x128xf32>
      %103 = arith.truncf %102 : vector<8x8x128xf32> to vector<8x8x128xbf16>
      %c1_62 = arith.constant 1 : index
      %c1_63 = arith.constant 1 : index
      %c1_64 = arith.constant 1 : index
      %c0_65 = arith.constant 0 : index
      %104 = vector.load %arg11[%c1_62, %c1_63, %c1_64, %c0_65] : memref<3x10x10x128xbf16, #tpu.memory_space<vmem>>, vector<1x8x8x128xbf16>
      %105 = vector.shape_cast %104 : vector<1x8x8x128xbf16> to vector<8x8x128xbf16>
      %106 = vector.shape_cast %103 : vector<8x8x128xbf16> to vector<1x8x8x128xbf16>
      tpu.vector_store %arg11[%c1_62, %c1_63, %c1_64, %c0_65], %106 {strides = array<i32>} : memref<3x10x10x128xbf16, #tpu.memory_space<vmem>>, vector<1x8x8x128xbf16>,
    } else {
    }
    %c0_i32_1 = arith.constant 0 : i32
    %3 = arith.cmpi sgt, %arg1, %c0_i32_1 : i32
    %4 = arith.extui %3 : i1 to i32
    %c0_i32_2 = arith.constant 0 : i32
    %5 = arith.cmpi ne, %4, %c0_i32_2 : i32
    scf.if %5 {
      %c1_43 = arith.constant 1 : index
      %c0_44 = arith.constant 0 : index
      %c0_45 = arith.constant 0 : index
      %c0_46 = arith.constant 0 : index
      %84 = vector.load %arg11[%c1_43, %c0_44, %c0_45, %c0_46] : memref<3x10x10x128xbf16, #tpu.memory_space<vmem>>, vector<1x10x10x128xbf16>
      %85 = vector.shape_cast %84 : vector<1x10x10x128xbf16> to vector<10x10x128xbf16>
      %c0_47 = arith.constant 0 : index
      %c0_48 = arith.constant 0 : index
      %c0_49 = arith.constant 0 : index
      %c0_50 = arith.constant 0 : index
      %86 = vector.load %arg11[%c0_47, %c0_48, %c0_49, %c0_50] : memref<3x10x10x128xbf16, #tpu.memory_space<vmem>>, vector<1x10x10x128xbf16>
      %87 = vector.shape_cast %86 : vector<1x10x10x128xbf16> to vector<10x10x128xbf16>
      %88 = vector.shape_cast %85 : vector<10x10x128xbf16> to vector<1x10x10x128xbf16>
      tpu.vector_store %arg11[%c0_47, %c0_48, %c0_49, %c0_50], %88 {strides = array<i32>} : memref<3x10x10x128xbf16, #tpu.memory_space<vmem>>, vector<1x10x10x128xbf16>,
      %c2_51 = arith.constant 2 : index
      %c0_52 = arith.constant 0 : index
      %c0_53 = arith.constant 0 : index
      %c0_54 = arith.constant 0 : index
      %89 = vector.load %arg11[%c2_51, %c0_52, %c0_53, %c0_54] : memref<3x10x10x128xbf16, #tpu.memory_space<vmem>>, vector<1x10x10x128xbf16>
      %90 = vector.shape_cast %89 : vector<1x10x10x128xbf16> to vector<10x10x128xbf16>
      %c1_55 = arith.constant 1 : index
      %c0_56 = arith.constant 0 : index
      %c0_57 = arith.constant 0 : index
      %c0_58 = arith.constant 0 : index
      %91 = vector.load %arg11[%c1_55, %c0_56, %c0_57, %c0_58] : memref<3x10x10x128xbf16, #tpu.memory_space<vmem>>, vector<1x10x10x128xbf16>
      %92 = vector.shape_cast %91 : vector<1x10x10x128xbf16> to vector<10x10x128xbf16>
      %93 = vector.shape_cast %90 : vector<10x10x128xbf16> to vector<1x10x10x128xbf16>
      tpu.vector_store %arg11[%c1_55, %c0_56, %c0_57, %c0_58], %93 {strides = array<i32>} : memref<3x10x10x128xbf16, #tpu.memory_space<vmem>>, vector<1x10x10x128xbf16>,
    } else {
    }
    %c3_i32 = arith.constant 3 : i32
    %6 = arith.cmpi slt, %arg1, %c3_i32 : i32
    %7 = arith.extui %6 : i1 to i32
    %c0_i32_3 = arith.constant 0 : i32
    %8 = arith.cmpi ne, %7, %c0_i32_3 : i32
    scf.if %8 {
      %c0_43 = arith.constant 0 : index
      %c0_44 = arith.constant 0 : index
      %c0_45 = arith.constant 0 : index
      %c0_46 = arith.constant 0 : index
      %84 = vector.load %arg3[%c0_43, %c0_44, %c0_45, %c0_46] : memref<1x10x10x512xbf16, #tpu.memory_space<vmem>>, vector<1x10x10x512xbf16>
      %85 = vector.shape_cast %84 : vector<1x10x10x512xbf16> to vector<10x10x512xbf16>
      %86 = vector.shape_cast %85 : vector<10x10x512xbf16> to vector<100x512xbf16>
      %c0_47 = arith.constant 0 : index
      %c0_48 = arith.constant 0 : index
      %87 = vector.load %arg4[%c0_47, %c0_48] : memref<512x128xbf16, #tpu.memory_space<vmem>>, vector<512x128xbf16>
      %cst_49 = arith.constant dense<0.000000e+00> : vector<100x128xf32>
      %88 = tpu.matmul %86, %87, %cst_49 {dimension_numbers = #tpu.dot_dimension_numbers<[1], [0], [0], [1], [0, 0, 1, 1], [], []>} : vector<100x512xbf16>, vector<512x128xbf16>, vector<100x128xf32> -> vector<100x128xf32>
      %c0_50 = arith.constant 0 : index
      %c0_51 = arith.constant 0 : index
      %89 = vector.load %arg5[%c0_50, %c0_51] : memref<1x128xf32, #tpu.memory_space<vmem>>, vector<1x128xf32>
      %90 = vector.broadcast %89 : vector<1x128xf32> to vector<100x128xf32>
      %91 = arith.addf %88, %90 : vector<100x128xf32>
      %cst_52 = arith.constant 0.000000e+00 : f32
      %92 = vector.broadcast %cst_52 : f32 to vector<100x128xf32>
      %93 = arith.maximumf %91, %92 : vector<100x128xf32>
      %94 = vector.shape_cast %93 : vector<100x128xf32> to vector<10x10x128xf32>
      %95 = tpu.iota {dimensions = array<i32: 0>} : vector<10x10x1xi32>
      %96 = tpu.iota {dimensions = array<i32: 1>} : vector<10x10x1xi32>
      %c1_i32 = arith.constant 1 : i32
      %97 = vector.broadcast %c1_i32 : i32 to vector<10x10x1xi32>
      %98 = arith.cmpi sge, %95, %97 : vector<10x10x1xi32>
      %c8_i32 = arith.constant 8 : i32
      %99 = vector.broadcast %c8_i32 : i32 to vector<10x10x1xi32>
      %100 = arith.cmpi sle, %95, %99 : vector<10x10x1xi32>
      %101 = arith.andi %98, %100 : vector<10x10x1xi1>
      %c1_i32_53 = arith.constant 1 : i32
      %102 = vector.broadcast %c1_i32_53 : i32 to vector<10x10x1xi32>
      %103 = arith.cmpi sge, %96, %102 : vector<10x10x1xi32>
      %104 = arith.andi %101, %103 : vector<10x10x1xi1>
      %c8_i32_54 = arith.constant 8 : i32
      %105 = vector.broadcast %c8_i32_54 : i32 to vector<10x10x1xi32>
      %106 = arith.cmpi sle, %96, %105 : vector<10x10x1xi32>
      %107 = arith.andi %104, %106 : vector<10x10x1xi1>
      %cst_55 = arith.constant 0.000000e+00 : f32
      %108 = vector.shape_cast %107 : vector<10x10x1xi1> to vector<10x10x1xi1>
      %109 = vector.broadcast %108 : vector<10x10x1xi1> to vector<10x10x128xi1>
      %110 = vector.broadcast %cst_55 : f32 to vector<10x10x128xf32>
      %111 = arith.select %109, %94, %110 : vector<10x10x128xi1>, vector<10x10x128xf32>
      %112 = arith.truncf %111 : vector<10x10x128xf32> to vector<10x10x128xbf16>
      %c2_56 = arith.constant 2 : index
      %c0_57 = arith.constant 0 : index
      %c0_58 = arith.constant 0 : index
      %c0_59 = arith.constant 0 : index
      %113 = vector.load %arg11[%c2_56, %c0_57, %c0_58, %c0_59] : memref<3x10x10x128xbf16, #tpu.memory_space<vmem>>, vector<1x10x10x128xbf16>
      %114 = vector.shape_cast %113 : vector<1x10x10x128xbf16> to vector<10x10x128xbf16>
      %115 = vector.shape_cast %112 : vector<10x10x128xbf16> to vector<1x10x10x128xbf16>
      tpu.vector_store %arg11[%c2_56, %c0_57, %c0_58, %c0_59], %115 {strides = array<i32>} : memref<3x10x10x128xbf16, #tpu.memory_space<vmem>>, vector<1x10x10x128xbf16>,
    } else {
    }
    %c3_i32_4 = arith.constant 3 : i32
    %9 = arith.cmpi eq, %arg1, %c3_i32_4 : i32
    %10 = arith.extui %9 : i1 to i32
    %c0_i32_5 = arith.constant 0 : i32
    %11 = arith.cmpi ne, %10, %c0_i32_5 : i32
    scf.if %11 {
      %cst_43 = arith.constant 0.000000e+00 : bf16
      %84 = vector.broadcast %cst_43 : bf16 to vector<10x10x128xbf16>
      %c2_44 = arith.constant 2 : index
      %c0_45 = arith.constant 0 : index
      %c0_46 = arith.constant 0 : index
      %c0_47 = arith.constant 0 : index
      %85 = vector.load %arg11[%c2_44, %c0_45, %c0_46, %c0_47] : memref<3x10x10x128xbf16, #tpu.memory_space<vmem>>, vector<1x10x10x128xbf16>
      %86 = vector.shape_cast %85 : vector<1x10x10x128xbf16> to vector<10x10x128xbf16>
      %87 = vector.shape_cast %84 : vector<10x10x128xbf16> to vector<1x10x10x128xbf16>
      tpu.vector_store %arg11[%c2_44, %c0_45, %c0_46, %c0_47], %87 {strides = array<i32>} : memref<3x10x10x128xbf16, #tpu.memory_space<vmem>>, vector<1x10x10x128xbf16>,
    } else {
    }
    %c0 = arith.constant 0 : index
    %c0_6 = arith.constant 0 : index
    %c0_7 = arith.constant 0 : index
    %c0_8 = arith.constant 0 : index
    %12 = vector.load %arg11[%c0, %c0_6, %c0_7, %c0_8] : memref<3x10x10x128xbf16, #tpu.memory_space<vmem>>, vector<1x10x10x128xbf16>
    %13 = vector.shape_cast %12 : vector<1x10x10x128xbf16> to vector<10x10x128xbf16>
    %14 = vector.extract_strided_slice %13 {offsets = [0, 0, 0], sizes = [8, 8, 128], strides = [1, 1, 1]} : vector<10x10x128xbf16> to vector<8x8x128xbf16>
    %15 = vector.extract_strided_slice %13 {offsets = [0, 1, 0], sizes = [8, 8, 128], strides = [1, 1, 1]} : vector<10x10x128xbf16> to vector<8x8x128xbf16>
    %16 = vector.extract_strided_slice %13 {offsets = [0, 2, 0], sizes = [8, 8, 128], strides = [1, 1, 1]} : vector<10x10x128xbf16> to vector<8x8x128xbf16>
    %17 = vector.extract_strided_slice %13 {offsets = [1, 0, 0], sizes = [8, 8, 128], strides = [1, 1, 1]} : vector<10x10x128xbf16> to vector<8x8x128xbf16>
    %18 = vector.extract_strided_slice %13 {offsets = [1, 1, 0], sizes = [8, 8, 128], strides = [1, 1, 1]} : vector<10x10x128xbf16> to vector<8x8x128xbf16>
    %19 = vector.extract_strided_slice %13 {offsets = [1, 2, 0], sizes = [8, 8, 128], strides = [1, 1, 1]} : vector<10x10x128xbf16> to vector<8x8x128xbf16>
    %20 = vector.extract_strided_slice %13 {offsets = [2, 0, 0], sizes = [8, 8, 128], strides = [1, 1, 1]} : vector<10x10x128xbf16> to vector<8x8x128xbf16>
    %21 = vector.extract_strided_slice %13 {offsets = [2, 1, 0], sizes = [8, 8, 128], strides = [1, 1, 1]} : vector<10x10x128xbf16> to vector<8x8x128xbf16>
    %22 = vector.extract_strided_slice %13 {offsets = [2, 2, 0], sizes = [8, 8, 128], strides = [1, 1, 1]} : vector<10x10x128xbf16> to vector<8x8x128xbf16>
    %23 = tpu.concatenate %14, %15, %16, %17, %18, %19, %20, %21, %22 in 2 : vector<8x8x128xbf16>, vector<8x8x128xbf16>, vector<8x8x128xbf16>, vector<8x8x128xbf16>, vector<8x8x128xbf16>, vector<8x8x128xbf16>, vector<8x8x128xbf16>, vector<8x8x128xbf16>, vector<8x8x128xbf16> -> vector<8x8x1152xbf16>
    %24 = vector.shape_cast %23 : vector<8x8x1152xbf16> to vector<64x1152xbf16>
    %c0_9 = arith.constant 0 : index
    %c0_10 = arith.constant 0 : index
    %c0_11 = arith.constant 0 : index
    %25 = vector.load %arg6[%c0_9, %c0_10, %c0_11] : memref<3x1152x128xbf16, #tpu.memory_space<vmem>>, vector<1x1152x128xbf16>
    %26 = vector.shape_cast %25 : vector<1x1152x128xbf16> to vector<1152x128xbf16>
    %cst = arith.constant dense<0.000000e+00> : vector<64x128xf32>
    %27 = tpu.matmul %24, %26, %cst {dimension_numbers = #tpu.dot_dimension_numbers<[1], [0], [0], [1], [0, 0, 1, 1], [], []>} : vector<64x1152xbf16>, vector<1152x128xbf16>, vector<64x128xf32> -> vector<64x128xf32>
    %c1 = arith.constant 1 : index
    %c0_12 = arith.constant 0 : index
    %c0_13 = arith.constant 0 : index
    %c0_14 = arith.constant 0 : index
    %28 = vector.load %arg11[%c1, %c0_12, %c0_13, %c0_14] : memref<3x10x10x128xbf16, #tpu.memory_space<vmem>>, vector<1x10x10x128xbf16>
    %29 = vector.shape_cast %28 : vector<1x10x10x128xbf16> to vector<10x10x128xbf16>
    %30 = vector.extract_strided_slice %29 {offsets = [0, 0, 0], sizes = [8, 8, 128], strides = [1, 1, 1]} : vector<10x10x128xbf16> to vector<8x8x128xbf16>
    %31 = vector.extract_strided_slice %29 {offsets = [0, 1, 0], sizes = [8, 8, 128], strides = [1, 1, 1]} : vector<10x10x128xbf16> to vector<8x8x128xbf16>
    %32 = vector.extract_strided_slice %29 {offsets = [0, 2, 0], sizes = [8, 8, 128], strides = [1, 1, 1]} : vector<10x10x128xbf16> to vector<8x8x128xbf16>
    %33 = vector.extract_strided_slice %29 {offsets = [1, 0, 0], sizes = [8, 8, 128], strides = [1, 1, 1]} : vector<10x10x128xbf16> to vector<8x8x128xbf16>
    %34 = vector.extract_strided_slice %29 {offsets = [1, 1, 0], sizes = [8, 8, 128], strides = [1, 1, 1]} : vector<10x10x128xbf16> to vector<8x8x128xbf16>
    %35 = vector.extract_strided_slice %29 {offsets = [1, 2, 0], sizes = [8, 8, 128], strides = [1, 1, 1]} : vector<10x10x128xbf16> to vector<8x8x128xbf16>
    %36 = vector.extract_strided_slice %29 {offsets = [2, 0, 0], sizes = [8, 8, 128], strides = [1, 1, 1]} : vector<10x10x128xbf16> to vector<8x8x128xbf16>
    %37 = vector.extract_strided_slice %29 {offsets = [2, 1, 0], sizes = [8, 8, 128], strides = [1, 1, 1]} : vector<10x10x128xbf16> to vector<8x8x128xbf16>
    %38 = vector.extract_strided_slice %29 {offsets = [2, 2, 0], sizes = [8, 8, 128], strides = [1, 1, 1]} : vector<10x10x128xbf16> to vector<8x8x128xbf16>
    %39 = tpu.concatenate %30, %31, %32, %33, %34, %35, %36, %37, %38 in 2 : vector<8x8x128xbf16>, vector<8x8x128xbf16>, vector<8x8x128xbf16>, vector<8x8x128xbf16>, vector<8x8x128xbf16>, vector<8x8x128xbf16>, vector<8x8x128xbf16>, vector<8x8x128xbf16>, vector<8x8x128xbf16> -> vector<8x8x1152xbf16>
    %40 = vector.shape_cast %39 : vector<8x8x1152xbf16> to vector<64x1152xbf16>
    %c1_15 = arith.constant 1 : index
    %c0_16 = arith.constant 0 : index
    %c0_17 = arith.constant 0 : index
    %41 = vector.load %arg6[%c1_15, %c0_16, %c0_17] : memref<3x1152x128xbf16, #tpu.memory_space<vmem>>, vector<1x1152x128xbf16>
    %42 = vector.shape_cast %41 : vector<1x1152x128xbf16> to vector<1152x128xbf16>
    %cst_18 = arith.constant dense<0.000000e+00> : vector<64x128xf32>
    %43 = tpu.matmul %40, %42, %cst_18 {dimension_numbers = #tpu.dot_dimension_numbers<[1], [0], [0], [1], [0, 0, 1, 1], [], []>} : vector<64x1152xbf16>, vector<1152x128xbf16>, vector<64x128xf32> -> vector<64x128xf32>
    %44 = arith.addf %27, %43 : vector<64x128xf32>
    %c2 = arith.constant 2 : index
    %c0_19 = arith.constant 0 : index
    %c0_20 = arith.constant 0 : index
    %c0_21 = arith.constant 0 : index
    %45 = vector.load %arg11[%c2, %c0_19, %c0_20, %c0_21] : memref<3x10x10x128xbf16, #tpu.memory_space<vmem>>, vector<1x10x10x128xbf16>
    %46 = vector.shape_cast %45 : vector<1x10x10x128xbf16> to vector<10x10x128xbf16>
    %47 = vector.extract_strided_slice %46 {offsets = [0, 0, 0], sizes = [8, 8, 128], strides = [1, 1, 1]} : vector<10x10x128xbf16> to vector<8x8x128xbf16>
    %48 = vector.extract_strided_slice %46 {offsets = [0, 1, 0], sizes = [8, 8, 128], strides = [1, 1, 1]} : vector<10x10x128xbf16> to vector<8x8x128xbf16>
    %49 = vector.extract_strided_slice %46 {offsets = [0, 2, 0], sizes = [8, 8, 128], strides = [1, 1, 1]} : vector<10x10x128xbf16> to vector<8x8x128xbf16>
    %50 = vector.extract_strided_slice %46 {offsets = [1, 0, 0], sizes = [8, 8, 128], strides = [1, 1, 1]} : vector<10x10x128xbf16> to vector<8x8x128xbf16>
    %51 = vector.extract_strided_slice %46 {offsets = [1, 1, 0], sizes = [8, 8, 128], strides = [1, 1, 1]} : vector<10x10x128xbf16> to vector<8x8x128xbf16>
    %52 = vector.extract_strided_slice %46 {offsets = [1, 2, 0], sizes = [8, 8, 128], strides = [1, 1, 1]} : vector<10x10x128xbf16> to vector<8x8x128xbf16>
    %53 = vector.extract_strided_slice %46 {offsets = [2, 0, 0], sizes = [8, 8, 128], strides = [1, 1, 1]} : vector<10x10x128xbf16> to vector<8x8x128xbf16>
    %54 = vector.extract_strided_slice %46 {offsets = [2, 1, 0], sizes = [8, 8, 128], strides = [1, 1, 1]} : vector<10x10x128xbf16> to vector<8x8x128xbf16>
    %55 = vector.extract_strided_slice %46 {offsets = [2, 2, 0], sizes = [8, 8, 128], strides = [1, 1, 1]} : vector<10x10x128xbf16> to vector<8x8x128xbf16>
    %56 = tpu.concatenate %47, %48, %49, %50, %51, %52, %53, %54, %55 in 2 : vector<8x8x128xbf16>, vector<8x8x128xbf16>, vector<8x8x128xbf16>, vector<8x8x128xbf16>, vector<8x8x128xbf16>, vector<8x8x128xbf16>, vector<8x8x128xbf16>, vector<8x8x128xbf16>, vector<8x8x128xbf16> -> vector<8x8x1152xbf16>
    %57 = vector.shape_cast %56 : vector<8x8x1152xbf16> to vector<64x1152xbf16>
    %c2_22 = arith.constant 2 : index
    %c0_23 = arith.constant 0 : index
    %c0_24 = arith.constant 0 : index
    %58 = vector.load %arg6[%c2_22, %c0_23, %c0_24] : memref<3x1152x128xbf16, #tpu.memory_space<vmem>>, vector<1x1152x128xbf16>
    %59 = vector.shape_cast %58 : vector<1x1152x128xbf16> to vector<1152x128xbf16>
    %cst_25 = arith.constant dense<0.000000e+00> : vector<64x128xf32>
    %60 = tpu.matmul %57, %59, %cst_25 {dimension_numbers = #tpu.dot_dimension_numbers<[1], [0], [0], [1], [0, 0, 1, 1], [], []>} : vector<64x1152xbf16>, vector<1152x128xbf16>, vector<64x128xf32> -> vector<64x128xf32>
    %61 = arith.addf %44, %60 : vector<64x128xf32>
    %c0_26 = arith.constant 0 : index
    %c0_27 = arith.constant 0 : index
    %62 = vector.load %arg7[%c0_26, %c0_27] : memref<1x128xf32, #tpu.memory_space<vmem>>, vector<1x128xf32>
    %63 = vector.broadcast %62 : vector<1x128xf32> to vector<64x128xf32>
    %64 = arith.addf %61, %63 : vector<64x128xf32>
    %cst_28 = arith.constant 0.000000e+00 : f32
    %65 = vector.broadcast %cst_28 : f32 to vector<64x128xf32>
    %66 = arith.maximumf %64, %65 : vector<64x128xf32>
    %67 = arith.truncf %66 : vector<64x128xf32> to vector<64x128xbf16>
    %c0_29 = arith.constant 0 : index
    %c0_30 = arith.constant 0 : index
    %68 = vector.load %arg8[%c0_29, %c0_30] : memref<128x512xbf16, #tpu.memory_space<vmem>>, vector<128x512xbf16>
    %cst_31 = arith.constant dense<0.000000e+00> : vector<64x512xf32>
    %69 = tpu.matmul %67, %68, %cst_31 {dimension_numbers = #tpu.dot_dimension_numbers<[1], [0], [0], [1], [0, 0, 1, 1], [], []>} : vector<64x128xbf16>, vector<128x512xbf16>, vector<64x512xf32> -> vector<64x512xf32>
    %c0_32 = arith.constant 0 : index
    %c0_33 = arith.constant 0 : index
    %c0_34 = arith.constant 0 : index
    %c0_35 = arith.constant 0 : index
    %70 = vector.load %arg2[%c0_32, %c0_33, %c0_34, %c0_35] : memref<1x8x8x512xf32, #tpu.memory_space<vmem>>, vector<1x8x8x512xf32>
    %71 = vector.shape_cast %70 : vector<1x8x8x512xf32> to vector<8x8x512xf32>
    %72 = vector.shape_cast %71 : vector<8x8x512xf32> to vector<64x512xf32>
    %c0_36 = arith.constant 0 : index
    %c0_37 = arith.constant 0 : index
    %73 = vector.load %arg9[%c0_36, %c0_37] : memref<1x512xf32, #tpu.memory_space<vmem>>, vector<1x512xf32>
    %74 = vector.broadcast %73 : vector<1x512xf32> to vector<64x512xf32>
    %75 = arith.addf %69, %74 : vector<64x512xf32>
    %76 = arith.addf %75, %72 : vector<64x512xf32>
    %cst_38 = arith.constant 0.000000e+00 : f32
    %77 = vector.broadcast %cst_38 : f32 to vector<64x512xf32>
    %78 = arith.maximumf %76, %77 : vector<64x512xf32>
    %79 = vector.shape_cast %78 : vector<64x512xf32> to vector<8x8x512xf32>
    %80 = arith.truncf %79 : vector<8x8x512xf32> to vector<8x8x512xbf16>
    %c0_39 = arith.constant 0 : index
    %c0_40 = arith.constant 0 : index
    %c0_41 = arith.constant 0 : index
    %c0_42 = arith.constant 0 : index
    %81 = vector.load %arg10[%c0_39, %c0_40, %c0_41, %c0_42] : memref<1x8x8x512xbf16, #tpu.memory_space<vmem>>, vector<1x8x8x512xbf16>
    %82 = vector.shape_cast %81 : vector<1x8x8x512xbf16> to vector<8x8x512xbf16>
    %83 = vector.shape_cast %80 : vector<8x8x512xbf16> to vector<1x8x8x512xbf16>
    tpu.vector_store %arg10[%c0_39, %c0_40, %c0_41, %c0_42], %83 {strides = array<i32>} : memref<1x8x8x512xbf16, #tpu.memory_space<vmem>>, vector<1x8x8x512xbf16>,
    return
  }
  func.func @transform_0(%arg0: i32, %arg1: i32) -> (i32, i32, i32, i32) {
    %c4_i32 = arith.constant 4 : i32
    %0 = arith.muli %arg0, %c4_i32 : i32
    %1 = arith.addi %0, %arg1 : i32
    %c0_i32 = arith.constant 0 : i32
    %c0_i32_0 = arith.constant 0 : i32
    %c0_i32_1 = arith.constant 0 : i32
    %c0_i32_2 = arith.constant 0 : i32
    return %1, %c0_i32, %c0_i32_0, %c0_i32_1 : i32, i32, i32, i32
  }
  func.func @transform_1(%arg0: i32, %arg1: i32) -> (i32, i32, i32, i32) {
    %c6_i32 = arith.constant 6 : i32
    %0 = arith.muli %arg0, %c6_i32 : i32
    %1 = arith.addi %0, %arg1 : i32
    %c2_i32 = arith.constant 2 : i32
    %2 = arith.addi %1, %c2_i32 : i32
    %c0_i32 = arith.constant 0 : i32
    %c0_i32_0 = arith.constant 0 : i32
    %c0_i32_1 = arith.constant 0 : i32
    %c0_i32_2 = arith.constant 0 : i32
    return %2, %c0_i32, %c0_i32_0, %c0_i32_1 : i32, i32, i32, i32
  }
  func.func @transform_2(%arg0: i32, %arg1: i32) -> (i32, i32) {
    %c0_i32 = arith.constant 0 : i32
    %c0_i32_0 = arith.constant 0 : i32
    %c0_i32_1 = arith.constant 0 : i32
    return %c0_i32, %c0_i32_0 : i32, i32
  }
  func.func @transform_3(%arg0: i32, %arg1: i32) -> (i32, i32) {
    %c0_i32 = arith.constant 0 : i32
    %c0_i32_0 = arith.constant 0 : i32
    %c0_i32_1 = arith.constant 0 : i32
    return %c0_i32, %c0_i32_0 : i32, i32
  }
  func.func @transform_4(%arg0: i32, %arg1: i32) -> (i32, i32, i32) {
    %c0_i32 = arith.constant 0 : i32
    %c0_i32_0 = arith.constant 0 : i32
    %c0_i32_1 = arith.constant 0 : i32
    %c0_i32_2 = arith.constant 0 : i32
    return %c0_i32, %c0_i32_0, %c0_i32_1 : i32, i32, i32
  }
  func.func @transform_5(%arg0: i32, %arg1: i32) -> (i32, i32) {
    %c0_i32 = arith.constant 0 : i32
    %c0_i32_0 = arith.constant 0 : i32
    %c0_i32_1 = arith.constant 0 : i32
    return %c0_i32, %c0_i32_0 : i32, i32
  }
  func.func @transform_6(%arg0: i32, %arg1: i32) -> (i32, i32) {
    %c0_i32 = arith.constant 0 : i32
    %c0_i32_0 = arith.constant 0 : i32
    %c0_i32_1 = arith.constant 0 : i32
    return %c0_i32, %c0_i32_0 : i32, i32
  }
  func.func @transform_7(%arg0: i32, %arg1: i32) -> (i32, i32) {
    %c0_i32 = arith.constant 0 : i32
    %c0_i32_0 = arith.constant 0 : i32
    %c0_i32_1 = arith.constant 0 : i32
    return %c0_i32, %c0_i32_0 : i32, i32
  }
  func.func @transform_8(%arg0: i32, %arg1: i32) -> (i32, i32, i32, i32) {
    %c4_i32 = arith.constant 4 : i32
    %0 = arith.muli %arg0, %c4_i32 : i32
    %1 = arith.addi %0, %arg1 : i32
    %c0_i32 = arith.constant 0 : i32
    %c0_i32_0 = arith.constant 0 : i32
    %c0_i32_1 = arith.constant 0 : i32
    %c0_i32_2 = arith.constant 0 : i32
    return %1, %c0_i32, %c0_i32_0, %c0_i32_1 : i32, i32, i32, i32
  }
}

</mosaic_0001>

<bundles_post_ra>
// kernel: bottleneck_forward.1
= control target key start
LH: loop header
LB: loop body
LE: loop exit
PB: predicated region body
PF: predicated region fallthrough
CT: control target
= control target key end

     0   :  { %13 = vsyncpa [#allocation4], 0  ;;  %s11923_s0 = inlined_call_operand.vmem [shape: f32[8,8,8,512], index: 0, kind: input, shape index: {}]   ;;  %s11924_s1 = inlined_call_operand.vmem [shape: bf16[12,10,10,512], index: 1, kind: input, shape index: {}]   ;;  %s11925_s2 = inlined_call_operand.vmem [shape: bf16[512,128], index: 2, kind: input, shape index: {}]   ;;  %s11926_s3 = inlined_call_operand.vmem [shape: f32[1,128], index: 3, kind: input, shape index: {}]   ;;  %s11927_s4 = inlined_call_operand.vmem [shape: bf16[3,1152,128], index: 4, kind: input, shape index: {}]   ;;  %s11928_s5 = inlined_call_operand.vmem [shape: f32[1,128], index: 5, kind: input, shape index: {}]   ;;  %s11929_s6 = inlined_call_operand.vmem [shape: bf16[128,512], index: 6, kind: input, shape index: {}]   ;;  %s11930_s7 = inlined_call_operand.vmem [shape: f32[1,512], index: 7, kind: input, shape index: {}]   ;;  %s11931_s8 = inlined_call_operand.hbm [shape: bf16[8,8,8,512], index: 8, kind: output, shape index: {}]  }
   0x1   :  { %15 = vsyncpa [#allocation4 + $0x1], 0  ;;  %s9781_s27 = smov 0   ;;  %s9783_s28 = smov 0  }
   0x2   :  { %s9785_s29 = smov 0   ;;  %s9787_s30 = smov 0  }
   0x3   :  { %s9789_s9 = smov 0   ;;  %s9791_s10 = smov 0  }
   0x4   :  { %s9793_s11 = smov 0   ;;  %s9795_s12 = smov 0  }
   0x5 LB: > { %11938 = sst [smem:[#allocation6_spill]] %s9705_s29  ;;  %s7433_s13 = sadd.s32 4294967295, %s9725_s12   ;;  %s9725_s12 = sphi %s9795_s12, %s21_s12   ;;  %s9721_s11 = sphi %s9793_s11, %s11956_s11   ;;  %s9717_s10 = sphi %s9791_s10, %s11955_s10   ;;  %s9713_s9 = sphi %s9789_s9, %s11954_s9   ;;  %s9709_s30 = sphi %s9787_s30, %s11953_s30   ;;  %s9705_s29 = sphi %s9785_s29, %s11952_s29   ;;  %s9701_s28 = sphi %s9783_s28, %s11958_s28   ;;  %s9697_s27 = sphi %s9781_s27, %s11957_s27  }
   0x6   : > { %11939 = sst [smem:[#allocation7_spill]] %s9717_s10  ;;  %s30_s14 = sadd.s32 1, %s9717_s10 }
   0x7   : > { %11940 = sst [smem:[#allocation8_spill]] %s9721_s11  ;;  %s33_s15 = sadd.s32 1, %s9721_s11 }
   0x8   : > { %p31_p0 = scmp.ge.s32.totalorder %s30_s14, 4  ;;  %s7437_s16 = sshll.u32 %s9721_s11, 2 }
   0x9   : > { %s7434_s17 = sadd.s32 4294967294, %s9725_s12   ;;  %s226_s18 = sadd.s32 %s9717_s10, %s7437_s16 }
   0xa   : > { %s11960_s14 = smov (%p31_p0, %s30_s14), 0  ;;  %s11962_s15 = smov (!%p31_p0, %s33_s15), %s9721_s11 }
   0xb   : > { %11941 = sst [smem:[#allocation9_spill]] %s11960_s14  ;;  %p242_p1 = scmp.ne.s32.totalorder %s9705_s29, %s9701_s28 }
   0xc   : > { %p243_p2 = scmp.eq.s32.totalorder %s7433_s13, 7  ;;  %p35_p3 = scmp.ge.s32.totalorder %s11962_s15, 2 }
   0xd   : > { %p248_p4 = scmp.ne.s32.totalorder %s9701_s28, %s9697_s27  ;;  %p249_p6 = scmp.eq.s32.totalorder %s7434_s17, 7 }
   0xe   : > { %p9834_p5 = por %p243_p2, %p242_p1  ;;  %s11964_s15 = smov (%p35_p3, %s11962_s15), 0 }
   0xf   : > { %11943 = sst [smem:[#allocation10_spill]] %s11964_s15  ;;  %p9840_p7 = por %p249_p6, %p248_p4 }
  0x10   : > { %p7441_p8 = scmp.ge.s32.totalorder %s9725_s12, 1  ;;  %s7438_s21 = sshll.u32 %s11964_s15, 2 }
  0x11   : > { %p311_p9 = scmp.lt.s32.totalorder %s9725_s12, 9  ;;  %s228_s22 = sadd.s32 %s7438_s21, %s11960_s14 }
  0x12   : > { %s232_s23 = sadd.s32 1, %s9705_s29  ;;  %s229_s24 = ssub.s32 %s226_s18, %s228_s22 }
  0x13   : > { %p312_p10 = pnand %p7441_p8, %p311_p9  ;;  %p230_p11 = scmp.eq.s32.totalorder %s229_s24, 0 }
  0x14   : > { %s11936_s26 = sand.u32 (!%p312_p10), 1, %s9701_s28   ;;  %s7443_s13 = sshll.u32 (!%p312_p10), %s9713_s9, 2 }
  0x15   : > { %s9850_s25 = scalar_select %p230_p11, %s9705_s29, %s232_s23  }
  0x16   : > { %315 = sbr.rel (%p312_p10) target bundleno = 1444 (0x5a4), region = 52  ;;  %s7442_s16 = sshll.u32 (!%p312_p10), %s11936_s26, 7 }
  0x17   : > { %11945 = sst [smem:[#allocation11_spill]] %s9850_s25  ;;  %s9857_s17 = sadd.s32 (!%p312_p10), %s9709_s30, %s7443_s13 }
  0x18   : > { %p357_p12 = scmp.lt.s32.totalorder (!%p312_p10), %s9857_s17, 7  ;;  %s364_s18 = smul.u32 (!%p312_p10), 6, %s9713_s9 }
  0x19   : > { %s9873_s29 = scalar_lea.vmem (!%p312_p10), [#allocation3], %s7442_s16  ;;  %p7447_p0 = scmp.ne.s32.totalorder (!%p312_p10), %s9709_s30, 0 }
  0x1a   : > { %s365_s22 = sadd.s32 (!%p312_p10), %s9709_s30, %s364_s18 }
  0x1b   : > { %s366_s24 = sadd.s32 (!%p312_p10), 2, %s365_s22 }
  0x1c   : > { %p367_p13 = scmp.lt.s32.totalorder (!%p312_p10), %s366_s24, 11 }
  0x1d   : > { %s358_s21 = scalar_select %p357_p12, %s9857_s17, 7 }
  0x1e   : > { %s11966_s24 = smov (!%p367_p13, %s366_s24), 11  ;;  %381 = sbr.rel (%p7447_p0) target bundleno = 323 (0x143), region = 56 }
  0x1f   : > { %s8260_s23 = sshll.u32 %s358_s21, 8  ;;  %s9166_s10 = smul.u32 320, %s11966_s24  ;;  %v9246_v0 = vld [vmem:[%s11925_s2 + $0x40] sm:$0xff] (!%p7447_p0)   ;;  %v9250_v4 = vld [vmem:[%s11925_s2 + $0x48] sm:$0xff] (!%p7447_p0)   ;;  %v9254_v8 = vld [vmem:[%s11925_s2 + $0x50] sm:$0xff] (!%p7447_p0)   ;;  %vm985_vm0 = vcmask (!%p7447_p0), 1043456  }
  0x20   : > { %s9866_s11 = scalar_lea.vmem %s11923_s0, %s8260_s23  ;;  %v9247_v1 = vld [vmem:[%s11925_s2 + $0xc0] sm:$0xff] (!%p7447_p0)   ;;  %8302 = vmatprep.subr.bf16.mxu0 (!%p7447_p0), %v9246_v0  ;;  %v9251_v5 = vld [vmem:[%s11925_s2 + $0xc8] sm:$0xff] (!%p7447_p0)   ;;  %v9255_v9 = vld [vmem:[%s11925_s2 + $0xd0] sm:$0xff] (!%p7447_p0)   ;;  %vm986_vm1 = vsmask.f32 (!%p7447_p0), 7938  ;;  %vm991_vm2 = vcmask (!%p7447_p0), 1040384  }
  0x21   : > { %s9871_s13 = scalar_lea.vmem %s11924_s1, %s9166_s10  ;;  %v9248_v2 = vld [vmem:[%s11925_s2] sm:$0xff] (!%p7447_p0)   ;;  %8342 = vmatprep.subr.bf16.mxu1 (!%p7447_p0), %v9247_v1  ;;  %v9252_v6 = vld [vmem:[%s11925_s2 + $0x8] sm:$0xff] (!%p7447_p0)   ;;  %v9256_v10 = vld [vmem:[%s11925_s2 + $0x10] sm:$0xff] (!%p7447_p0)   ;;  %vm992_vm3 = vsmask.f32 (!%p7447_p0), 256 }
  0x22   : > { %v9249_v3 = vld [vmem:[%s11925_s2 + $0x80] sm:$0xff] (!%p7447_p0)   ;;  %8303 = vmatpush3.bf16.msra.mxu0 (!%p7447_p0), %v9248_v2  ;;  %v9253_v7 = vld [vmem:[%s11925_s2 + $0x88] sm:$0xff] (!%p7447_p0)   ;;  %v9257_v11 = vld [vmem:[%s11925_s2 + $0x90] sm:$0xff] (!%p7447_p0)  }
  0x23   : > { %8343 = vmatpush3.bf16.msra.mxu1 (!%p7447_p0), %v9249_v3  ;;  %8304 = vmatprep.subr.bf16.mxu0 (!%p7447_p0), %v9250_v4  ;;  %v9258_v12 = vld [vmem:[%s11925_s2 + $0x58] sm:$0xff] (!%p7447_p0)   ;;  %v9262_v16 = vld [vmem:[%s11925_s2 + $0x60] sm:$0xff] (!%p7447_p0)   ;;  %v9266_v20 = vld [vmem:[%s11925_s2 + $0x68] sm:$0xff] (!%p7447_p0)  }
  0x24   : > { %8344 = vmatprep.subr.bf16.mxu1 (!%p7447_p0), %v9251_v5  ;;  %v9259_v13 = vld [vmem:[%s11925_s2 + $0xd8] sm:$0xff] (!%p7447_p0)   ;;  %v9263_v17 = vld [vmem:[%s11925_s2 + $0xe0] sm:$0xff] (!%p7447_p0)   ;;  %v9267_v21 = vld [vmem:[%s11925_s2 + $0xe8] sm:$0xff] (!%p7447_p0)  }
  0x25   : > { %v9260_v14 = vld [vmem:[%s11925_s2 + $0x18] sm:$0xff]   ;;  %v9264_v18 = vld [vmem:[%s11925_s2 + $0x20] sm:$0xff]   ;;  %v9268_v22 = vld [vmem:[%s11925_s2 + $0x28] sm:$0xff]  }
  0x26   : > { %8305 = vmatpush3.bf16.msra.mxu0 %v9252_v6  ;;  %v9261_v15 = vld [vmem:[%s11925_s2 + $0x98] sm:$0xff]   ;;  %v9265_v19 = vld [vmem:[%s11925_s2 + $0xa0] sm:$0xff]   ;;  %v9269_v23 = vld [vmem:[%s11925_s2 + $0xa8] sm:$0xff]  }
  0x27   : > { %8345 = vmatpush3.bf16.msra.mxu1 %v9253_v7  ;;  %8306 = vmatprep.subr.bf16.mxu0 %v9254_v8  ;;  %v9270_v24 = vld [vmem:[%s11925_s2 + $0x70] sm:$0xff]   ;;  %v9274_v28 = vld [vmem:[%s11925_s2 + $0x78] sm:$0xff]   ;;  %v424_v32 = vld [vmem:[%s9866_s11 + $0x8] sm:$0xff] }
  0x28   : > { %8346 = vmatprep.subr.bf16.mxu1 %v9255_v9  ;;  %v9271_v25 = vld [vmem:[%s11925_s2 + $0xf0] sm:$0xff]   ;;  %v9275_v29 = vld [vmem:[%s11925_s2 + $0xf8] sm:$0xff]   ;;  %v428_v33 = vld [vmem:[%s9866_s11 + $0x28] sm:$0xff] }
  0x29   : > { %v9272_v26 = vld [vmem:[%s11925_s2 + $0x30] sm:$0xff]   ;;  %v9276_v30 = vld [vmem:[%s11925_s2 + $0x38] sm:$0xff]   ;;  %v456_v35 = vpack.c.bf16 %v428_v33, %v424_v32  ;;  %v423_v37 = vld [vmem:[%s9866_s11] sm:$0xff] }
  0x2a   : > { %8307 = vmatpush3.bf16.msra.mxu0 %v9256_v10  ;;  %v9273_v27 = vld [vmem:[%s11925_s2 + $0xb0] sm:$0xff]   ;;  %v9277_v31 = vld [vmem:[%s11925_s2 + $0xb8] sm:$0xff]   ;;  %v427_v38 = vld [vmem:[%s9866_s11 + $0x20] sm:$0xff] }
  0x2b   : > { %8347 = vmatpush3.bf16.msra.mxu1 %v9257_v11  ;;  %8308 = vmatprep.subr.bf16.mxu0 %v9258_v12  ;;  %v426_v34 = vld [vmem:[%s9866_s11 + $0x18] sm:$0xff]  ;;  %v455_v40 = vpack.c.bf16 %v427_v38, %v423_v37  ;;  %v425_v41 = vld [vmem:[%s9866_s11 + $0x10] sm:$0xff]  ;;  %v432_v43 = vld [vmem:[%s9866_s11 + $0x48] sm:$0xff] }
  0x2c   : > { %8348 = vmatprep.subr.bf16.mxu1 %v9259_v13  ;;  %v430_v36 = vld [vmem:[%s9866_s11 + $0x38] sm:$0xff]  ;;  %v429_v42 = vld [vmem:[%s9866_s11 + $0x30] sm:$0xff]  ;;  %766 = vmatprep.mubr.bf16.mxu0 %v456_v35  ;;  %v436_v45 = vld [vmem:[%s9866_s11 + $0x68] sm:$0xff] }
  0x2d   : > { %v458_v39 = vpack.c.bf16 %v430_v36, %v426_v34  ;;  %v457_v44 = vpack.c.bf16 %v429_v42, %v425_v41  ;;  %v434_v46 = vld [vmem:[%s9866_s11 + $0x58] sm:$0xff]  ;;  %v460_v48 = vpack.c.bf16 %v436_v45, %v432_v43  ;;  %v431_v50 = vld [vmem:[%s9866_s11 + $0x40] sm:$0xff]  ;;  %v433_v52 = vld [vmem:[%s9866_s11 + $0x50] sm:$0xff] }
  0x2e   : > { %8309 = vmatpush3.bf16.msra.mxu0 %v9260_v14  ;;  %v438_v47 = vld [vmem:[%s9866_s11 + $0x78] sm:$0xff]  ;;  %v435_v51 = vld [vmem:[%s9866_s11 + $0x60] sm:$0xff]  ;;  %v437_v53 = vld [vmem:[%s9866_s11 + $0x70] sm:$0xff] }
  0x2f   : > { %8349 = vmatpush3.bf16.msra.mxu1 %v9261_v15  ;;  %8310 = vmatprep.subr.bf16.mxu0 %v9262_v16  ;;  %v462_v49 = vpack.c.bf16 %v438_v47, %v434_v46  ;;  %v440_v54 = vld [vmem:[%s9866_s11 + $0x88] sm:$0xff]  ;;  %v442_v56 = vld [vmem:[%s9866_s11 + $0x98] sm:$0xff]  ;;  %v459_v58 = vpack.c.bf16 %v435_v51, %v431_v50  ;;  %v461_v59 = vpack.c.bf16 %v437_v53, %v433_v52  ;;  %v439_v62 = vld [vmem:[%s9866_s11 + $0x80] sm:$0xff]  ;;  %v9727_v16 = vmov 0  }
  0x30   : > { %8350 = vmatprep.subr.bf16.mxu1 %v9263_v17  ;;  %831 = vmatprep.mubr.bf16.mxu1 %v458_v39  ;;  %v444_v55 = vld [vmem:[%s9866_s11 + $0xa8] sm:$0xff]  ;;  %v446_v57 = vld [vmem:[%s9866_s11 + $0xb8] sm:$0xff]  ;;  %v443_v63 = vld [vmem:[%s9866_s11 + $0xa0] sm:$0xff]  ;;  %405 = vst [vmem:[#allocation2 + $0x58] sm:$0xf] %v9727_v16 }
  0x31   : > { %v464_v60 = vpack.c.bf16 %v444_v55, %v440_v54  ;;  %v466_v61 = vpack.c.bf16 %v446_v57, %v442_v56  ;;  %v441_v0 = vld [vmem:[%s9866_s11 + $0x90] sm:$0xff]  ;;  %v448_v2 = vld [vmem:[%s9866_s11 + $0xc8] sm:$0xff]  ;;  %v450_v4 = vld [vmem:[%s9866_s11 + $0xd8] sm:$0xff]  ;;  %v463_v6 = vpack.c.bf16 %v443_v63, %v439_v62  ;;  %406 = vst [vmem:[#allocation2 + $0x5c] sm:$0x1] %v9727_v16 }
  0x32   : > { %8311 = vmatpush3.bf16.msra.mxu0 %v9264_v18  ;;  %v445_v1 = vld [vmem:[%s9866_s11 + $0xb0] sm:$0xff]  ;;  %v452_v3 = vld [vmem:[%s9866_s11 + $0xe8] sm:$0xff]  ;;  %v454_v5 = vld [vmem:[%s9866_s11 + $0xf8] sm:$0xff]  ;;  %382 = vst [vmem:[#allocation2] sm:$0xf] %v9727_v16 }
  0x33   : > { %8351 = vmatpush3.bf16.msra.mxu1 %v9265_v19  ;;  %8312 = vmatprep.subr.bf16.mxu0 %v9266_v20  ;;  %v465_v7 = vpack.c.bf16 %v445_v1, %v441_v0  ;;  %v468_v8 = vpack.c.bf16 %v452_v3, %v448_v2  ;;  %v470_v9 = vpack.c.bf16 %v454_v5, %v450_v4  ;;  %v447_v10 = vld [vmem:[%s9866_s11 + $0xc0] sm:$0xff]  ;;  %v449_v12 = vld [vmem:[%s9866_s11 + $0xd0] sm:$0xff]  ;;  %vm10013_vm4 = vmand %vm985_vm0, %vm986_vm1 }
  0x34   : > { %8352 = vmatprep.subr.bf16.mxu1 %v9267_v21  ;;  %v451_v11 = vld [vmem:[%s9866_s11 + $0xe0] sm:$0xff]  ;;  %v453_v13 = vld [vmem:[%s9866_s11 + $0xf0] sm:$0xff]  ;;  %383 = vst [vmem:[#allocation2 + $0x4] sm:$0x1] %v9727_v16  ;;  %384 = vst [vmem:[#allocation2 + $0x8] sm:$0xf] %v9727_v16 }
  0x35   : > { %v467_v14 = vpack.c.bf16 %v451_v11, %v447_v10  ;;  %v469_v15 = vpack.c.bf16 %v453_v13, %v449_v12  ;;  %385 = vst [vmem:[#allocation2 + $0xc] sm:$0x1] %v9727_v16  ;;  %386 = vst [vmem:[#allocation2 + $0x10] sm:$0xf] %v9727_v16  ;;  %v10007_v19 = vld [vmem:[%s11926_s3] ss:$0 sm:$0xff] }
  0x36   : > { %8313 = vmatpush3.bf16.msra.mxu0 %v9268_v22  ;;  %387 = vst [vmem:[#allocation2 + $0x14] sm:$0x1] %v9727_v16  ;;  %388 = vst [vmem:[#allocation2 + $0x18] sm:$0xf] %v9727_v16 }
  0x37   : > { %8353 = vmatpush3.bf16.msra.mxu1 %v9269_v23  ;;  %8314 = vmatprep.subr.bf16.mxu0 %v9270_v24  ;;  %389 = vst [vmem:[#allocation2 + $0x1c] sm:$0x1] %v9727_v16  ;;  %390 = vst [vmem:[#allocation2 + $0x20] sm:$0xf] %v9727_v16  ;;  %v988_v57 = vld [vmem:[#allocation2 + $0x58] sm:$0xf] }
  0x38   : > { %8354 = vmatprep.subr.bf16.mxu1 %v9271_v25  ;;  %391 = vst [vmem:[#allocation2 + $0x24] sm:$0x1] %v9727_v16  ;;  %392 = vst [vmem:[#allocation2 + $0x28] sm:$0xf] %v9727_v16 }
  0x39   : > { %393 = vst [vmem:[#allocation2 + $0x2c] sm:$0x1] %v9727_v16  ;;  %394 = vst [vmem:[#allocation2 + $0x30] sm:$0xf] %v9727_v16 }
  0x3a   : > { %8315 = vmatpush3.bf16.msra.mxu0 %v9272_v26  ;;  %395 = vst [vmem:[#allocation2 + $0x34] sm:$0x1] %v9727_v16  ;;  %396 = vst [vmem:[#allocation2 + $0x38] sm:$0xf] %v9727_v16 }
  0x3b   : > { %8355 = vmatpush3.bf16.msra.mxu1 %v9273_v27  ;;  %8316 = vmatprep.subr.bf16.mxu0 %v9274_v28  ;;  %397 = vst [vmem:[#allocation2 + $0x3c] sm:$0x1] %v9727_v16  ;;  %398 = vst [vmem:[#allocation2 + $0x40] sm:$0xf] %v9727_v16 }
  0x3c   : > { %8356 = vmatprep.subr.bf16.mxu1 %v9275_v29  ;;  %399 = vst [vmem:[#allocation2 + $0x44] sm:$0x1] %v9727_v16  ;;  %400 = vst [vmem:[#allocation2 + $0x48] sm:$0xf] %v9727_v16 }
  0x3d   : > { %401 = vst [vmem:[#allocation2 + $0x4c] sm:$0x1] %v9727_v16  ;;  %403 = vst [vmem:[#allocation2 + $0x50] sm:$0xf] %v9727_v16 }
  0x3e   : > { %8317 = vmatpush3.bf16.msra.mxu0 %v9276_v30  ;;  %404 = vst [vmem:[#allocation2 + $0x54] sm:$0x1] %v9727_v16  ;;  %407 = vst [vmem:[#allocation2 + $0x60] sm:$0xf] %v9727_v16 }
  0x3f   : > { %8357 = vmatpush3.bf16.msra.mxu1 %v9277_v31  ;;  %408 = vst [vmem:[#allocation2 + $0x64] sm:$0x1] %v9727_v16  ;;  %409 = vst [vmem:[#allocation2 + $0x68] sm:$0xf] %v9727_v16 }
  0x40   : > { %410 = vst [vmem:[#allocation2 + $0x6c] sm:$0x1] %v9727_v16  ;;  %411 = vst [vmem:[#allocation2 + $0x70] sm:$0xf] %v9727_v16 }
  0x41   : > { %767 = vmatmul.mubr.bf16.vlgmr.msra.gmra.mrb[0].mxu0 %v455_v40  ;;  %412 = vst [vmem:[#allocation2 + $0x74] sm:$0x1] %v9727_v16  ;;  %413 = vst [vmem:[#allocation2 + $0x78] sm:$0xf] %v9727_v16 }
  0x42   : > { %832 = vmatmul.mubr.bf16.vlgmr.msra.gmra.mrb[0].mxu1 %v457_v44  ;;  %774 = vmatprep.mubr.bf16.mxu0 %v460_v48  ;;  %414 = vst [vmem:[#allocation2 + $0x7c] sm:$0x1] %v9727_v16  ;;  %415 = vst [vmem:[#allocation2 + $0x80] sm:$0xf] %v9727_v16 }
  0x43   : > { %839 = vmatprep.mubr.bf16.mxu1 %v462_v49  ;;  %416 = vst [vmem:[#allocation2 + $0x84] sm:$0x1] %v9727_v16  ;;  %417 = vst [vmem:[#allocation2 + $0x88] sm:$0xf] %v9727_v16 }
  0x44   : > { %418 = vst [vmem:[#allocation2 + $0x8c] sm:$0x1] %v9727_v16  ;;  %419 = vst [vmem:[#allocation2 + $0x90] sm:$0xf] %v9727_v16 }
  0x45   : > { %420 = vst [vmem:[#allocation2 + $0x94] sm:$0x1] %v9727_v16  ;;  %421 = vst [vmem:[#allocation2 + $0x98] sm:$0xf] %v9727_v16  ;;  %v997_v3 = vld [vmem:[#allocation2 + $0x60] sm:$0xf] }
  0x46   : > { %422 = vst [vmem:[#allocation2 + $0x9c] sm:$0x1] %v9727_v16  ;;  %vm10018_vm5 = vmand %vm991_vm2, %vm992_vm3  ;;  %v1000_v4 = vld [vmem:[#allocation2 + $0x64] sm:$0x1] }
  0x49   : > { %775 = vmatmul.mubr.bf16.gmra.mrb[4].mxu0 %v459_v58 }
  0x4a   : > { %840 = vmatmul.mubr.bf16.gmra.mrb[4].mxu1 %v461_v59  ;;  %782 = vmatprep.mubr.bf16.mxu0 %v464_v60  ;;  %v994_v59 = vld [vmem:[#allocation2 + $0x5c] sm:$0x1] }
  0x4b   : > { %847 = vmatprep.mubr.bf16.mxu1 %v466_v61 }
  0x51   : > { %783 = vmatmul.mubr.bf16.gmra.mrb[8].mxu0 %v463_v6 }
  0x52   : > { %848 = vmatmul.mubr.bf16.gmra.mrb[8].mxu1 %v465_v7  ;;  %790 = vmatprep.mubr.bf16.mxu0 %v468_v8 }
  0x53   : > { %855 = vmatprep.mubr.bf16.mxu1 %v470_v9 }
  0x59   : > { %791 = vmatmul.mubr.bf16.gmra.mrb[12].mxu0 %v467_v14 }
  0x5a   : > { %856 = vmatmul.mubr.bf16.gmra.mrb[12].mxu1 %v469_v15 }
 0x114   : > { %v8318_v17 = vpop.f32.mrb[0].mxu0 }
 0x115   : > { %v8358_v18 = vpop.f32.mrb[0].mxu1  ;;  %v8319_v20 = vpop.f32.mrb[1].mxu0 }
 0x116   : > { %v8320_v21 = vadd.f32 %v8319_v20, %v8318_v17  ;;  %v8359_v22 = vpop.f32.mrb[1].mxu1  ;;  %v8321_v23 = vpop.f32.mrb[2].mxu0 }
 0x117   : > { %v8360_v24 = vadd.f32 %v8359_v22, %v8358_v18  ;;  %v8361_v25 = vpop.f32.mrb[2].mxu1  ;;  %v8322_v26 = vpop.f32.mrb[3].mxu0 }
 0x118   : > { %v769_v27 = vadd.f32 %v8320_v21, %v10007_v19  ;;  %v8323_v28 = vadd.f32 %v8322_v26, %v8321_v23  ;;  %v8362_v29 = vpop.f32.mrb[3].mxu1 }
 0x119   : > { %v8363_v30 = vadd.f32 %v8362_v29, %v8361_v25 }
 0x11a   : > { %v834_v31 = vadd.f32 %v8360_v24, %v769_v27  ;;  %v772_v32 = vadd.f32 %v8323_v28, %v10007_v19 }
 0x11c   : > { %v864_v33 = vmax.f32 %v834_v31, 0.0  ;;  %v837_v34 = vadd.f32 %v8363_v30, %v772_v32  ;;  %v8324_v35 = vpop.f32.mrb[4].mxu0  ;;  %v1003_v32 = vld [vmem:[#allocation2 + $0x68] sm:$0xf] }
 0x11d   : > { %v8364_v36 = vpop.f32.mrb[4].mxu1  ;;  %v8325_v37 = vpop.f32.mrb[5].mxu0 }
 0x11e   : > { %v8261_v38 = vpack.c.bf16 %v864_v33, %v864_v33  ;;  %v865_v39 = vmax.f32 %v837_v34, 0.0  ;;  %v8326_v40 = vadd.f32 %v8325_v37, %v8324_v35  ;;  %v8365_v41 = vpop.f32.mrb[5].mxu1  ;;  %v8327_v42 = vpop.f32.mrb[6].mxu0  ;;  %v1006_v35 = vld [vmem:[#allocation2 + $0x6c] sm:$0x1] }
 0x11f   : > { %v8366_v43 = vadd.f32 %v8365_v41, %v8364_v36  ;;  %v8367_v44 = vpop.f32.mrb[6].mxu1  ;;  %v8328_v45 = vpop.f32.mrb[7].mxu0  ;;  %v1009_v37 = vld [vmem:[#allocation2 + $0x70] sm:$0xf] }
 0x120   : > { %v905_v46 = vshrl.u32 %v8261_v38, 16  ;;  %v8262_v47 = vpack.c.bf16 %v865_v39, %v865_v39  ;;  %v777_v48 = vadd.f32 %v8326_v40, %v10007_v19  ;;  %v8368_v49 = vpop.f32.mrb[7].mxu1  ;;  %v8329_v50 = vadd.f32 %v8328_v45, %v8327_v42 }
 0x121   : > { %v8369_v51 = vadd.f32 %v8368_v49, %v8367_v44  ;;  %v908_v53 = vshll.u32 %v8261_v38, 16 }
 0x122   : > { %v907_v52 = vrot.slane %v905_v46, 7  ;;  %v913_v55 = vshrl.u32 %v8262_v47, 16  ;;  %v842_v56 = vadd.f32 %v8366_v43, %v777_v48  ;;  %v916_v60 = vshll.u32 %v8262_v47, 16  ;;  %v1012_v46 = vld [vmem:[#allocation2 + $0x74] sm:$0x1] }
 0x123   : > { %v780_v61 = vadd.f32 %v8329_v50, %v10007_v19 }
 0x124   : > { %v910_v62 = vor.u32 %v908_v53, %v907_v52  ;;  %v911_v63 = vrot.slane %v907_v52, 4  ;;  %v915_v0 = vrot.slane %v913_v55, 7  ;;  %v866_v1 = vmax.f32 %v842_v56, 0.0  ;;  %v8330_v2 = vpop.f32.mrb[8].mxu0 }
 0x125   : > { %v845_v5 = vadd.f32 %v8369_v51, %v780_v61  ;;  %v8370_v6 = vpop.f32.mrb[8].mxu1  ;;  %v8331_v7 = vpop.f32.mrb[9].mxu0 }
 0x126   : > { %v989_v8 = vsel %vm10013_vm4, %v910_v62, %v988_v57  ;;  %v995_v9 = vsel %vm10018_vm5, %v911_v63, %v994_v59  ;;  %v918_v10 = vor.u32 %v916_v60, %v915_v0  ;;  %v919_v11 = vrot.slane %v915_v0, 4  ;;  %v8371_v12 = vpop.f32.mrb[9].mxu1  ;;  %v8333_v13 = vpop.f32.mrb[10].mxu0 }
 0x127   : > { %990 = vst [vmem:[#allocation2 + $0x58] sm:$0xf] %v989_v8  ;;  %996 = vst [vmem:[#allocation2 + $0x5c] sm:$0x1] %v995_v9  ;;  %v8263_v14 = vpack.c.bf16 %v866_v1, %v866_v1  ;;  %v867_v15 = vmax.f32 %v845_v5, 0.0  ;;  %v8332_v16 = vadd.f32 %v8331_v7, %v8330_v2  ;;  %v8372_v17 = vadd.f32 %v8371_v12, %v8370_v6  ;;  %v8373_v18 = vpop.f32.mrb[10].mxu1 }
 0x128   : > { %v8334_v20 = vpop.f32.mrb[11].mxu0  ;;  %v998_v21 = vsel %vm10013_vm4, %v918_v10, %v997_v3  ;;  %v1001_v22 = vsel %vm10018_vm5, %v919_v11, %v1000_v4  ;;  %v8374_v24 = vpop.f32.mrb[11].mxu1  ;;  %v1015_v6 = vld [vmem:[#allocation2 + $0x78] sm:$0xf]  ;;  %v1018_v11 = vld [vmem:[#allocation2 + $0x7c] sm:$0x1] }
 0x129   : > { %v8335_v23 = vadd.f32 %v8334_v20, %v8333_v13  ;;  %999 = vst [vmem:[#allocation2 + $0x60] sm:$0xf] %v998_v21  ;;  %1002 = vst [vmem:[#allocation2 + $0x64] sm:$0x1] %v1001_v22  ;;  %v921_v25 = vshrl.u32 %v8263_v14, 16  ;;  %v8264_v26 = vpack.c.bf16 %v867_v15, %v867_v15  ;;  %v785_v27 = vadd.f32 %v8332_v16, %v10007_v19 }
 0x12a   : > { %v8375_v29 = vadd.f32 %v8374_v24, %v8373_v18  ;;  %v924_v31 = vshll.u32 %v8263_v14, 16  ;;  %v1021_v14 = vld [vmem:[#allocation2 + $0x80] sm:$0xf]  ;;  %v1024_v15 = vld [vmem:[#allocation2 + $0x84] sm:$0x1] }
 0x12b   : > { %v788_v28 = vadd.f32 %v8335_v23, %v10007_v19  ;;  %v923_v30 = vrot.slane %v921_v25, 7  ;;  %v929_v33 = vshrl.u32 %v8264_v26, 16  ;;  %v850_v34 = vadd.f32 %v8372_v17, %v785_v27 }
 0x12c   : > { %v932_v36 = vshll.u32 %v8264_v26, 16  ;;  %v8336_v39 = vpop.f32.mrb[12].mxu0 }
 0x12d   : > { %v853_v38 = vadd.f32 %v8375_v29, %v788_v28  ;;  %v926_v40 = vor.u32 %v924_v31, %v923_v30  ;;  %v927_v41 = vrot.slane %v923_v30, 4  ;;  %v931_v42 = vrot.slane %v929_v33, 7  ;;  %v8376_v44 = vpop.f32.mrb[12].mxu1  ;;  %v8337_v45 = vpop.f32.mrb[13].mxu0  ;;  %v1027_v33 = vld [vmem:[#allocation2 + $0x88] sm:$0xf] }
 0x12e   : > { %v868_v43 = vmax.f32 %v850_v34, 0.0  ;;  %v8338_v48 = vadd.f32 %v8337_v45, %v8336_v39  ;;  %v8377_v49 = vpop.f32.mrb[13].mxu1  ;;  %v8339_v50 = vpop.f32.mrb[14].mxu0  ;;  %v1030_v34 = vld [vmem:[#allocation2 + $0x8c] sm:$0x1] }
 0x12f   : > { %v869_v47 = vmax.f32 %v853_v38, 0.0  ;;  %v1004_v51 = vsel %vm10013_vm4, %v926_v40, %v1003_v32  ;;  %v1007_v52 = vsel %vm10018_vm5, %v927_v41, %v1006_v35  ;;  %v934_v53 = vor.u32 %v932_v36, %v931_v42  ;;  %v8379_v56 = vpop.f32.mrb[14].mxu1  ;;  %v8340_v57 = vpop.f32.mrb[15].mxu0  ;;  %v1033_v39 = vld [vmem:[#allocation2 + $0x90] sm:$0xf] }
 0x130   : > { %v935_v55 = vrot.slane %v931_v42, 4  ;;  %1005 = vst [vmem:[#allocation2 + $0x68] sm:$0xf] %v1004_v51  ;;  %1008 = vst [vmem:[#allocation2 + $0x6c] sm:$0x1] %v1007_v52  ;;  %v8265_v59 = vpack.c.bf16 %v868_v43, %v868_v43  ;;  %v793_v61 = vadd.f32 %v8338_v48, %v10007_v19  ;;  %v8378_v62 = vadd.f32 %v8377_v49, %v8376_v44  ;;  %v8380_v63 = vpop.f32.mrb[15].mxu1 }
 0x131   : > { %v8266_v60 = vpack.c.bf16 %v869_v47, %v869_v47  ;;  %v1010_v0 = vsel %vm10013_vm4, %v934_v53, %v1009_v37  ;;  %v8341_v2 = vadd.f32 %v8340_v57, %v8339_v50  ;;  %v8381_v3 = vadd.f32 %v8380_v63, %v8379_v56  ;;  %v1036_v40 = vld [vmem:[#allocation2 + $0x94] sm:$0x1] }
 0x132   : > { %v1013_v1 = vsel %vm10018_vm5, %v935_v55, %v1012_v46  ;;  %1011 = vst [vmem:[#allocation2 + $0x70] sm:$0xf] %v1010_v0  ;;  %v937_v4 = vshrl.u32 %v8265_v59, 16  ;;  %v858_v7 = vadd.f32 %v8378_v62, %v793_v61  ;;  %v940_v10 = vshll.u32 %v8265_v59, 16 }
 0x133   : > { %1014 = vst [vmem:[#allocation2 + $0x74] sm:$0x1] %v1013_v1  ;;  %v945_v5 = vshrl.u32 %v8266_v60, 16  ;;  %v796_v8 = vadd.f32 %v8341_v2, %v10007_v19  ;;  %v948_v13 = vshll.u32 %v8266_v60, 16 }
 0x134   : > { %v939_v9 = vrot.slane %v937_v4, 7  ;;  %v870_v16 = vmax.f32 %v858_v7, 0.0 }
 0x135   : > { %v947_v12 = vrot.slane %v945_v5, 7  ;;  %v861_v17 = vadd.f32 %v8381_v3, %v796_v8 }
 0x136   : > { %v942_v18 = vor.u32 %v940_v10, %v939_v9  ;;  %v943_v20 = vrot.slane %v939_v9, 4  ;;  %v8267_v23 = vpack.c.bf16 %v870_v16, %v870_v16 }
 0x137   : > { %v950_v21 = vor.u32 %v948_v13, %v947_v12  ;;  %v951_v22 = vrot.slane %v947_v12, 4  ;;  %v871_v24 = vmax.f32 %v861_v17, 0.0 }
 0x138   : > { %v1016_v25 = vsel %vm10013_vm4, %v942_v18, %v1015_v6  ;;  %v1019_v19 = vsel %vm10018_vm5, %v943_v20, %v1018_v11  ;;  %v953_v28 = vshrl.u32 %v8267_v23, 16  ;;  %v956_v31 = vshll.u32 %v8267_v23, 16 }
 0x139   : > { %v1022_v26 = vsel %vm10013_vm4, %v950_v21, %v1021_v14  ;;  %v1025_v27 = vsel %vm10018_vm5, %v951_v22, %v1024_v15  ;;  %1017 = vst [vmem:[#allocation2 + $0x78] sm:$0xf] %v1016_v25  ;;  %1020 = vst [vmem:[#allocation2 + $0x7c] sm:$0x1] %v1019_v19  ;;  %v8268_v29 = vpack.c.bf16 %v871_v24, %v871_v24 }
 0x13a   : > { %1023 = vst [vmem:[#allocation2 + $0x80] sm:$0xf] %v1022_v26  ;;  %1026 = vst [vmem:[#allocation2 + $0x84] sm:$0x1] %v1025_v27  ;;  %v955_v30 = vrot.slane %v953_v28, 7 }
 0x13b   : > { %v961_v32 = vshrl.u32 %v8268_v29, 16  ;;  %v964_v38 = vshll.u32 %v8268_v29, 16 }
 0x13c   : > { %v958_v35 = vor.u32 %v956_v31, %v955_v30  ;;  %v959_v36 = vrot.slane %v955_v30, 4 }
 0x13d   : > { %v963_v37 = vrot.slane %v961_v32, 7 }
 0x13e   : > { %v1028_v41 = vsel %vm10013_vm4, %v958_v35, %v1027_v33  ;;  %v1031_v42 = vsel %vm10018_vm5, %v959_v36, %v1030_v34 }
 0x13f   : > { %v966_v43 = vor.u32 %v964_v38, %v963_v37  ;;  %v967_v44 = vrot.slane %v963_v37, 4  ;;  %1029 = vst [vmem:[#allocation2 + $0x88] sm:$0xf] %v1028_v41  ;;  %1032 = vst [vmem:[#allocation2 + $0x8c] sm:$0x1] %v1031_v42 }
 0x141   : > { %v1034_v45 = vsel %vm10013_vm4, %v966_v43, %v1033_v39  ;;  %v1037_v46 = vsel %vm10018_vm5, %v967_v44, %v1036_v40 }
 0x142   : > { %1035 = vst [vmem:[#allocation2 + $0x90] sm:$0xf] %v1034_v45  ;;  %1038 = vst [vmem:[#allocation2 + $0x94] sm:$0x1] %v1037_v46 }
 0x143 PF: > { %p7489_p1 = scmp.le.s32.totalorder %s9709_s30, 0 }
 0x144   : > { %v1044_v47 = vld [vmem:[#allocation2 + $0x50] sm:$0xf] (!%p7489_p1)  ;;  %v1045_v48 = vld [vmem:[#allocation2 + $0x54] sm:$0x1] (!%p7489_p1)  ;;  %v1046_v49 = vld [vmem:[#allocation2 + $0x58] sm:$0xf] (!%p7489_p1) }
 0x145   : > { %1042 = sbr.rel (%p7489_p1) target bundleno = 352 (0x160), region = 60  ;;  %1064 = vst [vmem:[#allocation2] sm:$0xf] (!%p7489_p1), %v1044_v47  ;;  %1065 = vst [vmem:[#allocation2 + $0x4] sm:$0x1] (!%p7489_p1), %v1045_v48 }
 0x146   : > { %1066 = vst [vmem:[#allocation2 + $0x8] sm:$0xf] (!%p7489_p1), %v1046_v49  ;;  %v1047_v50 = vld [vmem:[#allocation2 + $0x5c] sm:$0x1] (!%p7489_p1)  ;;  %v1048_v51 = vld [vmem:[#allocation2 + $0x60] sm:$0xf] (!%p7489_p1) }
 0x147   : > { %v1049_v52 = vld [vmem:[#allocation2 + $0x64] sm:$0x1] (!%p7489_p1)  ;;  %1067 = vst [vmem:[#allocation2 + $0xc] sm:$0x1] (!%p7489_p1), %v1047_v50  ;;  %1068 = vst [vmem:[#allocation2 + $0x10] sm:$0xf] (!%p7489_p1), %v1048_v51 }
 0x148   : > { %1069 = vst [vmem:[#allocation2 + $0x14] sm:$0x1] (!%p7489_p1), %v1049_v52  ;;  %v1050_v54 = vld [vmem:[#allocation2 + $0x68] sm:$0xf] (!%p7489_p1)  ;;  %v1051_v58 = vld [vmem:[#allocation2 + $0x6c] sm:$0x1] (!%p7489_p1) }
 0x149   : > { %v1052_v53 = vld [vmem:[#allocation2 + $0x70] sm:$0xf] (!%p7489_p1)  ;;  %1070 = vst [vmem:[#allocation2 + $0x18] sm:$0xf] (!%p7489_p1), %v1050_v54  ;;  %1071 = vst [vmem:[#allocation2 + $0x1c] sm:$0x1] (!%p7489_p1), %v1051_v58 }
 0x14a   : > { %1072 = vst [vmem:[#allocation2 + $0x20] sm:$0xf] (!%p7489_p1), %v1052_v53  ;;  %v1053_v55 = vld [vmem:[#allocation2 + $0x74] sm:$0x1] (!%p7489_p1)  ;;  %v1054_v56 = vld [vmem:[#allocation2 + $0x78] sm:$0xf] (!%p7489_p1) }
 0x14b   : > { %v1055_v57 = vld [vmem:[#allocation2 + $0x7c] sm:$0x1] (!%p7489_p1)  ;;  %1073 = vst [vmem:[#allocation2 + $0x24] sm:$0x1] (!%p7489_p1), %v1053_v55  ;;  %1074 = vst [vmem:[#allocation2 + $0x28] sm:$0xf] (!%p7489_p1), %v1054_v56 }
 0x14c   : > { %1075 = vst [vmem:[#allocation2 + $0x2c] sm:$0x1] %v1055_v57  ;;  %v1056_v59 = vld [vmem:[#allocation2 + $0x80] sm:$0xf]  ;;  %v1057_v60 = vld [vmem:[#allocation2 + $0x84] sm:$0x1] }
 0x14d   : > { %v1058_v61 = vld [vmem:[#allocation2 + $0x88] sm:$0xf]  ;;  %1076 = vst [vmem:[#allocation2 + $0x30] sm:$0xf] %v1056_v59  ;;  %1077 = vst [vmem:[#allocation2 + $0x34] sm:$0x1] %v1057_v60 }
 0x14e   : > { %1078 = vst [vmem:[#allocation2 + $0x38] sm:$0xf] %v1058_v61  ;;  %v1059_v62 = vld [vmem:[#allocation2 + $0x8c] sm:$0x1]  ;;  %v1060_v63 = vld [vmem:[#allocation2 + $0x90] sm:$0xf] }
 0x14f   : > { %v1061_v0 = vld [vmem:[#allocation2 + $0x94] sm:$0x1]  ;;  %1079 = vst [vmem:[#allocation2 + $0x3c] sm:$0x1] %v1059_v62  ;;  %1080 = vst [vmem:[#allocation2 + $0x40] sm:$0xf] %v1060_v63 }
 0x150   : > { %1081 = vst [vmem:[#allocation2 + $0x44] sm:$0x1] %v1061_v0  ;;  %v1062_v1 = vld [vmem:[#allocation2 + $0x98] sm:$0xf]  ;;  %v1063_v2 = vld [vmem:[#allocation2 + $0x9c] sm:$0x1] }
 0x151   : > { %v1085_v3 = vld [vmem:[#allocation2 + $0xa0] sm:$0xf]  ;;  %1082 = vst [vmem:[#allocation2 + $0x48] sm:$0xf] %v1062_v1  ;;  %1083 = vst [vmem:[#allocation2 + $0x4c] sm:$0x1] %v1063_v2 }
 0x152   : > { %1105 = vst [vmem:[#allocation2 + $0x50] sm:$0xf] %v1085_v3  ;;  %v1086_v4 = vld [vmem:[#allocation2 + $0xa4] sm:$0x1]  ;;  %v1087_v5 = vld [vmem:[#allocation2 + $0xa8] sm:$0xf] }
 0x153   : > { %v1088_v6 = vld [vmem:[#allocation2 + $0xac] sm:$0x1]  ;;  %1106 = vst [vmem:[#allocation2 + $0x54] sm:$0x1] %v1086_v4  ;;  %1107 = vst [vmem:[#allocation2 + $0x58] sm:$0xf] %v1087_v5 }
 0x154   : > { %1108 = vst [vmem:[#allocation2 + $0x5c] sm:$0x1] %v1088_v6  ;;  %v1089_v7 = vld [vmem:[#allocation2 + $0xb0] sm:$0xf]  ;;  %v1090_v8 = vld [vmem:[#allocation2 + $0xb4] sm:$0x1] }
 0x155   : > { %v1091_v9 = vld [vmem:[#allocation2 + $0xb8] sm:$0xf]  ;;  %1109 = vst [vmem:[#allocation2 + $0x60] sm:$0xf] %v1089_v7  ;;  %1110 = vst [vmem:[#allocation2 + $0x64] sm:$0x1] %v1090_v8 }
 0x156   : > { %1111 = vst [vmem:[#allocation2 + $0x68] sm:$0xf] %v1091_v9  ;;  %v1092_v10 = vld [vmem:[#allocation2 + $0xbc] sm:$0x1]  ;;  %v1093_v11 = vld [vmem:[#allocation2 + $0xc0] sm:$0xf] }
 0x157   : > { %v1094_v12 = vld [vmem:[#allocation2 + $0xc4] sm:$0x1]  ;;  %1112 = vst [vmem:[#allocation2 + $0x6c] sm:$0x1] %v1092_v10  ;;  %1113 = vst [vmem:[#allocation2 + $0x70] sm:$0xf] %v1093_v11 }
 0x158   : > { %1114 = vst [vmem:[#allocation2 + $0x74] sm:$0x1] %v1094_v12  ;;  %v1095_v13 = vld [vmem:[#allocation2 + $0xc8] sm:$0xf]  ;;  %v1096_v14 = vld [vmem:[#allocation2 + $0xcc] sm:$0x1] }
 0x159   : > { %v1097_v15 = vld [vmem:[#allocation2 + $0xd0] sm:$0xf]  ;;  %1115 = vst [vmem:[#allocation2 + $0x78] sm:$0xf] %v1095_v13  ;;  %1116 = vst [vmem:[#allocation2 + $0x7c] sm:$0x1] %v1096_v14 }
 0x15a   : > { %1117 = vst [vmem:[#allocation2 + $0x80] sm:$0xf] %v1097_v15  ;;  %v1098_v16 = vld [vmem:[#allocation2 + $0xd4] sm:$0x1]  ;;  %v1099_v17 = vld [vmem:[#allocation2 + $0xd8] sm:$0xf] }
 0x15b   : > { %v1100_v18 = vld [vmem:[#allocation2 + $0xdc] sm:$0x1]  ;;  %1118 = vst [vmem:[#allocation2 + $0x84] sm:$0x1] %v1098_v16  ;;  %1119 = vst [vmem:[#allocation2 + $0x88] sm:$0xf] %v1099_v17 }
 0x15c   : > { %1120 = vst [vmem:[#allocation2 + $0x8c] sm:$0x1] %v1100_v18  ;;  %v1101_v20 = vld [vmem:[#allocation2 + $0xe0] sm:$0xf]  ;;  %v1102_v21 = vld [vmem:[#allocation2 + $0xe4] sm:$0x1] }
 0x15d   : > { %v1103_v22 = vld [vmem:[#allocation2 + $0xe8] sm:$0xf]  ;;  %1121 = vst [vmem:[#allocation2 + $0x90] sm:$0xf] %v1101_v20  ;;  %1122 = vst [vmem:[#allocation2 + $0x94] sm:$0x1] %v1102_v21 }
 0x15e   : > { %1123 = vst [vmem:[#allocation2 + $0x98] sm:$0xf] %v1103_v22  ;;  %v1104_v23 = vld [vmem:[#allocation2 + $0xec] sm:$0x1] }
 0x15f   : > { %1124 = vst [vmem:[#allocation2 + $0x9c] sm:$0x1] %v1104_v23 }
 0x160 PF: > { %p7490_p2 = scmp.ge.s32.totalorder %s9709_s30, 3 }
 0x161   : > { %v9278_v24 = vld [vmem:[%s11925_s2 + $0x40] sm:$0xff] (!%p7490_p2)   ;;  %v9282_v27 = vld [vmem:[%s11925_s2 + $0x48] sm:$0xff] (!%p7490_p2)   ;;  %v9286_v31 = vld [vmem:[%s11925_s2 + $0x50] sm:$0xff] (!%p7490_p2)   ;;  %v1228_v58 = vlaneseq (!%p7490_p2)  ;;  %v9728_v60 = vmov (!%p7490_p2), 1966171168  }
 0x162   : > { %1128 = sbr.rel (%p7490_p2) target bundleno = 673 (0x2a1), region = 64  ;;  %v9279_v25 = vld [vmem:[%s11925_s2 + $0xc0] sm:$0xff] (!%p7490_p2)   ;;  %8382 = vmatprep.subr.bf16.mxu0 (!%p7490_p2), %v9278_v24  ;;  %v9283_v28 = vld [vmem:[%s11925_s2 + $0xc8] sm:$0xff] (!%p7490_p2)   ;;  %v9287_v32 = vld [vmem:[%s11925_s2 + $0xd0] sm:$0xff] (!%p7490_p2)   ;;  %v1226_v61 = vunpack.c.l.s4 (!%p7490_p2), %v9728_v60 }
 0x163   : > { %v9280_v19 = vld [vmem:[%s11925_s2] sm:$0xff] (!%p7490_p2)   ;;  %8440 = vmatprep.subr.bf16.mxu1 (!%p7490_p2), %v9279_v25  ;;  %v9284_v29 = vld [vmem:[%s11925_s2 + $0x8] sm:$0xff] (!%p7490_p2)   ;;  %v9288_v33 = vld [vmem:[%s11925_s2 + $0x10] sm:$0xff] (!%p7490_p2)   ;;  %v10161_v62 = vshrl.u32 (!%p7490_p2), %v1228_v58, 7 }
 0x164   : > { %v9281_v26 = vld [vmem:[%s11925_s2 + $0x80] sm:$0xff] (!%p7490_p2)   ;;  %8383 = vmatpush3.bf16.msra.mxu0 (!%p7490_p2), %v9280_v19  ;;  %v9285_v30 = vld [vmem:[%s11925_s2 + $0x88] sm:$0xff] (!%p7490_p2)   ;;  %v9289_v34 = vld [vmem:[%s11925_s2 + $0x90] sm:$0xff] (!%p7490_p2)   ;;  %v1227_v3 = vunpack.c.0.s8 (!%p7490_p2), %v1226_v61 }
 0x165   : > { %8441 = vmatpush3.bf16.msra.mxu1 (!%p7490_p2), %v9281_v26  ;;  %8384 = vmatprep.subr.bf16.mxu0 (!%p7490_p2), %v9282_v27  ;;  %v9290_v35 = vld [vmem:[%s11925_s2 + $0x58] sm:$0xff] (!%p7490_p2)   ;;  %v9294_v39 = vld [vmem:[%s11925_s2 + $0x60] sm:$0xff] (!%p7490_p2)   ;;  %v9298_v43 = vld [vmem:[%s11925_s2 + $0x68] sm:$0xff] (!%p7490_p2)   ;;  %vm2890_vm7 = vcmp.ge.s32.totalorder (!%p7490_p2), %v10161_v62, 1 }
 0x166   : > { %8442 = vmatprep.subr.bf16.mxu1 (!%p7490_p2), %v9283_v28  ;;  %v9291_v36 = vld [vmem:[%s11925_s2 + $0xd8] sm:$0xff] (!%p7490_p2)   ;;  %v9295_v40 = vld [vmem:[%s11925_s2 + $0xe0] sm:$0xff] (!%p7490_p2)   ;;  %v9299_v44 = vld [vmem:[%s11925_s2 + $0xe8] sm:$0xff] (!%p7490_p2)   ;;  %v10168_v9 = vsub.s32 (!%p7490_p2), %v1227_v3, %v10161_v62 }
 0x167   : > { %v9292_v37 = vld [vmem:[%s11925_s2 + $0x18] sm:$0xff] (!%p7490_p2)   ;;  %v9296_v41 = vld [vmem:[%s11925_s2 + $0x20] sm:$0xff] (!%p7490_p2)   ;;  %v9300_v45 = vld [vmem:[%s11925_s2 + $0x28] sm:$0xff] (!%p7490_p2)  }
 0x168   : > { %8385 = vmatpush3.bf16.msra.mxu0 (!%p7490_p2), %v9284_v29  ;;  %v9293_v38 = vld [vmem:[%s11925_s2 + $0x98] sm:$0xff] (!%p7490_p2)   ;;  %v9297_v42 = vld [vmem:[%s11925_s2 + $0xa0] sm:$0xff] (!%p7490_p2)   ;;  %v9301_v46 = vld [vmem:[%s11925_s2 + $0xa8] sm:$0xff] (!%p7490_p2)  }
 0x169   : > { %8443 = vmatpush3.bf16.msra.mxu1 %v9285_v30  ;;  %8386 = vmatprep.subr.bf16.mxu0 %v9286_v31  ;;  %v9302_v47 = vld [vmem:[%s11925_s2 + $0x70] sm:$0xff]   ;;  %v9306_v51 = vld [vmem:[%s11925_s2 + $0x78] sm:$0xff]   ;;  %v7491_v55 = vld.sshfl [vmem:[%s9871_s13] sm:$0xff pattern:$0x75316420] }
 0x16a   : > { %8444 = vmatprep.subr.bf16.mxu1 %v9287_v32  ;;  %v9303_v48 = vld [vmem:[%s11925_s2 + $0xf0] sm:$0xff]   ;;  %v9307_v52 = vld [vmem:[%s11925_s2 + $0xf8] sm:$0xff]   ;;  %v7492_v56 = vld.sshfl [vmem:[%s9871_s13 + $0x8] sm:$0xff pattern:$0x75316420] }
 0x16b   : > { %v9304_v49 = vld [vmem:[%s11925_s2 + $0x30] sm:$0xff]   ;;  %v9308_v54 = vld [vmem:[%s11925_s2 + $0x38] sm:$0xff]   ;;  %v7495_v63 = vld.sshfl [vmem:[%s9871_s13 + $0x20] sm:$0xff pattern:$0x75316420]  ;;  %v1223_v1 = vcombine.low %v7491_v55, %v7492_v56  ;;  %v1224_v2 = vcombine.high %v7491_v55, %v7492_v56 }
 0x16c   : > { %8387 = vmatpush3.bf16.msra.mxu0 %v9288_v33  ;;  %v9305_v50 = vld [vmem:[%s11925_s2 + $0xb0] sm:$0xff]   ;;  %v9309_v53 = vld [vmem:[%s11925_s2 + $0xb8] sm:$0xff]   ;;  %v7496_v0 = vld.sshfl [vmem:[%s9871_s13 + $0x28] sm:$0xff pattern:$0x75316420] }
 0x16d   : > { %8445 = vmatpush3.bf16.msra.mxu1 %v9289_v34  ;;  %8388 = vmatprep.subr.bf16.mxu0 %v9290_v35  ;;  %v7493_v57 = vld.sshfl [vmem:[%s9871_s13 + $0x10] sm:$0x5 pattern:$0x75316420]  ;;  %v1277_v5 = vcombine.low %v7495_v63, %v7496_v0  ;;  %v1278_v7 = vcombine.high %v7495_v63, %v7496_v0  ;;  %v1231_v16 = vrot.slane %v1223_v1, %v10168_v9 }
 0x16e   : > { %8446 = vmatprep.subr.bf16.mxu1 %v9291_v36  ;;  %v7494_v59 = vld.sshfl [vmem:[%s9871_s13 + $0x18] sm:$0x5 pattern:$0x75316420]  ;;  %v1238_v17 = vrot.slane %v1224_v2, %v10168_v9 }
 0x16f   : > { %v1255_v4 = vcombine.low %v7493_v57, %v7494_v59  ;;  %v7497_v6 = vld.sshfl [vmem:[%s9871_s13 + $0x30] sm:$0x5 pattern:$0x75316420]  ;;  %v1285_v20 = vrot.slane %v1277_v5, %v10168_v9  ;;  %v1292_v22 = vrot.slane %v1278_v7, %v10168_v9 }
 0x170   : > { %8389 = vmatpush3.bf16.msra.mxu0 %v9292_v37  ;;  %v7498_v8 = vld.sshfl [vmem:[%s9871_s13 + $0x38] sm:$0x5 pattern:$0x75316420]  ;;  %v1820_v28 = vcombine.low %v1231_v16, %v1238_v17  ;;  %v7532_v29 = vcombine.high %v1231_v16, %v1238_v17 }
 0x171   : > { %8447 = vmatpush3.bf16.msra.mxu1 %v9293_v38  ;;  %8390 = vmatprep.subr.bf16.mxu0 %v9294_v39  ;;  %v7499_v10 = vld.sshfl [vmem:[%s9871_s13 + $0x40] sm:$0xff pattern:$0x75316420]  ;;  %v7500_v11 = vld.sshfl [vmem:[%s9871_s13 + $0x48] sm:$0xff pattern:$0x75316420]  ;;  %v1309_v12 = vcombine.low %v7497_v6, %v7498_v8  ;;  %v1262_v18 = vrot.slane %v1255_v4, %v10168_v9  ;;  %v1293_v27 = vcombine.high %v1285_v20, %v1285_v20 }
 0x172   : > { %8448 = vmatprep.subr.bf16.mxu1 %v9295_v40  ;;  %v7501_v13 = vld.sshfl [vmem:[%s9871_s13 + $0x50] sm:$0x5 pattern:$0x75316420]  ;;  %v1331_v14 = vcombine.low %v7499_v10, %v7500_v11  ;;  %v1332_v15 = vcombine.high %v7499_v10, %v7500_v11  ;;  %v1294_v31 = vcombine.high %v1292_v22, %v1292_v22  ;;  %v1830_v36 = vrot.slane %v1820_v28, %v10168_v9 }
 0x173   : > { %v7502_v21 = vld.sshfl [vmem:[%s9871_s13 + $0x58] sm:$0x5 pattern:$0x75316420]  ;;  %v1316_v25 = vrot.slane %v1309_v12, %v10168_v9  ;;  %v1822_v30 = vcombine.low %v1262_v18, %v1285_v20  ;;  %v1823_v35 = vcombine.low %v1292_v22, %v1293_v27  ;;  %v1837_v37 = vrot.slane %v7532_v29, %v10168_v9 }
 0x174   : > { %8391 = vmatpush3.bf16.msra.mxu0 %v9296_v41  ;;  %v7503_v23 = vld.sshfl [vmem:[%s9871_s13 + $0x60] sm:$0xff pattern:$0x75316420]  ;;  %v7504_v24 = vld.sshfl [vmem:[%s9871_s13 + $0x68] sm:$0xff pattern:$0x75316420]  ;;  %v1339_v19 = vrot.slane %v1331_v14, %v10168_v9  ;;  %v1346_v26 = vrot.slane %v1332_v15, %v10168_v9  ;;  %v1363_v32 = vcombine.low %v7501_v13, %v7502_v21 }
 0x175   : > { %8449 = vmatpush3.bf16.msra.mxu1 %v9297_v42  ;;  %8392 = vmatprep.subr.bf16.mxu0 %v9298_v43  ;;  %v1385_v33 = vcombine.low %v7503_v23, %v7504_v24  ;;  %v1844_v38 = vrot.slane %v1822_v30, %v10168_v9  ;;  %v1888_v41 = vcombine.low %v1294_v31, %v1316_v25  ;;  %v7507_v6 = vld.sshfl [vmem:[%s9871_s13 + $0x80] sm:$0xff pattern:$0x75316420]  ;;  %v7508_v7 = vld.sshfl [vmem:[%s9871_s13 + $0x88] sm:$0xff pattern:$0x75316420] }
 0x176   : > { %8450 = vmatprep.subr.bf16.mxu1 %v9299_v44  ;;  %v1889_v34 = vcombine.low %v1339_v19, %v1346_v26  ;;  %v1370_v39 = vrot.slane %v1363_v32, %v10168_v9  ;;  %v7533_v42 = vcombine.high %v1339_v19, %v1346_v26  ;;  %v1851_v43 = vrot.slane %v1823_v35, %v10168_v9  ;;  %v7509_v13 = vld.sshfl [vmem:[%s9871_s13 + $0x90] sm:$0x5 pattern:$0x75316420] }
 0x177   : > { %v1393_v40 = vrot.slane %v1385_v33, %v10168_v9  ;;  %v1853_v44 = vcombine.high %v1830_v36, %v1837_v37  ;;  %v7510_v14 = vld.sshfl [vmem:[%s9871_s13 + $0x98] sm:$0x5 pattern:$0x75316420]  ;;  %v1439_v22 = vcombine.low %v7507_v6, %v7508_v7 }
 0x178   : > { %8393 = vmatpush3.bf16.msra.mxu0 %v9300_v45  ;;  %v1852_v45 = vcombine.low %v1830_v36, %v1837_v37  ;;  %v7511_v20 = vld.sshfl [vmem:[%s9871_s13 + $0xa0] sm:$0xff pattern:$0x75316420]  ;;  %v7512_v21 = vld.sshfl [vmem:[%s9871_s13 + $0xa8] sm:$0xff pattern:$0x75316420]  ;;  %v1471_v36 = vcombine.low %v7509_v13, %v7510_v14 }
 0x179   : > { %8451 = vmatpush3.bf16.msra.mxu1 %v9301_v46  ;;  %8394 = vmatprep.subr.bf16.mxu0 %v9302_v47  ;;  %v1905_v46 = vrot.slane %v1889_v34, %v10168_v9  ;;  %v7505_v47 = vld.sshfl [vmem:[%s9871_s13 + $0x70] sm:$0x5 pattern:$0x75316420]  ;;  %v1869_v58 = vrot.slane %v1853_v44, %v10168_v9  ;;  %v1401_v0 = vcombine.high %v1393_v40, %v1393_v40 }
 0x17a   : > { %8452 = vmatprep.subr.bf16.mxu1 %v9303_v48  ;;  %v1891_v48 = vcombine.low %v1370_v39, %v1393_v40  ;;  %v1862_v55 = vrot.slane %v1852_v45, %v10168_v9  ;;  %v7513_v25 = vld.sshfl [vmem:[%s9871_s13 + $0xb0] sm:$0x5 pattern:$0x75316420]  ;;  %v1447_v30 = vrot.slane %v1439_v22, %v10168_v9  ;;  %v1493_v37 = vcombine.low %v7511_v20, %v7512_v21 }
 0x17b   : > { %v7514_v28 = vld.sshfl [vmem:[%s9871_s13 + $0xb8] sm:$0x5 pattern:$0x75316420] }
 0x17c   : > { %8395 = vmatpush3.bf16.msra.mxu0 %v9304_v49  ;;  %v1898_v49 = vrot.slane %v1888_v41, %v10168_v9  ;;  %v1919_v56 = vrot.slane %v1891_v48, %v10168_v9  ;;  %v7515_v33 = vld.sshfl [vmem:[%s9871_s13 + $0xc0] sm:$0xff pattern:$0x75316420]  ;;  %v7516_v34 = vld.sshfl [vmem:[%s9871_s13 + $0xc8] sm:$0xff pattern:$0x75316420]  ;;  %v1494_v41 = vcombine.high %v7511_v20, %v7512_v21  ;;  %v1525_v44 = vcombine.low %v7513_v25, %v7514_v28 }
 0x17d   : > { %8453 = vmatpush3.bf16.msra.mxu1 %v9305_v50  ;;  %8396 = vmatprep.subr.bf16.mxu0 %v9306_v51  ;;  %v1912_v50 = vrot.slane %v7533_v42, %v10168_v9  ;;  %v7506_v51 = vld.sshfl [vmem:[%s9871_s13 + $0x78] sm:$0x5 pattern:$0x75316420]  ;;  %v1478_v42 = vrot.slane %v1471_v36, %v10168_v9  ;;  %v1547_v45 = vcombine.low %v7515_v33, %v7516_v34 }
 0x17e   : > { %8454 = vmatprep.subr.bf16.mxu1 %v9307_v52  ;;  %v1386_v52 = vcombine.high %v7503_v23, %v7504_v24  ;;  %v1921_v57 = vcombine.high %v1898_v49, %v1905_v46  ;;  %v1920_v59 = vcombine.low %v1898_v49, %v1905_v46  ;;  %v1417_v1 = vcombine.low %v7505_v47, %v7506_v51  ;;  %v7522_v21 = vld.sshfl [vmem:[%s9871_s13 + $0xf8] sm:$0x5 pattern:$0x75316420] }
 0x17f   : > { %v1923_v2 = vcombine.high %v1912_v50, %v1919_v56  ;;  %v1922_v4 = vcombine.low %v1912_v50, %v1919_v56  ;;  %v1440_v23 = vcombine.high %v7507_v6, %v7508_v7  ;;  %v7517_v50 = vld.sshfl [vmem:[%s9871_s13 + $0xd0] sm:$0x5 pattern:$0x75316420]  ;;  %v1508_v51 = vrot.slane %v1494_v41, %v10168_v9 }
 0x180   : > { %8397 = vmatpush3.bf16.msra.mxu0 %v9308_v54  ;;  %v1855_v54 = vcombine.high %v1844_v38, %v1851_v43  ;;  %v1400_v60 = vrot.slane %v1386_v52, %v10168_v9  ;;  %v1937_v3 = vrot.slane %v1921_v57, %v10168_v9  ;;  %v10203_v5 = vrot.slane %v1920_v59, %v10168_v9  ;;  %v7524_v36 = vld.sshfl [vmem:[%s9871_s13 + $0x108] sm:$0xff pattern:$0x75316420] }
 0x181   : > { %8455 = vmatpush3.bf16.msra.mxu1 %v9309_v53  ;;  %v1854_v53 = vcombine.low %v1844_v38, %v1851_v43  ;;  %v1951_v15 = vrot.slane %v1923_v2, %v10168_v9  ;;  %v1944_v16 = vrot.slane %v1922_v4, %v10168_v9  ;;  %v1424_v18 = vrot.slane %v1417_v1, %v10168_v9  ;;  %v7525_v41 = vld.sshfl [vmem:[%s9871_s13 + $0x110] sm:$0x5 pattern:$0x75316420] }
 0x182   : > { %v1883_v61 = vrot.slane %v1855_v54, %v10168_v9  ;;  %v1402_v17 = vcombine.high %v1400_v60, %v1400_v60  ;;  %v1956_v24 = vcombine.low %v1400_v60, %v1401_v0  ;;  %v1454_v31 = vrot.slane %v1440_v23, %v10168_v9  ;;  %v7519_v60 = vld.sshfl [vmem:[%s9871_s13 + $0xe0] sm:$0xff pattern:$0x75316420] }
 0x183   : > { %v1876_v63 = vrot.slane %v1854_v53, %v10168_v9  ;;  %v1954_v19 = vcombine.low %v1937_v3, %v1951_v15  ;;  %v1955_v26 = vcombine.high %v1937_v3, %v1951_v15  ;;  %v1952_v27 = vcombine.low %v10203_v5, %v1944_v16  ;;  %v7518_v53 = vld.sshfl [vmem:[%s9871_s13 + $0xd8] sm:$0x5 pattern:$0x75316420] }
 0x184   : > { %v1886_v8 = vcombine.low %v1869_v58, %v1883_v61  ;;  %v1887_v10 = vcombine.high %v1869_v58, %v1883_v61  ;;  %v1953_v29 = vcombine.high %v10203_v5, %v1944_v16  ;;  %v1957_v32 = vcombine.low %v1402_v17, %v1424_v18  ;;  %v7520_v61 = vld.sshfl [vmem:[%s9871_s13 + $0xe8] sm:$0xff pattern:$0x75316420] }
 0x185   : > { %v1884_v11 = vcombine.low %v1862_v55, %v1876_v63  ;;  %v1885_v12 = vcombine.high %v1862_v55, %v1876_v63  ;;  %v1966_v35 = vrot.slane %v1956_v24, %v10168_v9  ;;  %v1958_v38 = vcombine.low %v1447_v30, %v1454_v31  ;;  %v7521_v15 = vld.sshfl [vmem:[%s9871_s13 + $0xf0] sm:$0x5 pattern:$0x75316420] }
 0x186   : > { %2505 = vmatprep.mubr.bf16.mxu0 %v1886_v8  ;;  %2593 = vmatprep.mubr.bf16.mxu1 %v1887_v10  ;;  %v7534_v39 = vcombine.high %v1447_v30, %v1454_v31  ;;  %v1973_v40 = vrot.slane %v1957_v32, %v10168_v9  ;;  %v1501_v43 = vrot.slane %v1493_v37, %v10168_v9 }
 0x187   : > { %2506 = vmatmul.mubr.bf16.vlgmr.msra.gmra.mrb[0].mxu0 %v1884_v11  ;;  %2594 = vmatmul.mubr.bf16.vlgmr.msra.gmra.mrb[0].mxu1 %v1885_v12  ;;  %v1980_v46 = vrot.slane %v1958_v38, %v10168_v9  ;;  %v1532_v54 = vrot.slane %v1525_v44, %v10168_v9  ;;  %v1548_v58 = vcombine.high %v7515_v33, %v7516_v34 }
 0x188   : > { %2513 = vmatprep.mubr.bf16.mxu0 %v1954_v19  ;;  %2601 = vmatprep.mubr.bf16.mxu1 %v1955_v26  ;;  %v1987_v47 = vrot.slane %v7534_v39, %v10168_v9  ;;  %v1989_v48 = vcombine.high %v1966_v35, %v1973_v40  ;;  %v1988_v49 = vcombine.low %v1966_v35, %v1973_v40  ;;  %v7523_v35 = vld.sshfl [vmem:[%s9871_s13 + $0x100] sm:$0xff pattern:$0x75316420] }
 0x189   : > { %v1509_v52 = vcombine.high %v1501_v43, %v1501_v43  ;;  %v1510_v63 = vcombine.high %v1508_v51, %v1508_v51  ;;  %v1555_v0 = vrot.slane %v1547_v45, %v10168_v9  ;;  %v1562_v1 = vrot.slane %v1548_v58, %v10168_v9 }
 0x18a   : > { %v1991_v55 = vcombine.high %v1980_v46, %v1987_v47  ;;  %v2005_v56 = vrot.slane %v1989_v48, %v10168_v9  ;;  %v1990_v57 = vcombine.low %v1980_v46, %v1987_v47  ;;  %v1998_v59 = vrot.slane %v1988_v49, %v10168_v9  ;;  %v7526_v46 = vld.sshfl [vmem:[%s9871_s13 + $0x118] sm:$0x5 pattern:$0x75316420] }
 0x18b   : > { %v2024_v4 = vcombine.low %v1478_v42, %v1501_v43  ;;  %v2025_v5 = vcombine.low %v1508_v51, %v1509_v52  ;;  %v2026_v6 = vcombine.low %v1510_v63, %v1532_v54  ;;  %v2027_v7 = vcombine.low %v1555_v0, %v1562_v1  ;;  %v7527_v51 = vld.sshfl [vmem:[%s9871_s13 + $0x120] sm:$0xff pattern:$0x75316420]  ;;  %v7528_v52 = vld.sshfl [vmem:[%s9871_s13 + $0x128] sm:$0xff pattern:$0x75316420] }
 0x18c   : > { %v2019_v2 = vrot.slane %v1991_v55, %v10168_v9  ;;  %v2012_v3 = vrot.slane %v1990_v57, %v10168_v9  ;;  %v1579_v8 = vcombine.low %v7517_v50, %v7518_v53  ;;  %v1601_v10 = vcombine.low %v7519_v60, %v7520_v61 }
 0x18d   : > { %v2034_v16 = vrot.slane %v2024_v4, %v10168_v9  ;;  %v2041_v17 = vrot.slane %v2025_v5, %v10168_v9  ;;  %v2048_v18 = vrot.slane %v2026_v6, %v10168_v9  ;;  %v2055_v20 = vrot.slane %v2027_v7, %v10168_v9  ;;  %v7530_v6 = vld.sshfl [vmem:[%s9871_s13 + $0x138] sm:$0x5 pattern:$0x75316420] }
 0x18e   : > { %v2022_v11 = vcombine.low %v2005_v56, %v2019_v2  ;;  %v2023_v12 = vcombine.high %v2005_v56, %v2019_v2  ;;  %v2020_v13 = vcombine.low %v1998_v59, %v2012_v3  ;;  %v2021_v14 = vcombine.high %v1998_v59, %v2012_v3 }
 0x18f   : > { %2514 = vmatmul.mubr.bf16.gmra.mrb[4].mxu0 %v1952_v27  ;;  %2602 = vmatmul.mubr.bf16.gmra.mrb[4].mxu1 %v1953_v29  ;;  %v1586_v22 = vrot.slane %v1579_v8, %v10168_v9  ;;  %v1602_v23 = vcombine.high %v7519_v60, %v7520_v61  ;;  %v1609_v24 = vrot.slane %v1601_v10, %v10168_v9 }
 0x190   : > { %2521 = vmatprep.mubr.bf16.mxu0 %v2022_v11  ;;  %2609 = vmatprep.mubr.bf16.mxu1 %v2023_v12  ;;  %v2057_v25 = vcombine.high %v2034_v16, %v2041_v17  ;;  %v2059_v19 = vcombine.high %v2048_v18, %v2055_v20  ;;  %v2056_v26 = vcombine.low %v2034_v16, %v2041_v17 }
 0x191   : > { %v2058_v27 = vcombine.low %v2048_v18, %v2055_v20  ;;  %v1616_v28 = vrot.slane %v1602_v23, %v10168_v9  ;;  %v1617_v29 = vcombine.high %v1609_v24, %v1609_v24  ;;  %v1633_v30 = vcombine.low %v7521_v15, %v7522_v21 }
 0x192   : > { %v7535_v31 = vcombine.high %v1555_v0, %v1562_v1  ;;  %v2073_v32 = vrot.slane %v2057_v25, %v10168_v9  ;;  %v2087_v33 = vrot.slane %v2059_v19, %v10168_v9  ;;  %v2066_v34 = vrot.slane %v2056_v26, %v10168_v9  ;;  %v7529_v1 = vld.sshfl [vmem:[%s9871_s13 + $0x130] sm:$0x5 pattern:$0x75316420] }
 0x193   : > { %v2080_v37 = vrot.slane %v2058_v27, %v10168_v9  ;;  %v1618_v38 = vcombine.high %v1616_v28, %v1616_v28  ;;  %v1640_v39 = vrot.slane %v1633_v30, %v10168_v9  ;;  %v2093_v40 = vcombine.low %v1586_v22, %v1609_v24 }
 0x194   : > { %v2090_v42 = vcombine.low %v2073_v32, %v2087_v33  ;;  %v2091_v43 = vcombine.high %v2073_v32, %v2087_v33  ;;  %v2094_v44 = vcombine.low %v1616_v28, %v1617_v29  ;;  %v2102_v45 = vrot.slane %v7535_v31, %v10168_v9 }
 0x195   : > { %v2088_v47 = vcombine.low %v2066_v34, %v2080_v37  ;;  %v2089_v48 = vcombine.high %v2066_v34, %v2080_v37  ;;  %v2095_v49 = vcombine.low %v1618_v38, %v1640_v39  ;;  %v2109_v50 = vrot.slane %v2093_v40, %v10168_v9 }
 0x196   : > { %v2116_v54 = vrot.slane %v2094_v44, %v10168_v9  ;;  %v1655_v58 = vcombine.low %v7523_v35, %v7524_v36  ;;  %v1656_v53 = vcombine.high %v7523_v35, %v7524_v36  ;;  %v1687_v59 = vcombine.low %v7525_v41, %v7526_v46 }
 0x197   : > { %2522 = vmatmul.mubr.bf16.gmra.mrb[8].mxu0 %v2020_v13  ;;  %2610 = vmatmul.mubr.bf16.gmra.mrb[8].mxu1 %v2021_v14  ;;  %v2123_v55 = vrot.slane %v2095_v49, %v10168_v9  ;;  %v2125_v56 = vcombine.high %v2102_v45, %v2109_v50  ;;  %v2124_v57 = vcombine.low %v2102_v45, %v2109_v50 }
 0x198   : > { %2529 = vmatprep.mubr.bf16.mxu0 %v2090_v42  ;;  %2617 = vmatprep.mubr.bf16.mxu1 %v2091_v43  ;;  %v1663_v60 = vrot.slane %v1655_v58, %v10168_v9  ;;  %v1670_v61 = vrot.slane %v1656_v53, %v10168_v9  ;;  %v1709_v63 = vcombine.low %v7527_v51, %v7528_v52 }
 0x199   : > { %v1710_v0 = vcombine.high %v7527_v51, %v7528_v52  ;;  %v2127_v2 = vcombine.high %v2116_v54, %v2123_v55  ;;  %v2141_v3 = vrot.slane %v2125_v56, %v10168_v9  ;;  %v2126_v4 = vcombine.low %v2116_v54, %v2123_v55 }
 0x19a   : > { %v2134_v5 = vrot.slane %v2124_v57, %v10168_v9  ;;  %v1694_v7 = vrot.slane %v1687_v59, %v10168_v9  ;;  %v1717_v8 = vrot.slane %v1709_v63, %v10168_v9  ;;  %v2160_v13 = vcombine.low %v1663_v60, %v1670_v61  ;;  %v10290_v57 = vld [vmem:[%s11926_s3] ss:$0 sm:$0xff] }
 0x19b   : > { %v1724_v10 = vrot.slane %v1710_v0, %v10168_v9  ;;  %v2155_v11 = vrot.slane %v2127_v2, %v10168_v9  ;;  %v2148_v12 = vrot.slane %v2126_v4, %v10168_v9  ;;  %v7536_v14 = vcombine.high %v1663_v60, %v1670_v61 }
 0x19c   : > { %v1725_v15 = vcombine.high %v1717_v8, %v1717_v8  ;;  %v2162_v16 = vcombine.low %v1694_v7, %v1717_v8  ;;  %v1741_v18 = vcombine.low %v7529_v1, %v7530_v6  ;;  %v2170_v25 = vrot.slane %v2160_v13, %v10168_v9 }
 0x19d   : > { %v1726_v17 = vcombine.high %v1724_v10, %v1724_v10  ;;  %v2158_v20 = vcombine.low %v2141_v3, %v2155_v11  ;;  %v2159_v21 = vcombine.high %v2141_v3, %v2155_v11  ;;  %v2156_v22 = vcombine.low %v2134_v5, %v2148_v12 }
 0x19e   : > { %v2157_v23 = vcombine.high %v2134_v5, %v2148_v12  ;;  %v2163_v24 = vcombine.low %v1724_v10, %v1725_v15  ;;  %v2177_v19 = vrot.slane %v7536_v14, %v10168_v9  ;;  %v2184_v26 = vrot.slane %v2162_v16, %v10168_v9 }
 0x19f   : > { %2530 = vmatmul.mubr.bf16.gmra.mrb[12].mxu0 %v2088_v47  ;;  %2618 = vmatmul.mubr.bf16.gmra.mrb[12].mxu1 %v2089_v48  ;;  %v1748_v27 = vrot.slane %v1741_v18, %v10168_v9  ;;  %v9729_v48 = vmov 0.0|0.0   ;;  %v9730_v54 = vmov 1983009808  }
 0x1a0   : > { %2537 = vmatprep.mubr.bf16.mxu0 %v2158_v20  ;;  %2625 = vmatprep.mubr.bf16.mxu1 %v2159_v21  ;;  %v2191_v28 = vrot.slane %v2163_v24, %v10168_v9  ;;  %v2193_v29 = vcombine.high %v2170_v25, %v2177_v19  ;;  %v2192_v30 = vcombine.low %v2170_v25, %v2177_v19  ;;  %v2694_v58 = vunpack.c.l.s4 %v9730_v54 }
 0x1a1   : > { %v2228_v31 = vcombine.low %v1726_v17, %v1748_v27  ;;  %v7569_v49 = vcombine.low %v9729_v48, %v9729_v48  ;;  %v7570_v50 = vcombine.high %v9729_v48, %v9729_v48  ;;  %v10301_v19 = vadd.s32 8, %v10161_v62 }
 0x1a2   : > { %v2195_v32 = vcombine.high %v2184_v26, %v2191_v28  ;;  %v2209_v33 = vrot.slane %v2193_v29, %v10168_v9  ;;  %v2194_v34 = vcombine.low %v2184_v26, %v2191_v28  ;;  %v2202_v35 = vrot.slane %v2192_v30, %v10168_v9 }
 0x1a3   : > { %v2235_v36 = vrot.slane %v2228_v31, %v10168_v9  ;;  %3271 = vst [vmem:[#allocation2 + $0xa0] sm:$0xf] %v7569_v49  ;;  %3272 = vst [vmem:[#allocation2 + $0xa4] sm:$0x1] %v7570_v50  ;;  %v2695_v0 = vunpack.c.0.s8 %v2694_v58  ;;  %vm2897_vm6 = vcmp.le.s32.totalorder %v10301_v19, 8 }
 0x1a4   : > { %v2223_v37 = vrot.slane %v2195_v32, %v10168_v9  ;;  %v2216_v38 = vrot.slane %v2194_v34, %v10168_v9  ;;  %3289 = vst [vmem:[#allocation2 + $0xe8] sm:$0xf] %v7569_v49  ;;  %3290 = vst [vmem:[#allocation2 + $0xec] sm:$0x1] %v7570_v50 }
 0x1a5   : > { %v2236_v39 = vcombine.high %v2235_v36, %v2235_v36  ;;  %v2243_v46 = vrot.slane %v2235_v36, %v10168_v9  ;;  %v10294_v3 = vsub.s32 %v2695_v0, %v10161_v62 }
 0x1a6   : > { %v2226_v40 = vcombine.low %v2209_v33, %v2223_v37  ;;  %v2227_v41 = vcombine.high %v2209_v33, %v2223_v37  ;;  %v2224_v42 = vcombine.low %v2202_v35, %v2216_v38  ;;  %v2225_v43 = vcombine.high %v2202_v35, %v2216_v38 }
 0x1a7   : > { %2538 = vmatmul.mubr.bf16.gmra.mrb[16].mxu0 %v2156_v22  ;;  %2626 = vmatmul.mubr.bf16.gmra.mrb[16].mxu1 %v2157_v23  ;;  %v2250_v44 = vrot.slane %v2236_v39, %v10168_v9  ;;  %v2251_v47 = vcombine.high %v2243_v46, %v2243_v46 }
 0x1a8   : > { %2545 = vmatprep.mubr.bf16.mxu0 %v2226_v40  ;;  %2633 = vmatprep.mubr.bf16.mxu1 %v2227_v41 }
 0x1a9   : > { %v2252_v45 = vcombine.high %v2250_v44, %v2250_v44 }
 0x1af   : > { %2546 = vmatmul.mubr.bf16.gmra.mrb[20].mxu0 %v2224_v42  ;;  %2634 = vmatmul.mubr.bf16.gmra.mrb[20].mxu1 %v2225_v43 }
 0x1b0   : > { %2553 = vmatprep.mubr.bf16.mxu0 %v2250_v44  ;;  %2641 = vmatprep.mubr.bf16.mxu1 %v2252_v45 }
 0x1b7   : > { %2554 = vmatmul.mubr.bf16.gmra.mrb[24].mxu0 %v2243_v46  ;;  %2642 = vmatmul.mubr.bf16.gmra.mrb[24].mxu1 %v2251_v47 }
 0x25a   : > { %v8398_v51 = vpop.f32.mrb[0].mxu0  ;;  %v8456_v52 = vpop.f32.mrb[0].mxu1 }
 0x25b   : > { %v8399_v53 = vpop.f32.mrb[1].mxu0  ;;  %v8457_v55 = vpop.f32.mrb[1].mxu1 }
 0x25c   : > { %v8401_v56 = vpop.f32.mrb[2].mxu0  ;;  %v8459_v9 = vpop.f32.mrb[2].mxu1 }
 0x25d   : > { %v8402_v59 = vpop.f32.mrb[3].mxu0  ;;  %v8460_v60 = vpop.f32.mrb[3].mxu1 }
 0x25e   : > { %v8403_v61 = vadd.f32 %v8402_v59, %v8401_v56  ;;  %v8461_v63 = vadd.f32 %v8460_v60, %v8459_v9 }
 0x260   : > { %v2511_v1 = vadd.f32 %v8403_v61, %v10290_v57 }
 0x262   : > { %v2599_v2 = vadd.f32 %v8461_v63, %v2511_v1  ;;  %v8404_v4 = vpop.f32.mrb[4].mxu0  ;;  %v8462_v5 = vpop.f32.mrb[4].mxu1 }
 0x263   : > { %v8405_v6 = vpop.f32.mrb[5].mxu0  ;;  %v8463_v7 = vpop.f32.mrb[5].mxu1 }
 0x264   : > { %v2650_v8 = vmax.f32 %v2599_v2, 0.0  ;;  %v8406_v10 = vadd.f32 %v8405_v6, %v8404_v4  ;;  %v8464_v11 = vadd.f32 %v8463_v7, %v8462_v5  ;;  %v8407_v12 = vpop.f32.mrb[6].mxu0  ;;  %v8465_v13 = vpop.f32.mrb[6].mxu1 }
 0x265   : > { %v8408_v14 = vpop.f32.mrb[7].mxu0  ;;  %v8466_v15 = vpop.f32.mrb[7].mxu1 }
 0x266   : > { %v2692_v16 = vcombine.high %v2650_v8, %v2650_v8  ;;  %v2699_v17 = vrot.slane %v2650_v8, %v10294_v3  ;;  %v2516_v18 = vadd.f32 %v8406_v10, %v10290_v57  ;;  %v8409_v20 = vadd.f32 %v8408_v14, %v8407_v12 }
 0x267   : > { %v8467_v21 = vadd.f32 %v8466_v15, %v8465_v13 }
 0x268   : > { %v2706_v22 = vrot.slane %v2692_v16, %v10294_v3  ;;  %v2707_v23 = vcombine.high %v2699_v17, %v2699_v17  ;;  %v2604_v24 = vadd.f32 %v8464_v11, %v2516_v18  ;;  %v2519_v25 = vadd.f32 %v8409_v20, %v10290_v57 }
 0x26a   : > { %v2934_v26 = vcombine.low %v2707_v23, %v2706_v22  ;;  %v2651_v27 = vmax.f32 %v2604_v24, 0.0  ;;  %v2607_v28 = vadd.f32 %v8467_v21, %v2519_v25  ;;  %v8410_v29 = vpop.f32.mrb[8].mxu0  ;;  %v8468_v30 = vpop.f32.mrb[8].mxu1  ;;  %v2708_v33 = vcombine.high %v2706_v22, %v2706_v22 }
 0x26b   : > { %v8411_v31 = vpop.f32.mrb[9].mxu0  ;;  %v8469_v32 = vpop.f32.mrb[9].mxu1 }
 0x26c   : > { %v2709_v34 = vcombine.high %v2651_v27, %v2651_v27  ;;  %v2716_v35 = vrot.slane %v2651_v27, %v10294_v3  ;;  %v2652_v36 = vmax.f32 %v2607_v28, 0.0  ;;  %v8413_v37 = vpop.f32.mrb[10].mxu0  ;;  %v8471_v38 = vpop.f32.mrb[10].mxu1  ;;  %v2942_v39 = vrot.slane %v2934_v26, %v10294_v3 }
 0x26d   : > { %v8412_v40 = vadd.f32 %v8411_v31, %v8410_v29  ;;  %v8470_v41 = vadd.f32 %v8469_v32, %v8468_v30  ;;  %v8414_v42 = vpop.f32.mrb[11].mxu0  ;;  %v8472_v43 = vpop.f32.mrb[11].mxu1 }
 0x26e   : > { %v2723_v44 = vrot.slane %v2709_v34, %v10294_v3  ;;  %v2724_v45 = vcombine.high %v2716_v35, %v2716_v35  ;;  %v2935_v46 = vcombine.low %v2708_v33, %v2716_v35  ;;  %v2726_v47 = vcombine.high %v2652_v36, %v2652_v36 }
 0x26f   : > { %v2733_v48 = vrot.slane %v2652_v36, %v10294_v3  ;;  %v2524_v49 = vadd.f32 %v8412_v40, %v10290_v57  ;;  %v8415_v50 = vadd.f32 %v8414_v42, %v8413_v37  ;;  %v8473_v51 = vadd.f32 %v8472_v43, %v8471_v38 }
 0x270   : > { %v2725_v52 = vcombine.high %v2723_v44, %v2723_v44  ;;  %v2949_v54 = vrot.slane %v2935_v46, %v10294_v3  ;;  %v2957_v58 = vrot.slane %v2724_v45, %v10294_v3  ;;  %v2740_v53 = vrot.slane %v2726_v47, %v10294_v3 }
 0x271   : > { %v2741_v55 = vcombine.high %v2733_v48, %v2733_v48  ;;  %v2612_v56 = vadd.f32 %v8470_v41, %v2524_v49  ;;  %v2527_v9 = vadd.f32 %v8415_v50, %v10290_v57 }
 0x272   : > { %v2950_v59 = vcombine.low %v2942_v39, %v2949_v54  ;;  %v2958_v60 = vcombine.low %v2723_v44, %v2725_v52  ;;  %v3173_v61 = vsel %vm2897_vm6, %v2957_v58, 0.0  ;;  %v2981_v63 = vrot.slane %v2740_v53, %v10294_v3  ;;  %v8416_v0 = vpop.f32.mrb[12].mxu0  ;;  %v8474_v1 = vpop.f32.mrb[12].mxu1 }
 0x273   : > { %v8270_v2 = vpack.c.bf16 %v3173_v61, %v3173_v61  ;;  %v2959_v4 = vcombine.low %v2733_v48, %v2741_v55  ;;  %v2653_v5 = vmax.f32 %v2612_v56, 0.0  ;;  %v2742_v6 = vcombine.high %v2740_v53, %v2740_v53  ;;  %v8417_v7 = vpop.f32.mrb[13].mxu0  ;;  %v8475_v8 = vpop.f32.mrb[13].mxu1 }
 0x274   : > { %v2966_v10 = vrot.slane %v2958_v60, %v10294_v3  ;;  %v3172_v11 = vsel %vm2890_vm7, %v2950_v59, 0.0  ;;  %v3175_v12 = vsel %vm2897_vm6, %v2981_v63, 0.0  ;;  %v2615_v13 = vadd.f32 %v8473_v51, %v2527_v9  ;;  %v8419_v14 = vpop.f32.mrb[14].mxu0  ;;  %v8477_v15 = vpop.f32.mrb[14].mxu1 }
 0x275   : > { %v8269_v16 = vpack.c.bf16 %v3172_v11, %v3172_v11  ;;  %3274 = vst [vmem:[#allocation2 + $0xac] sm:$0x1] %v8270_v2  ;;  %v2973_v17 = vrot.slane %v2959_v4, %v10294_v3  ;;  %v8272_v18 = vpack.c.bf16 %v3175_v12, %v3175_v12  ;;  %v2743_v20 = vcombine.high %v2653_v5, %v2653_v5  ;;  %v8420_v21 = vpop.f32.mrb[15].mxu0  ;;  %v8478_v22 = vpop.f32.mrb[15].mxu1 }
 0x276   : > { %v2750_v23 = vrot.slane %v2653_v5, %v10294_v3  ;;  %v2654_v24 = vmax.f32 %v2615_v13, 0.0  ;;  %v8418_v25 = vadd.f32 %v8417_v7, %v8416_v0  ;;  %v8476_v26 = vadd.f32 %v8475_v8, %v8474_v1 }
 0x277   : > { %3273 = vst [vmem:[#allocation2 + $0xa8] sm:$0xf] %v8269_v16  ;;  %v2974_v27 = vcombine.low %v2966_v10, %v2973_v17  ;;  %3276 = vst [vmem:[#allocation2 + $0xb4] sm:$0x1] %v8272_v18  ;;  %v2757_v28 = vrot.slane %v2743_v20, %v10294_v3  ;;  %v8421_v29 = vadd.f32 %v8420_v21, %v8419_v14 }
 0x278   : > { %v8479_v30 = vadd.f32 %v8478_v22, %v8477_v15  ;;  %v2758_v31 = vcombine.high %v2750_v23, %v2750_v23  ;;  %v2982_v32 = vcombine.low %v2742_v6, %v2750_v23  ;;  %v2760_v33 = vcombine.high %v2654_v24, %v2654_v24 }
 0x279   : > { %v2767_v34 = vrot.slane %v2654_v24, %v10294_v3  ;;  %v3174_v35 = vsel %vm2890_vm7, %v2974_v27, 0.0  ;;  %v2759_v36 = vcombine.high %v2757_v28, %v2757_v28  ;;  %v2532_v37 = vadd.f32 %v8418_v25, %v10290_v57 }
 0x27a   : > { %v2535_v38 = vadd.f32 %v8421_v29, %v10290_v57  ;;  %v8271_v39 = vpack.c.bf16 %v3174_v35, %v3174_v35  ;;  %v2983_v40 = vcombine.low %v2758_v31, %v2757_v28  ;;  %v2990_v41 = vrot.slane %v2982_v32, %v10294_v3  ;;  %v8422_v43 = vpop.f32.mrb[16].mxu0  ;;  %v8480_v44 = vpop.f32.mrb[16].mxu1 }
 0x27b   : > { %v2774_v42 = vrot.slane %v2760_v33, %v10294_v3  ;;  %v3005_v45 = vrot.slane %v2759_v36, %v10294_v3  ;;  %v2775_v46 = vcombine.high %v2767_v34, %v2767_v34  ;;  %v2620_v47 = vadd.f32 %v8476_v26, %v2532_v37  ;;  %v8423_v49 = vpop.f32.mrb[17].mxu0  ;;  %v8481_v50 = vpop.f32.mrb[17].mxu1 }
 0x27c   : > { %v2623_v48 = vadd.f32 %v8479_v30, %v2535_v38  ;;  %3275 = vst [vmem:[#allocation2 + $0xb0] sm:$0xf] %v8271_v39  ;;  %v2997_v51 = vrot.slane %v2983_v40, %v10294_v3  ;;  %v8424_v54 = vadd.f32 %v8423_v49, %v8422_v43  ;;  %v8482_v58 = vadd.f32 %v8481_v50, %v8480_v44  ;;  %v8425_v53 = vpop.f32.mrb[18].mxu0  ;;  %v8483_v55 = vpop.f32.mrb[18].mxu1 }
 0x27d   : > { %v2776_v52 = vcombine.high %v2774_v42, %v2774_v42  ;;  %v3177_v56 = vsel %vm2897_vm6, %v3005_v45, 0.0  ;;  %v3006_v9 = vcombine.low %v2767_v34, %v2775_v46  ;;  %v2655_v59 = vmax.f32 %v2620_v47, 0.0  ;;  %v8426_v61 = vpop.f32.mrb[19].mxu0  ;;  %v8484_v63 = vpop.f32.mrb[19].mxu1 }
 0x27e   : > { %v2656_v60 = vmax.f32 %v2623_v48, 0.0  ;;  %v2998_v0 = vcombine.low %v2990_v41, %v2997_v51  ;;  %v8274_v1 = vpack.c.bf16 %v3177_v56, %v3177_v56  ;;  %v2540_v4 = vadd.f32 %v8424_v54, %v10290_v57 }
 0x27f   : > { %v3007_v2 = vcombine.low %v2774_v42, %v2776_v52  ;;  %v3014_v5 = vrot.slane %v3006_v9, %v10294_v3  ;;  %v2777_v6 = vcombine.high %v2655_v59, %v2655_v59  ;;  %v2784_v7 = vrot.slane %v2655_v59, %v10294_v3 }
 0x280   : > { %v2794_v8 = vcombine.high %v2656_v60, %v2656_v60  ;;  %v3176_v10 = vsel %vm2890_vm7, %v2998_v0, 0.0  ;;  %3278 = vst [vmem:[#allocation2 + $0xbc] sm:$0x1] %v8274_v1  ;;  %v2801_v12 = vrot.slane %v2656_v60, %v10294_v3  ;;  %v2628_v13 = vadd.f32 %v8482_v58, %v2540_v4 }
 0x281   : > { %v3021_v11 = vrot.slane %v3007_v2, %v10294_v3  ;;  %v8273_v14 = vpack.c.bf16 %v3176_v10, %v3176_v10  ;;  %v2791_v15 = vrot.slane %v2777_v6, %v10294_v3  ;;  %v2792_v16 = vcombine.high %v2784_v7, %v2784_v7 }
 0x282   : > { %v3029_v17 = vrot.slane %v2784_v7, %v10294_v3  ;;  %v2808_v20 = vrot.slane %v2794_v8, %v10294_v3  ;;  %v2809_v21 = vcombine.high %v2801_v12, %v2801_v12  ;;  %v2657_v22 = vmax.f32 %v2628_v13, 0.0  ;;  %v8428_v23 = vpop.f32.mrb[20].mxu0  ;;  %v8486_v24 = vpop.f32.mrb[20].mxu1 }
 0x283   : > { %v3022_v18 = vcombine.low %v3014_v5, %v3021_v11  ;;  %3277 = vst [vmem:[#allocation2 + $0xb8] sm:$0xf] %v8273_v14  ;;  %v3030_v25 = vcombine.low %v2792_v16, %v2791_v15  ;;  %v2793_v27 = vcombine.high %v2791_v15, %v2791_v15  ;;  %v8427_v28 = vadd.f32 %v8426_v61, %v8425_v53  ;;  %v8429_v29 = vpop.f32.mrb[21].mxu0  ;;  %v8487_v30 = vpop.f32.mrb[21].mxu1 }
 0x284   : > { %v3179_v26 = vsel %vm2897_vm6, %v3029_v17, 0.0  ;;  %v2810_v33 = vcombine.high %v2808_v20, %v2808_v20  ;;  %v3053_v34 = vrot.slane %v2809_v21, %v10294_v3  ;;  %v8431_v35 = vpop.f32.mrb[22].mxu0  ;;  %v8489_v36 = vpop.f32.mrb[22].mxu1  ;;  %v2811_v40 = vcombine.high %v2657_v22, %v2657_v22 }
 0x285   : > { %v3178_v31 = vsel %vm2890_vm7, %v3022_v18, 0.0  ;;  %v8276_v32 = vpack.c.bf16 %v3179_v26, %v3179_v26  ;;  %v3038_v38 = vrot.slane %v3030_v25, %v10294_v3  ;;  %v3031_v39 = vcombine.low %v2793_v27, %v2801_v12  ;;  %v8432_v41 = vpop.f32.mrb[23].mxu0  ;;  %v8490_v42 = vpop.f32.mrb[23].mxu1 }
 0x286   : > { %v8275_v37 = vpack.c.bf16 %v3178_v31, %v3178_v31  ;;  %v3054_v43 = vcombine.low %v2808_v20, %v2810_v33  ;;  %v3181_v44 = vsel %vm2897_vm6, %v3053_v34, 0.0  ;;  %v2818_v45 = vrot.slane %v2657_v22, %v10294_v3 }
 0x287   : > { %3280 = vst [vmem:[#allocation2 + $0xc4] sm:$0x1] %v8276_v32  ;;  %v2543_v46 = vadd.f32 %v8427_v28, %v10290_v57  ;;  %v3045_v47 = vrot.slane %v3031_v39, %v10294_v3  ;;  %v8278_v48 = vpack.c.bf16 %v3181_v44, %v3181_v44  ;;  %v2825_v49 = vrot.slane %v2811_v40, %v10294_v3 }
 0x288   : > { %3279 = vst [vmem:[#allocation2 + $0xc0] sm:$0xf] %v8275_v37  ;;  %v8485_v50 = vadd.f32 %v8484_v63, %v8483_v55  ;;  %v2826_v51 = vcombine.high %v2818_v45, %v2818_v45  ;;  %v8430_v52 = vadd.f32 %v8429_v29, %v8428_v23  ;;  %v8488_v54 = vadd.f32 %v8487_v30, %v8486_v24 }
 0x289   : > { %v3046_v58 = vcombine.low %v3038_v38, %v3045_v47  ;;  %v3062_v53 = vrot.slane %v3054_v43, %v10294_v3  ;;  %3282 = vst [vmem:[#allocation2 + $0xcc] sm:$0x1] %v8278_v48  ;;  %v3077_v56 = vrot.slane %v2825_v49, %v10294_v3  ;;  %v8433_v61 = vadd.f32 %v8432_v41, %v8431_v35 }
 0x28a   : > { %v2631_v9 = vadd.f32 %v8485_v50, %v2543_v46  ;;  %v3055_v59 = vcombine.low %v2818_v45, %v2826_v51  ;;  %v2548_v60 = vadd.f32 %v8430_v52, %v10290_v57  ;;  %v8491_v0 = vadd.f32 %v8490_v42, %v8489_v36  ;;  %v8434_v1 = vpop.f32.mrb[24].mxu0  ;;  %v8492_v2 = vpop.f32.mrb[24].mxu1 }
 0x28b   : > { %v3180_v55 = vsel %vm2890_vm7, %v3046_v58, 0.0  ;;  %v3183_v63 = vsel %vm2897_vm6, %v3077_v56, 0.0  ;;  %v2827_v5 = vcombine.high %v2825_v49, %v2825_v49  ;;  %v8435_v6 = vpop.f32.mrb[25].mxu0  ;;  %v8493_v7 = vpop.f32.mrb[25].mxu1  ;;  %v2551_v17 = vadd.f32 %v8433_v61, %v10290_v57 }
 0x28c   : > { %v2658_v4 = vmax.f32 %v2631_v9, 0.0  ;;  %v8277_v8 = vpack.c.bf16 %v3180_v55, %v3180_v55  ;;  %v3069_v10 = vrot.slane %v3055_v59, %v10294_v3  ;;  %v8280_v11 = vpack.c.bf16 %v3183_v63, %v3183_v63  ;;  %v8437_v13 = vpop.f32.mrb[26].mxu0  ;;  %v8495_v14 = vpop.f32.mrb[26].mxu1 }
 0x28d   : > { %v2636_v12 = vadd.f32 %v8488_v54, %v2548_v60  ;;  %v8438_v18 = vpop.f32.mrb[27].mxu0  ;;  %v8496_v20 = vpop.f32.mrb[27].mxu1  ;;  %v2639_v26 = vadd.f32 %v8491_v0, %v2551_v17 }
 0x28e   : > { %v2828_v15 = vcombine.high %v2658_v4, %v2658_v4  ;;  %v2835_v16 = vrot.slane %v2658_v4, %v10294_v3  ;;  %3281 = vst [vmem:[#allocation2 + $0xc8] sm:$0xf] %v8277_v8  ;;  %v3070_v21 = vcombine.low %v3062_v53, %v3069_v10  ;;  %3284 = vst [vmem:[#allocation2 + $0xd4] sm:$0x1] %v8280_v11 }
 0x28f   : > { %v2659_v22 = vmax.f32 %v2636_v12, 0.0  ;;  %v2660_v35 = vmax.f32 %v2639_v26, 0.0 }
 0x290   : > { %v2842_v23 = vrot.slane %v2828_v15, %v10294_v3  ;;  %v2843_v24 = vcombine.high %v2835_v16, %v2835_v16  ;;  %v3078_v25 = vcombine.low %v2827_v5, %v2835_v16  ;;  %v3182_v27 = vsel %vm2890_vm7, %v3070_v21, 0.0 }
 0x291   : > { %v2845_v28 = vcombine.high %v2659_v22, %v2659_v22  ;;  %v2852_v29 = vrot.slane %v2659_v22, %v10294_v3  ;;  %v8279_v30 = vpack.c.bf16 %v3182_v27, %v3182_v27  ;;  %v2869_v40 = vrot.slane %v2660_v35, %v10294_v3 }
 0x292   : > { %v2844_v31 = vcombine.high %v2842_v23, %v2842_v23  ;;  %v3079_v57 = vcombine.low %v2843_v24, %v2842_v23  ;;  %v3086_v32 = vrot.slane %v3078_v25, %v10294_v3 }
 0x293   : > { %v2859_v33 = vrot.slane %v2845_v28, %v10294_v3  ;;  %v2860_v34 = vcombine.high %v2852_v29, %v2852_v29  ;;  %3283 = vst [vmem:[#allocation2 + $0xd0] sm:$0xf] %v8279_v30  ;;  %v3125_v45 = vrot.slane %v2869_v40, %v10294_v3 }
 0x294   : > { %v3093_v36 = vrot.slane %v3079_v57, %v10294_v3  ;;  %v3101_v37 = vrot.slane %v2844_v31, %v10294_v3 }
 0x295   : > { %v2861_v38 = vcombine.high %v2859_v33, %v2859_v33  ;;  %v3102_v39 = vcombine.low %v2852_v29, %v2860_v34  ;;  %v3187_v50 = vsel %vm2897_vm6, %v3125_v45, 0.0 }
 0x296   : > { %v3094_v41 = vcombine.low %v3086_v32, %v3093_v36  ;;  %v3185_v42 = vsel %vm2897_vm6, %v3101_v37, 0.0  ;;  %v8284_v51 = vpack.c.bf16 %v3187_v50, %v3187_v50 }
 0x297   : > { %v8282_v43 = vpack.c.bf16 %v3185_v42, %v3185_v42  ;;  %v3103_v44 = vcombine.low %v2859_v33, %v2861_v38  ;;  %v3110_v48 = vrot.slane %v3102_v39, %v10294_v3 }
 0x298   : > { %v3184_v46 = vsel %vm2890_vm7, %v3094_v41, 0.0  ;;  %3288 = vst [vmem:[#allocation2 + $0xe4] sm:$0x1] %v8284_v51 }
 0x299   : > { %v8281_v47 = vpack.c.bf16 %v3184_v46, %v3184_v46  ;;  %3286 = vst [vmem:[#allocation2 + $0xdc] sm:$0x1] %v8282_v43  ;;  %v3117_v49 = vrot.slane %v3103_v44, %v10294_v3 }
 0x29b   : > { %3285 = vst [vmem:[#allocation2 + $0xd8] sm:$0xf] %v8281_v47  ;;  %v3118_v52 = vcombine.low %v3110_v48, %v3117_v49 }
 0x29d   : > { %v3186_v54 = vsel %vm2890_vm7, %v3118_v52, 0.0 }
 0x29e   : > { %v8283_v58 = vpack.c.bf16 %v3186_v54, %v3186_v54 }
 0x2a0   : > { %3287 = vst [vmem:[#allocation2 + $0xe0] sm:$0xf] %v8283_v58 }
 0x2a1 PF: > { %p7589_p3 = scmp.ne.s32.totalorder %s9709_s30, 3 }
 0x2a2   : > { %v9731_v53 = vmov (!%p7589_p3), 0  }
 0x2a3   : > { %3294 = sbr.rel (%p7589_p3) target bundleno = 685 (0x2ad), region = 68  ;;  %3296 = vst [vmem:[#allocation2 + $0xa0] sm:$0xf] (!%p7589_p3), %v9731_v53  ;;  %3297 = vst [vmem:[#allocation2 + $0xa4] sm:$0x1] (!%p7589_p3), %v9731_v53 }
 0x2a4   : > { %3298 = vst [vmem:[#allocation2 + $0xa8] sm:$0xf] (!%p7589_p3), %v9731_v53  ;;  %3299 = vst [vmem:[#allocation2 + $0xac] sm:$0x1] (!%p7589_p3), %v9731_v53 }
 0x2a5   : > { %3300 = vst [vmem:[#allocation2 + $0xb0] sm:$0xf] (!%p7589_p3), %v9731_v53  ;;  %3301 = vst [vmem:[#allocation2 + $0xb4] sm:$0x1] (!%p7589_p3), %v9731_v53 }
 0x2a6   : > { %3302 = vst [vmem:[#allocation2 + $0xb8] sm:$0xf] (!%p7589_p3), %v9731_v53  ;;  %3303 = vst [vmem:[#allocation2 + $0xbc] sm:$0x1] (!%p7589_p3), %v9731_v53 }
 0x2a7   : > { %3304 = vst [vmem:[#allocation2 + $0xc0] sm:$0xf] (!%p7589_p3), %v9731_v53  ;;  %3305 = vst [vmem:[#allocation2 + $0xc4] sm:$0x1] (!%p7589_p3), %v9731_v53 }
 0x2a8   : > { %3306 = vst [vmem:[#allocation2 + $0xc8] sm:$0xf] (!%p7589_p3), %v9731_v53  ;;  %3307 = vst [vmem:[#allocation2 + $0xcc] sm:$0x1] (!%p7589_p3), %v9731_v53 }
 0x2a9   : > { %3308 = vst [vmem:[#allocation2 + $0xd0] sm:$0xf] (!%p7589_p3), %v9731_v53  ;;  %3309 = vst [vmem:[#allocation2 + $0xd4] sm:$0x1] (!%p7589_p3), %v9731_v53 }
 0x2aa   : > { %3310 = vst [vmem:[#allocation2 + $0xd8] sm:$0xf] %v9731_v53  ;;  %3311 = vst [vmem:[#allocation2 + $0xdc] sm:$0x1] %v9731_v53 }
 0x2ab   : > { %3312 = vst [vmem:[#allocation2 + $0xe0] sm:$0xf] %v9731_v53  ;;  %3313 = vst [vmem:[#allocation2 + $0xe4] sm:$0x1] %v9731_v53 }
 0x2ac   : > { %3314 = vst [vmem:[#allocation2 + $0xe8] sm:$0xf] %v9731_v53  ;;  %3315 = vst [vmem:[#allocation2 + $0xec] sm:$0x1] %v9731_v53 }
 0x2ad PF: > { %v9310_v62 = vld [vmem:[%s11927_s4 + $0x280] sm:$0xff]   ;;  %v9314_v9 = vld [vmem:[%s11927_s4 + $0x288] sm:$0xff]   ;;  %v9318_v0 = vld [vmem:[%s11927_s4 + $0x290] sm:$0xff]   ;;  %s8301_s26 = sshll.u32 %s9857_s17, 11  ;;  %s7346_s16 = sshll.u32 %s9873_s29, 4  ;;  %s11865_s16 = int_to_ptr.vmem [resolvable:$true] %s7346_s16 }
 0x2ae   : > { %v9311_v3 = vld [vmem:[%s11927_s4 + $0x300] sm:$0xff]   ;;  %8498 = vmatprep.subr.bf16.mxu0 %v9310_v62  ;;  %v9315_v59 = vld [vmem:[%s11927_s4 + $0x308] sm:$0xff]   ;;  %v9319_v1 = vld [vmem:[%s11927_s4 + $0x310] sm:$0xff]   ;;  %s11863_s23 = scalar_lea.hbm %s11931_s8, %s8301_s26  ;;  %s11950_s30 = sand.u32 1, %s9701_s28  }
 0x2af   : > { %v9312_v19 = vld [vmem:[%s11927_s4 + $0x240] sm:$0xff]   ;;  %8538 = vmatprep.subr.bf16.mxu1 %v9311_v3  ;;  %v9316_v60 = vld [vmem:[%s11927_s4 + $0x248] sm:$0xff]   ;;  %v9320_v2 = vld [vmem:[%s11927_s4 + $0x250] sm:$0xff]   ;;  %s11871_s24 = scalar_lea.sflag [#allocation4], %s11950_s30  ;;  %s9631_s17 = scalar_lea.vmem %s11865_s16, 2048 }
 0x2b0   : > { %v9313_v56 = vld [vmem:[%s11927_s4 + $0x2c0] sm:$0xff]   ;;  %8499 = vmatpush3.bf16.msra.mxu0 %v9312_v19  ;;  %v9317_v61 = vld [vmem:[%s11927_s4 + $0x2c8] sm:$0xff]   ;;  %v9321_v55 = vld [vmem:[%s11927_s4 + $0x2d0] sm:$0xff]   ;;  %p9632_p4 = scmp.ne.s32.totalorder %s11865_s16, %s9631_s17  ;;  %s9733_s9 = smov [#allocation3]  }
 0x2b1   : > { %8539 = vmatpush3.bf16.msra.mxu1 %v9313_v56  ;;  %8500 = vmatprep.subr.bf16.mxu0 %v9314_v9  ;;  %v9322_v63 = vld [vmem:[%s11927_s4 + $0x298] sm:$0xff]   ;;  %v9326_v7 = vld [vmem:[%s11927_s4 + $0x2a0] sm:$0xff]   ;;  %v9330_v12 = vld [vmem:[%s11927_s4 + $0x2a8] sm:$0xff]   ;;  %s9635_s18 = sshll.u32 %s9733_s9, 4  ;;  %s9636_s18 = int_to_ptr.vmem [resolvable:$false] %s9635_s18 }
 0x2b2   : > { %8540 = vmatprep.subr.bf16.mxu1 %v9315_v59  ;;  %v9323_v4 = vld [vmem:[%s11927_s4 + $0x318] sm:$0xff]   ;;  %v9327_v8 = vld [vmem:[%s11927_s4 + $0x320] sm:$0xff]   ;;  %v9331_v13 = vld [vmem:[%s11927_s4 + $0x328] sm:$0xff]   ;;  %p9633_p6 = pnand %p9632_p4, %p9834_p5  ;;  %s9637_s14 = scalar_lea.vmem %s9636_s18, 4096 }
 0x2b3   : > { %v9324_v5 = vld [vmem:[%s11927_s4 + $0x258] sm:$0xff]   ;;  %v9328_v10 = vld [vmem:[%s11927_s4 + $0x260] sm:$0xff]   ;;  %v9332_v14 = vld [vmem:[%s11927_s4 + $0x268] sm:$0xff]   ;;  %p9638_p9 = scmp.lt.s32.totalorder %s11865_s16, %s9636_s18  ;;  %p9639_p10 = scmp.lt.s32.totalorder %s9637_s14, %s9631_s17 }
 0x2b4   : > { %8501 = vmatpush3.bf16.msra.mxu0 %v9316_v60  ;;  %v9325_v6 = vld [vmem:[%s11927_s4 + $0x2d8] sm:$0xff]   ;;  %v9329_v11 = vld [vmem:[%s11927_s4 + $0x2e0] sm:$0xff]   ;;  %v9333_v15 = vld [vmem:[%s11927_s4 + $0x2e8] sm:$0xff]   ;;  %p9634_p8 = pneg %p9633_p6 }
 0x2b5   : > { %8541 = vmatpush3.bf16.msra.mxu1 %v9317_v61  ;;  %8502 = vmatprep.subr.bf16.mxu0 %v9318_v0  ;;  %v9334_v16 = vld [vmem:[%s11927_s4 + $0x2b0] sm:$0xff]   ;;  %v9338_v21 = vld [vmem:[%s11927_s4 + $0x2b8] sm:$0xff]   ;;  %v10485_v30 = vld [vmem:[#allocation2 + $0x60] sm:$0xf]  ;;  %p9640_p11 = por %p9639_p10, %p9638_p9 }
 0x2b6   : > { %8542 = vmatprep.subr.bf16.mxu1 %v9319_v1  ;;  %v9335_v17 = vld [vmem:[%s11927_s4 + $0x330] sm:$0xff]   ;;  %v9339_v22 = vld [vmem:[%s11927_s4 + $0x338] sm:$0xff]   ;;  %v3636_v31 = vld [vmem:[#allocation2 + $0x64] sm:$0x1] }
 0x2b7   : > { %v9336_v18 = vld [vmem:[%s11927_s4 + $0x270] sm:$0xff]   ;;  %v9340_v23 = vld [vmem:[%s11927_s4 + $0x278] sm:$0xff]   ;;  %v9347_v33 = vld [vmem:[%s11927_s4 + $0x380] sm:$0xff]   ;;  %v10500_v42 = vcombine.low %v10485_v30, %v3636_v31  ;;  %p9641_p12 = pnand %p9640_p11, %p9634_p8 }
 0x2b8   : > { %8503 = vmatpush3.bf16.msra.mxu0 %v9320_v2  ;;  %v9337_v20 = vld [vmem:[%s11927_s4 + $0x2f0] sm:$0xff]   ;;  %v9341_v24 = vld [vmem:[%s11927_s4 + $0x2f8] sm:$0xff]   ;;  %v9348_v37 = vld [vmem:[%s11927_s4 + $0x400] sm:$0xff]  }
 0x2b9   : > { %8543 = vmatpush3.bf16.msra.mxu1 %v9321_v55  ;;  %8504 = vmatprep.subr.bf16.mxu0 %v9322_v63  ;;  %v3631_v25 = vld [vmem:[#allocation2 + $0x50] sm:$0xf]  ;;  %v3632_v26 = vld [vmem:[#allocation2 + $0x54] sm:$0x1]  ;;  %v3633_v27 = vld [vmem:[#allocation2 + $0x58] sm:$0xf] }
 0x2ba   : > { %8544 = vmatprep.subr.bf16.mxu1 %v9323_v4  ;;  %v3634_v28 = vld [vmem:[#allocation2 + $0x5c] sm:$0x1]  ;;  %v7600_v29 = vcombine.low %v3631_v25, %v3632_v26  ;;  %v7757_v32 = vcombine.low %v3633_v27, %v10485_v30  ;;  %v9350_v43 = vld [vmem:[%s11927_s4 + $0x3c0] sm:$0xff]   ;;  %v9352_v49 = vld [vmem:[%s11927_s4 + $0x408] sm:$0xff]   ;;  %v7754_v50 = vcombine.low %v3631_v25, %v3633_v27  ;;  %v3708_v52 = vshll.u32 %v10500_v42, 16 }
 0x2bb   : > { %v10487_v57 = vcombine.low %v3633_v27, %v3634_v28  ;;  %v9349_v48 = vld [vmem:[%s11927_s4 + $0x340] sm:$0xff]   ;;  %v9351_v51 = vld [vmem:[%s11927_s4 + $0x388] sm:$0xff]   ;;  %v3706_v62 = vshrl.u32 %v10500_v42, 16  ;;  %v10524_v56 = vld [vmem:[#allocation2 + $0x70] sm:$0xf]  ;;  %v3749_v9 = vrot.slane %v10500_v42, 1 }
 0x2bc   : > { %8505 = vmatpush3.bf16.msra.mxu0 %v9324_v5  ;;  %v3692_v34 = vshrl.u32 %v7600_v29, 16  ;;  %v3694_v35 = vshll.u32 %v7600_v29, 16  ;;  %v3747_v36 = vrot.slane %v7600_v29, 1  ;;  %4529 = vmatprep.mubr.bf16.mxu1 %v7757_v32  ;;  %v9354_v58 = vld [vmem:[%s11927_s4 + $0x3c8] sm:$0xff]   ;;  %v3710_v19 = vrot.slane %v3708_v52, 1  ;;  %v9360_v1 = vld [vmem:[%s11927_s4 + $0x410] sm:$0xff]  }
 0x2bd   : > { %8545 = vmatpush3.bf16.msra.mxu1 %v9325_v6  ;;  %8506 = vmatprep.subr.bf16.mxu0 %v9326_v7  ;;  %v3699_v38 = vshrl.u32 %v10487_v57, 16  ;;  %v3701_v39 = vshll.u32 %v10487_v57, 16  ;;  %v3748_v40 = vrot.slane %v10487_v57, 1  ;;  %v3637_v53 = vld [vmem:[#allocation2 + $0x68] sm:$0xf]  ;;  %v9359_v5 = vld [vmem:[%s11927_s4 + $0x390] sm:$0xff]  }
 0x2be   : > { %8546 = vmatprep.subr.bf16.mxu1 %v9327_v8  ;;  %v3696_v41 = vrot.slane %v3694_v35, 1  ;;  %v3638_v3 = vld [vmem:[#allocation2 + $0x6c] sm:$0x1]  ;;  %v3640_v61 = vld [vmem:[#allocation2 + $0x74] sm:$0x1]  ;;  %v7763_v0 = vcombine.low %v3637_v53, %v10524_v56  ;;  %v10545_v6 = vor.u32 %v3710_v19, %v3706_v62  ;;  %v9372_v35 = vld [vmem:[%s11927_s4 + $0x420] sm:$0xff]  }
 0x2bf   : > { %v3703_v44 = vrot.slane %v3701_v39, 1  ;;  %v7756_v45 = vcombine.low %v3747_v36, %v3748_v40  ;;  %v9353_v59 = vld [vmem:[%s11927_s4 + $0x348] sm:$0xff]   ;;  %v10530_v60 = vcombine.low %v3637_v53, %v3638_v3  ;;  %v10539_v63 = vcombine.low %v10524_v56, %v3640_v61  ;;  %v10586_v27 = vld [vmem:[#allocation2 + $0x80] sm:$0xf]  ;;  %v3644_v28 = vld [vmem:[#allocation2 + $0x84] sm:$0x1] }
 0x2c0   : > { %8507 = vmatpush3.bf16.msra.mxu0 %v9328_v10  ;;  %v3697_v46 = vor.u32 %v3696_v41, %v3692_v34  ;;  %v9361_v10 = vld [vmem:[%s11927_s4 + $0x350] sm:$0xff]   ;;  %v9373_v36 = vld [vmem:[%s11927_s4 + $0x360] sm:$0xff]   ;;  %v9395_v57 = vld [vmem:[%s11927_s4 + $0x48] sm:$0xff]  }
 0x2c1   : > { %8547 = vmatpush3.bf16.msra.mxu1 %v9329_v11  ;;  %8508 = vmatprep.subr.bf16.mxu0 %v9330_v12  ;;  %v10507_v47 = vor.u32 %v3703_v44, %v3699_v38  ;;  %v3713_v2 = vshrl.u32 %v10530_v60, 16  ;;  %v3715_v55 = vshll.u32 %v10530_v60, 16  ;;  %v3750_v4 = vrot.slane %v10530_v60, 1  ;;  %v9362_v11 = vld [vmem:[%s11927_s4 + $0x3d0] sm:$0xff]   ;;  %v9363_v12 = vld [vmem:[%s11927_s4 + $0x398] sm:$0xff]   ;;  %v9374_v41 = vld [vmem:[%s11927_s4 + $0x3e0] sm:$0xff]  }
 0x2c2   : > { %8548 = vmatprep.subr.bf16.mxu1 %v9331_v13  ;;  %v9393_v42 = vld [vmem:[%s11927_s4] sm:$0xff]   ;;  %v9401_v60 = vld [vmem:[%s11927_s4 + $0x58] sm:$0xff]  }
 0x2c3   : > { %v7755_v54 = vcombine.low %v3697_v46, %v10507_v47  ;;  %v3717_v7 = vrot.slane %v3715_v55, 1  ;;  %v10551_v8 = vcombine.low %v3749_v9, %v3750_v4  ;;  %v9385_v55 = vld [vmem:[%s11927_s4 + $0x370] sm:$0xff]  }
 0x2c4   : > { %8509 = vmatpush3.bf16.msra.mxu0 %v9332_v14  ;;  %v9364_v14 = vld [vmem:[%s11927_s4 + $0x418] sm:$0xff]  }
 0x2c5   : > { %8549 = vmatpush3.bf16.msra.mxu1 %v9333_v15  ;;  %8510 = vmatprep.subr.bf16.mxu0 %v9334_v16  ;;  %v10562_v13 = vor.u32 %v3717_v7, %v3713_v2  ;;  %v3722_v15 = vshll.u32 %v10539_v63, 16  ;;  %v10570_v16 = vcombine.low %v10485_v30, %v3637_v53  ;;  %v9371_v30 = vld [vmem:[%s11927_s4 + $0x3a0] sm:$0xff]   ;;  %v10639_v53 = vld [vmem:[#allocation2 + $0x90] sm:$0xf] }
 0x2c6   : > { %8550 = vmatprep.subr.bf16.mxu1 %v9335_v17  ;;  %4464 = vmatprep.mubr.bf16.mxu0 %v7755_v54  ;;  %v3720_v17 = vshrl.u32 %v10539_v63, 16  ;;  %v3645_v54 = vld [vmem:[#allocation2 + $0x88] sm:$0xf]  ;;  %v9384_v2 = vld [vmem:[%s11927_s4 + $0x430] sm:$0xff]  }
 0x2c7   : > { %v3724_v25 = vrot.slane %v3722_v15, 1  ;;  %v7775_v19 = vcombine.low %v3645_v54, %v10639_v53  ;;  %v9388_v15 = vld [vmem:[%s11927_s4 + $0x438] sm:$0xff]  }
 0x2c8   : > { %8511 = vmatpush3.bf16.msra.mxu0 %v9336_v18  ;;  %v3751_v18 = vrot.slane %v10539_v63, 1  ;;  %v9397_v63 = vld [vmem:[%s11927_s4 + $0x450] sm:$0xff]  }
 0x2c9   : > { %8551 = vmatpush3.bf16.msra.mxu1 %v9337_v20  ;;  %8512 = vmatprep.subr.bf16.mxu0 %v9338_v21  ;;  %v10576_v20 = vcombine.low %v10545_v6, %v10562_v13  ;;  %v9365_v21 = vld [vmem:[%s11927_s4 + $0x358] sm:$0xff]  }
 0x2ca   : > { %8552 = vmatprep.subr.bf16.mxu1 %v9339_v22  ;;  %v9366_v22 = vld [vmem:[%s11927_s4 + $0x3d8] sm:$0xff]  }
 0x2cc   : > { %8513 = vmatpush3.bf16.msra.mxu0 %v9340_v23  ;;  %v3641_v23 = vld [vmem:[#allocation2 + $0x78] sm:$0xf] }
 0x2cd   : > { %8553 = vmatpush3.bf16.msra.mxu1 %v9341_v24  ;;  %8578 = vmatprep.subr.bf16.mxu0 %v9347_v33  ;;  %v3642_v24 = vld [vmem:[#allocation2 + $0x7c] sm:$0x1]  ;;  %v7769_v29 = vcombine.low %v3641_v23, %v10586_v27  ;;  %v10597_v33 = vcombine.low %v10586_v27, %v3644_v28  ;;  %v9394_v28 = vld [vmem:[%s11927_s4 + $0x448] sm:$0xff]  }
 0x2ce   : > { %8618 = vmatprep.subr.bf16.mxu1 %v9348_v37  ;;  %v10584_v26 = vcombine.low %v3641_v23, %v3642_v24  ;;  %v10606_v37 = vor.u32 %v3724_v25, %v3720_v17  ;;  %v10679_v17 = vcombine.low %v10586_v27, %v3645_v54  ;;  %v7759_v24 = vcombine.low %v3748_v40, %v3749_v9  ;;  %v9391_v25 = vld [vmem:[%s11927_s4 + $0x440] sm:$0xff]   ;;  %v3648_v40 = vld [vmem:[#allocation2 + $0x94] sm:$0x1] }
 0x2cf   : > { %4465 = vmatmul.mubr.bf16.vlgmr.msra.gmra.mrb[0].mxu0 %v7754_v50  ;;  %v3736_v46 = vshll.u32 %v10597_v33, 16  ;;  %v3734_v52 = vshrl.u32 %v10597_v33, 16  ;;  %v9392_v27 = vld [vmem:[%s11927_s4 + $0x40] sm:$0xff]   ;;  %v7758_v9 = vcombine.low %v10507_v47, %v10545_v6  ;;  %v9398_v47 = vld [vmem:[%s11927_s4 + $0x50] sm:$0xff]  }
 0x2d0   : > { %4530 = vmatmul.mubr.bf16.vlgmr.msra.gmra.mrb[0].mxu1 %v7756_v45  ;;  %8579 = vmatpush3.bf16.msra.mxu0 %v9349_v48  ;;  %v3727_v31 = vshrl.u32 %v10584_v26, 16  ;;  %v3729_v32 = vshll.u32 %v10584_v26, 16  ;;  %v3752_v34 = vrot.slane %v10584_v26, 1  ;;  %v9376_v45 = vld [vmem:[%s11927_s4 + $0x428] sm:$0xff]   ;;  %v10628_v48 = vcombine.low %v10524_v56, %v3641_v23  ;;  %v9390_v23 = vld [vmem:[%s11927_s4 + $0x3f8] sm:$0xff]   ;;  %v9399_v6 = vld [vmem:[%s11927_s4 + $0x10] sm:$0xff]  }
 0x2d1   : > { %8619 = vmatpush3.bf16.msra.mxu1 %v9350_v43  ;;  %4537 = vmatprep.mubr.bf16.mxu1 %v7763_v0  ;;  %v9375_v43 = vld [vmem:[%s11927_s4 + $0x3a8] sm:$0xff]   ;;  %v3738_v3 = vrot.slane %v3736_v46, 1  ;;  %v3753_v56 = vrot.slane %v10597_v33, 1  ;;  %v3650_v26 = vld [vmem:[#allocation2 + $0x9c] sm:$0x1] }
 0x2d2   : > { %8620 = vmatprep.subr.bf16.mxu1 %v9352_v49  ;;  %8580 = vmatprep.subr.bf16.mxu0 %v9351_v51  ;;  %v3731_v38 = vrot.slane %v3729_v32, 1  ;;  %v10612_v39 = vcombine.low %v3751_v18, %v3752_v34  ;;  %v9377_v49 = vld [vmem:[%s11927_s4 + $0x368] sm:$0xff]  }
 0x2d3   : > { %4472 = vmatprep.mubr.bf16.mxu0 %v10576_v20  ;;  %v9378_v51 = vld [vmem:[%s11927_s4 + $0x3e8] sm:$0xff]  }
 0x2d4   : > { %8581 = vmatpush3.bf16.msra.mxu0 %v9353_v59  ;;  %v10620_v44 = vor.u32 %v3731_v38, %v3727_v31  ;;  %v9383_v59 = vld [vmem:[%s11927_s4 + $0x3b0] sm:$0xff]   ;;  %v7771_v31 = vcombine.low %v3752_v34, %v3753_v56  ;;  %v9407_v33 = vld [vmem:[%s11927_s4 + $0x68] sm:$0xff]  }
 0x2d5   : > { %8621 = vmatpush3.bf16.msra.mxu1 %v9354_v58  ;;  %8582 = vmatprep.subr.bf16.mxu0 %v9359_v5  ;;  %v3646_v58 = vld [vmem:[#allocation2 + $0x8c] sm:$0x1]  ;;  %v10658_v5 = vor.u32 %v3738_v3, %v3734_v52  ;;  %v3317_v3 = vld [vmem:[#allocation2 + $0x4] sm:$0x1] }
 0x2d6   : > { %8622 = vmatprep.subr.bf16.mxu1 %v9360_v1  ;;  %v7767_v50 = vcombine.low %v10606_v37, %v10620_v44  ;;  %v10641_v62 = vcombine.low %v3645_v54, %v3646_v58  ;;  %v9412_v58 = vld [vmem:[%s11927_s4 + $0x70] sm:$0xff]  }
 0x2d7   : > { %4473 = vmatmul.mubr.bf16.gmra.mrb[4].mxu0 %v10570_v16 }
 0x2d8   : > { %4538 = vmatmul.mubr.bf16.gmra.mrb[4].mxu1 %v10551_v8  ;;  %8583 = vmatpush3.bf16.msra.mxu0 %v9361_v10  ;;  %v3741_v61 = vshrl.u32 %v10641_v62, 16  ;;  %v3743_v0 = vshll.u32 %v10641_v62, 16  ;;  %v3754_v1 = vrot.slane %v10641_v62, 1 }
 0x2d9   : > { %8623 = vmatpush3.bf16.msra.mxu1 %v9362_v11  ;;  %8584 = vmatprep.subr.bf16.mxu0 %v9363_v12  ;;  %v9386_v11 = vld [vmem:[%s11927_s4 + $0x3f0] sm:$0xff]   ;;  %v9387_v12 = vld [vmem:[%s11927_s4 + $0x3b8] sm:$0xff]  }
 0x2da   : > { %8624 = vmatprep.subr.bf16.mxu1 %v9364_v14  ;;  %4545 = vmatprep.mubr.bf16.mxu1 %v7769_v29  ;;  %v3745_v7 = vrot.slane %v3743_v0, 1  ;;  %v10664_v10 = vcombine.low %v3753_v56, %v3754_v1  ;;  %v10727_v29 = vcombine.low %v10639_v53, %v3648_v40  ;;  %v10783_v56 = vld [vmem:[#allocation2 + $0x8] sm:$0xf]  ;;  %v9411_v0 = vld [vmem:[%s11927_s4 + $0x470] sm:$0xff]   ;;  %v9420_v40 = vld [vmem:[%s11927_s4 + $0xc0] sm:$0xff]  }
 0x2db   : > { %4480 = vmatprep.mubr.bf16.mxu0 %v7767_v50 }
 0x2dc   : > { %8585 = vmatpush3.bf16.msra.mxu0 %v9365_v21  ;;  %v10672_v14 = vor.u32 %v3745_v7, %v3741_v61  ;;  %v9389_v21 = vld [vmem:[%s11927_s4 + $0x378] sm:$0xff]   ;;  %v3763_v32 = vshll.u32 %v10727_v29, 16  ;;  %v3761_v38 = vshrl.u32 %v10727_v29, 16 }
 0x2dd   : > { %8625 = vmatpush3.bf16.msra.mxu1 %v9366_v22  ;;  %8586 = vmatprep.subr.bf16.mxu0 %v9371_v30  ;;  %v9400_v30 = vld [vmem:[%s11927_s4 + $0x458] sm:$0xff]  }
 0x2de   : > { %8626 = vmatprep.subr.bf16.mxu1 %v9372_v35  ;;  %v7773_v22 = vcombine.low %v10658_v5, %v10672_v14  ;;  %v3767_v35 = vrot.slane %v10727_v29, 1  ;;  %v3765_v34 = vrot.slane %v3763_v32, 1  ;;  %v9438_v29 = vld [vmem:[%s11927_s4 + $0x118] sm:$0xff]  }
 0x2df   : > { %4481 = vmatmul.mubr.bf16.gmra.mrb[8].mxu0 %v10628_v48 }
 0x2e0   : > { %4546 = vmatmul.mubr.bf16.gmra.mrb[8].mxu1 %v10612_v39  ;;  %8587 = vmatpush3.bf16.msra.mxu0 %v9373_v36  ;;  %v9405_v36 = vld [vmem:[%s11927_s4 + $0x20] sm:$0xff]   ;;  %v3766_v52 = vor.u32 %v3765_v34, %v3761_v38  ;;  %v9426_v38 = vld [vmem:[%s11927_s4 + $0x88] sm:$0xff]   ;;  %v9431_v34 = vld [vmem:[%s11927_s4 + $0xd0] sm:$0xff]  }
 0x2e1   : > { %8627 = vmatpush3.bf16.msra.mxu1 %v9374_v41  ;;  %8588 = vmatprep.subr.bf16.mxu0 %v9375_v43  ;;  %v9403_v43 = vld [vmem:[%s11927_s4 + $0x460] sm:$0xff]  }
 0x2e2   : > { %8628 = vmatprep.subr.bf16.mxu1 %v9376_v45  ;;  %4553 = vmatprep.mubr.bf16.mxu1 %v7775_v19  ;;  %v9408_v45 = vld [vmem:[%s11927_s4 + $0x28] sm:$0xff]  }
 0x2e3   : > { %4488 = vmatprep.mubr.bf16.mxu0 %v7773_v22 }
 0x2e4   : > { %8589 = vmatpush3.bf16.msra.mxu0 %v9377_v49  ;;  %v7770_v49 = vcombine.low %v10620_v44, %v10658_v5  ;;  %v3316_v44 = vld [vmem:[#allocation2] sm:$0xf]  ;;  %v9415_v5 = vld [vmem:[%s11927_s4 + $0x78] sm:$0xff]  }
 0x2e5   : > { %8629 = vmatpush3.bf16.msra.mxu1 %v9378_v51  ;;  %8590 = vmatprep.subr.bf16.mxu0 %v9383_v59  ;;  %v7777_v51 = vcombine.low %v3754_v1, %v3767_v35  ;;  %v3319_v59 = vld [vmem:[#allocation2 + $0xc] sm:$0x1]  ;;  %v10785_v61 = vcombine.low %v3316_v44, %v3317_v3 }
 0x2e6   : > { %8630 = vmatprep.subr.bf16.mxu1 %v9384_v2  ;;  %v10792_v1 = vcombine.low %v10783_v56, %v3319_v59 }
 0x2e7   : > { %4489 = vmatmul.mubr.bf16.gmra.mrb[12].mxu0 %v10679_v17  ;;  %v3379_v7 = vshll.u32 %v10785_v61, 16 }
 0x2e8   : > { %4554 = vmatmul.mubr.bf16.gmra.mrb[12].mxu1 %v10664_v10  ;;  %8591 = vmatpush3.bf16.msra.mxu0 %v9385_v55  ;;  %v9413_v55 = vld [vmem:[%s11927_s4 + $0x30] sm:$0xff]  }
 0x2e9   : > { %8631 = vmatpush3.bf16.msra.mxu1 %v9386_v11  ;;  %8592 = vmatprep.subr.bf16.mxu0 %v9387_v12  ;;  %v3384_v11 = vshrl.u32 %v10792_v1, 16  ;;  %v3386_v12 = vshll.u32 %v10792_v1, 16 }
 0x2ea   : > { %8632 = vmatprep.subr.bf16.mxu1 %v9388_v15  ;;  %4659 = vmatprep.mubr.bf16.mxu1 %v10576_v20  ;;  %v9396_v20 = vld [vmem:[%s11927_s4 + $0x8] sm:$0xff]   ;;  %v3381_v15 = vrot.slane %v3379_v7, 1  ;;  %v9442_v7 = vld [vmem:[%s11927_s4 + $0xe0] sm:$0xff]  }
 0x2eb   : > { %4594 = vmatprep.mubr.bf16.mxu0 %v7759_v24 }
 0x2ec   : > { %8593 = vmatpush3.bf16.msra.mxu0 %v9389_v21  ;;  %v9414_v21 = vld [vmem:[%s11927_s4 + $0x478] sm:$0xff]  }
 0x2ed   : > { %8633 = vmatpush3.bf16.msra.mxu1 %v9390_v23  ;;  %9014 = vmatprep.subr.bf16.mxu0 %v9391_v25  ;;  %v9416_v23 = vld [vmem:[%s11927_s4 + $0x38] sm:$0xff]  }
 0x2ee   : > { %8670 = vmatprep.subr.bf16.mxu1 %v9392_v27  ;;  %v9423_v27 = vld [vmem:[%s11927_s4 + $0x100] sm:$0xff]  }
 0x2ef   : > { %4595 = vmatmul.mubr.bf16.vlgmr.msra.gmra.mrb[16].mxu0 %v7758_v9  ;;  %v10824_v9 = vld [vmem:[#allocation2 + $0x10] sm:$0xf] }
 0x2f0   : > { %4660 = vmatmul.mubr.bf16.vlgmr.msra.gmra.mrb[16].mxu1 %v10570_v16  ;;  %v7765_v16 = vcombine.low %v3750_v4, %v3751_v18  ;;  %9015 = vmatpush3.bf16.msra.mxu0 %v9391_v25  ;;  %v7764_v4 = vcombine.low %v10562_v13, %v10606_v37  ;;  %v9402_v18 = vld [vmem:[%s11927_s4 + $0x18] sm:$0xff]   ;;  %v9404_v13 = vld [vmem:[%s11927_s4 + $0x60] sm:$0xff]  }
 0x2f1   : > { %8671 = vmatpush3.bf16.msra.mxu1 %v9393_v42  ;;  %4667 = vmatprep.mubr.bf16.mxu1 %v7767_v50  ;;  %v3649_v37 = vld [vmem:[#allocation2 + $0x98] sm:$0xf]  ;;  %v9406_v50 = vld [vmem:[%s11927_s4 + $0x468] sm:$0xff]  }
 0x2f2   : > { %8672 = vmatprep.subr.bf16.mxu1 %v9395_v57  ;;  %4602 = vmatprep.mubr.bf16.mxu0 %v7765_v16  ;;  %v10760_v41 = vcombine.low %v3649_v37, %v3650_v26  ;;  %v7778_v62 = vcombine.low %v10639_v53, %v3649_v37  ;;  %v3377_v53 = vshrl.u32 %v10785_v61, 16  ;;  %v7853_v57 = vcombine.low %v3316_v44, %v10783_v56  ;;  %v3323_v16 = vld [vmem:[#allocation2 + $0x1c] sm:$0x1]  ;;  %v9432_v37 = vld [vmem:[%s11927_s4 + $0x150] sm:$0xff]  }
 0x2f3   : > { %9016 = vmatprep.subr.bf16.mxu0 %v9394_v28  ;;  %v9435_v44 = vld [vmem:[%s11927_s4 + $0xd8] sm:$0xff]  }
 0x2f4   : > { %9017 = vmatpush3.bf16.msra.mxu0 %v9394_v28  ;;  %v3774_v46 = vshrl.u32 %v10760_v41, 16  ;;  %v3382_v24 = vor.u32 %v3381_v15, %v3377_v53  ;;  %v10826_v28 = vld [vmem:[#allocation2 + $0x18] sm:$0xf] }
 0x2f5   : > { %8673 = vmatpush3.bf16.msra.mxu1 %v9396_v20  ;;  %9018 = vmatprep.subr.bf16.mxu0 %v9397_v63  ;;  %v3321_v20 = vld [vmem:[#allocation2 + $0x14] sm:$0x1] }
 0x2f6   : > { %8674 = vmatprep.subr.bf16.mxu1 %v9398_v47  ;;  %v10829_v47 = vcombine.low %v10824_v9, %v3321_v20 }
 0x2f7   : > { %4603 = vmatmul.mubr.bf16.gmra.mrb[20].mxu0 %v7764_v4 }
 0x2f8   : > { %4668 = vmatmul.mubr.bf16.gmra.mrb[20].mxu1 %v10628_v48  ;;  %9019 = vmatpush3.bf16.msra.mxu0 %v9397_v63  ;;  %v3776_v48 = vshll.u32 %v10760_v41, 16  ;;  %v9422_v63 = vld [vmem:[%s11927_s4 + $0x80] sm:$0xff]   ;;  %v3391_v4 = vshrl.u32 %v10829_v47, 16 }
 0x2f9   : > { %8675 = vmatpush3.bf16.msra.mxu1 %v9399_v6  ;;  %4675 = vmatprep.mubr.bf16.mxu1 %v7773_v22  ;;  %v3388_v22 = vrot.slane %v3386_v12, 1  ;;  %v9425_v6 = vld [vmem:[%s11927_s4 + $0x148] sm:$0xff]   ;;  %v9445_v12 = vld [vmem:[%s11927_s4 + $0x120] sm:$0xff]  }
 0x2fa   : > { %8676 = vmatprep.subr.bf16.mxu1 %v9401_v60  ;;  %4610 = vmatprep.mubr.bf16.mxu0 %v7771_v31  ;;  %v3778_v54 = vrot.slane %v3776_v48, 1  ;;  %v10835_v60 = vcombine.low %v10826_v28, %v3323_v16  ;;  %v10873_v48 = vld [vmem:[#allocation2 + $0x20] sm:$0xf] }
 0x2fb   : > { %9020 = vmatprep.subr.bf16.mxu0 %v9400_v30  ;;  %v10811_v25 = vor.u32 %v3388_v22, %v3384_v11  ;;  %v10940_v22 = vld [vmem:[#allocation2 + $0x30] sm:$0xf] }
 0x2fc   : > { %9021 = vmatpush3.bf16.msra.mxu0 %v9400_v30  ;;  %v3779_v19 = vor.u32 %v3778_v54, %v3774_v46  ;;  %v9424_v30 = vld [vmem:[%s11927_s4 + $0xc8] sm:$0xff]   ;;  %v3398_v31 = vshrl.u32 %v10835_v60, 16  ;;  %v3400_v32 = vshll.u32 %v10835_v60, 16  ;;  %v9434_v46 = vld [vmem:[%s11927_s4 + $0x110] sm:$0xff]  }
 0x2fd   : > { %8677 = vmatpush3.bf16.msra.mxu1 %v9402_v18  ;;  %9022 = vmatprep.subr.bf16.mxu0 %v9403_v43  ;;  %v7854_v42 = vcombine.low %v3382_v24, %v10811_v25  ;;  %v3393_v18 = vshll.u32 %v10829_v47, 16  ;;  %v10942_v24 = vld [vmem:[#allocation2 + $0x38] sm:$0xf] }
 0x2fe   : > { %8678 = vmatprep.subr.bf16.mxu1 %v9404_v13  ;;  %v7779_v2 = vcombine.low %v3766_v52, %v3779_v19  ;;  %v7856_v19 = vcombine.low %v10783_v56, %v10824_v9 }
 0x2ff   : > { %4611 = vmatmul.mubr.bf16.gmra.mrb[24].mxu0 %v7770_v49  ;;  %v3395_v13 = vrot.slane %v3393_v18, 1  ;;  %v3325_v49 = vld [vmem:[#allocation2 + $0x24] sm:$0x1]  ;;  %v3434_v18 = vrot.slane %v10829_v47, 1  ;;  %v9456_v47 = vld [vmem:[%s11927_s4 + $0x130] sm:$0xff]  }
 0x300   : > { %4676 = vmatmul.mubr.bf16.gmra.mrb[24].mxu1 %v10679_v17  ;;  %9023 = vmatpush3.bf16.msra.mxu0 %v9403_v43  ;;  %v7776_v17 = vcombine.low %v10672_v14, %v3766_v52  ;;  %v9421_v14 = vld [vmem:[%s11927_s4 + $0x140] sm:$0xff]   ;;  %v3780_v43 = vrot.slane %v10760_v41, 1  ;;  %v10879_v41 = vld [vmem:[#allocation2 + $0x28] sm:$0xf]  ;;  %v9436_v52 = vld [vmem:[%s11927_s4 + $0x158] sm:$0xff]   ;;  %v10888_v54 = vcombine.low %v10873_v48, %v3325_v49 }
 0x301   : > { %8679 = vmatpush3.bf16.msra.mxu1 %v9405_v36  ;;  %4618 = vmatprep.mubr.bf16.mxu0 %v7777_v51  ;;  %v3402_v36 = vrot.slane %v3400_v32, 1  ;;  %v10857_v26 = vor.u32 %v3395_v13, %v3391_v4  ;;  %v9433_v51 = vld [vmem:[%s11927_s4 + $0x90] sm:$0xff]   ;;  %v10925_v11 = vcombine.low %v10873_v48, %v10879_v41  ;;  %v9460_v49 = vld [vmem:[%s11927_s4 + $0x138] sm:$0xff]  }
 0x302   : > { %8680 = vmatprep.subr.bf16.mxu1 %v9407_v33  ;;  %9024 = vmatprep.subr.bf16.mxu0 %v9406_v50  ;;  %v7780_v3 = vcombine.low %v3767_v35, %v3780_v43  ;;  %v3405_v59 = vshrl.u32 %v10888_v54, 16  ;;  %v9437_v35 = vld [vmem:[%s11927_s4 + $0x98] sm:$0xff]   ;;  %v9454_v4 = vld [vmem:[%s11927_s4 + $0x170] sm:$0xff]  }
 0x303   : > { %4683 = vmatprep.mubr.bf16.mxu1 %v7779_v2  ;;  %v10860_v33 = vor.u32 %v3402_v36, %v3398_v31  ;;  %v9453_v32 = vld [vmem:[%s11927_s4 + $0xf0] sm:$0xff]   ;;  %v10982_v36 = vcombine.low %v10940_v22, %v10942_v24 }
 0x304   : > { %9025 = vmatpush3.bf16.msra.mxu0 %v9406_v50  ;;  %v3327_v50 = vld [vmem:[#allocation2 + $0x2c] sm:$0x1] }
 0x305   : > { %8681 = vmatpush3.bf16.msra.mxu1 %v9408_v45  ;;  %9026 = vmatprep.subr.bf16.mxu0 %v9411_v0  ;;  %v10868_v45 = vcombine.low %v10824_v9, %v10826_v28  ;;  %v3433_v9 = vrot.slane %v10792_v1, 1  ;;  %v9448_v1 = vld [vmem:[%s11927_s4 + $0xa8] sm:$0xff]  }
 0x306   : > { %8682 = vmatprep.subr.bf16.mxu1 %v9412_v58  ;;  %v10891_v58 = vcombine.low %v10879_v41, %v3327_v50  ;;  %v3432_v50 = vrot.slane %v10785_v61, 1  ;;  %v9464_v61 = vld [vmem:[%s11927_s4 + $0x180] sm:$0xff]  }
 0x307   : > { %4619 = vmatmul.mubr.bf16.gmra.mrb[28].mxu0 %v7776_v17  ;;  %v9444_v17 = vld [vmem:[%s11927_s4 + $0xa0] sm:$0xff]   ;;  %v7858_v43 = vcombine.low %v3433_v9, %v3434_v18 }
 0x308   : > { %4684 = vmatmul.mubr.bf16.gmra.mrb[28].mxu1 %v7778_v62  ;;  %9027 = vmatpush3.bf16.msra.mxu0 %v9411_v0  ;;  %v3407_v62 = vshll.u32 %v10888_v54, 16  ;;  %v3414_v0 = vshll.u32 %v10891_v58, 16 }
 0x309   : > { %8683 = vmatpush3.bf16.msra.mxu1 %v9413_v55  ;;  %9028 = vmatprep.subr.bf16.mxu0 %v9414_v21  ;;  %v9443_v55 = vld [vmem:[%s11927_s4 + $0x160] sm:$0xff]  }
 0x30a   : > { %8684 = vmatprep.subr.bf16.mxu1 %v9415_v5  ;;  %5275 = vmatprep.mubr.bf16.mxu1 %v7854_v42  ;;  %v3409_v56 = vrot.slane %v3407_v62, 1  ;;  %v3416_v2 = vrot.slane %v3414_v0, 1  ;;  %v7855_v62 = vcombine.low %v3432_v50, %v3433_v9  ;;  %v9467_v0 = vld [vmem:[%s11927_s4 + $0x4c8] sm:$0xff]   ;;  %v9495_v50 = vld [vmem:[%s11927_s4 + $0x4f8] sm:$0xff]  }
 0x30b   : > { %9030 = vmatprep.mubr.bf16.mxu0 %v10551_v8  ;;  %v9427_v8 = vld [vmem:[%s11927_s4 + $0x108] sm:$0xff]  }
 0x30c   : > { %9029 = vmatpush3.bf16.msra.mxu0 %v9414_v21  ;;  %v10916_v5 = vor.u32 %v3409_v56, %v3405_v59  ;;  %v9447_v21 = vld [vmem:[%s11927_s4 + $0x168] sm:$0xff]   ;;  %v7857_v59 = vcombine.low %v10811_v25, %v10857_v26  ;;  %v9472_v56 = vld [vmem:[%s11927_s4 + $0x4d0] sm:$0xff]  }
 0x30d   : > { %8685 = vmatpush3.bf16.msra.mxu1 %v9416_v23  ;;  %8710 = vmatprep.subr.bf16.mxu0 %v9420_v40  ;;  %v3329_v23 = vld [vmem:[#allocation2 + $0x34] sm:$0x1]  ;;  %v9449_v40 = vld [vmem:[%s11927_s4 + $0x128] sm:$0xff]  }
 0x30e   : > { %8750 = vmatprep.subr.bf16.mxu1 %v9421_v14  ;;  %v3331_v14 = vld [vmem:[#allocation2 + $0x3c] sm:$0x1]  ;;  %v10949_v42 = vcombine.low %v10940_v22, %v3329_v23  ;;  %v9468_v25 = vld [vmem:[%s11927_s4 + $0x188] sm:$0xff]  }
 0x30f   : > { %9031 = vmatmul.mubr.bf16.vlgmr.msra.gmra.mrb[32].mxu0 %v10612_v39  ;;  %v10877_v39 = vcombine.low %v10857_v26, %v10860_v33  ;;  %v7862_v26 = vcombine.low %v10826_v28, %v10873_v48  ;;  %v3437_v28 = vrot.slane %v10891_v58, 1  ;;  %v9473_v48 = vld [vmem:[%s11927_s4 + $0x190] sm:$0xff]   ;;  %v9478_v23 = vld [vmem:[%s11927_s4 + $0x498] sm:$0xff]   ;;  %v9484_v9 = vld [vmem:[%s11927_s4 + $0x1e8] sm:$0xff]  }
 0x310   : > { %5276 = vmatmul.mubr.bf16.vlgmr.msra.gmra.mrb[32].mxu1 %v7853_v57  ;;  %8711 = vmatpush3.bf16.msra.mxu0 %v9422_v63  ;;  %v10952_v57 = vcombine.low %v10942_v24, %v3331_v14  ;;  %v3419_v20 = vshrl.u32 %v10949_v42, 16  ;;  %v3421_v16 = vshll.u32 %v10949_v42, 16  ;;  %v9480_v14 = vld [vmem:[%s11927_s4 + $0x1e0] sm:$0xff]  }
 0x311   : > { %8751 = vmatpush3.bf16.msra.mxu1 %v9423_v27  ;;  %8712 = vmatprep.subr.bf16.mxu0 %v9424_v30  ;;  %v9446_v27 = vld [vmem:[%s11927_s4 + $0xe8] sm:$0xff]  }
 0x312   : > { %8752 = vmatprep.subr.bf16.mxu1 %v9425_v6  ;;  %9034 = vmatprep.mubr.bf16.mxu0 %v10664_v10  ;;  %v3412_v10 = vshrl.u32 %v10891_v58, 16  ;;  %v3426_v6 = vshrl.u32 %v10952_v57, 16  ;;  %v3428_v63 = vshll.u32 %v10952_v57, 16  ;;  %v3423_v30 = vrot.slane %v3421_v16, 1  ;;  %v9475_v58 = vld [vmem:[%s11927_s4 + $0x1d8] sm:$0xff]  }
 0x313   : > { %5283 = vmatprep.mubr.bf16.mxu1 %v10877_v39  ;;  %v11091_v16 = vld [vmem:[#allocation2 + $0x40] sm:$0xf] }
 0x314   : > { %8713 = vmatpush3.bf16.msra.mxu0 %v9426_v38  ;;  %v10918_v53 = vor.u32 %v3416_v2, %v3412_v10  ;;  %v3430_v31 = vrot.slane %v3428_v63, 1  ;;  %v9465_v10 = vld [vmem:[%s11927_s4 + $0x480] sm:$0xff]   ;;  %v3438_v2 = vrot.slane %v10949_v42, 1  ;;  %v9486_v63 = vld [vmem:[%s11927_s4 + $0x1a8] sm:$0xff]  }
 0x315   : > { %8753 = vmatpush3.bf16.msra.mxu1 %v9427_v8  ;;  %8714 = vmatprep.subr.bf16.mxu0 %v9431_v34  ;;  %v10973_v8 = vor.u32 %v3423_v30, %v3419_v20  ;;  %v9455_v34 = vld [vmem:[%s11927_s4 + $0xb0] sm:$0xff]   ;;  %v9485_v20 = vld [vmem:[%s11927_s4 + $0x4e8] sm:$0xff]  }
 0x316   : > { %8754 = vmatprep.subr.bf16.mxu1 %v9432_v37  ;;  %v10932_v15 = vcombine.low %v10916_v5, %v10918_v53  ;;  %v10975_v13 = vor.u32 %v3430_v31, %v3426_v6  ;;  %v9458_v37 = vld [vmem:[%s11927_s4 + $0x178] sm:$0xff]   ;;  %v3333_v6 = vld [vmem:[#allocation2 + $0x44] sm:$0x1] }
 0x317   : > { %9035 = vmatmul.mubr.bf16.gmra.mrb[36].mxu0 %v7780_v3  ;;  %v3435_v3 = vrot.slane %v10835_v60, 1  ;;  %v9466_v60 = vld [vmem:[%s11927_s4 + $0x1c8] sm:$0xff]  }
 0x318   : > { %5284 = vmatmul.mubr.bf16.gmra.mrb[36].mxu1 %v10868_v45  ;;  %8715 = vmatpush3.bf16.msra.mxu0 %v9433_v51  ;;  %v10989_v38 = vcombine.low %v10973_v8, %v10975_v13  ;;  %v9463_v51 = vld [vmem:[%s11927_s4 + $0x4c0] sm:$0xff]  }
 0x319   : > { %8755 = vmatpush3.bf16.msra.mxu1 %v9434_v46  ;;  %5340 = vmatprep.mubr.bf16.mxu0 %v7856_v19  ;;  %v9457_v46 = vld [vmem:[%s11927_s4 + $0xf8] sm:$0xff]   ;;  %v3436_v19 = vrot.slane %v10888_v54, 1 }
 0x31a   : > { %8756 = vmatprep.subr.bf16.mxu1 %v9436_v52  ;;  %8716 = vmatprep.subr.bf16.mxu0 %v9435_v44  ;;  %v9459_v52 = vld [vmem:[%s11927_s4 + $0xb8] sm:$0xff]   ;;  %v9462_v44 = vld [vmem:[%s11927_s4 + $0x1c0] sm:$0xff]  }
 0x31b   : > { %5291 = vmatprep.mubr.bf16.mxu1 %v10932_v15  ;;  %v7864_v54 = vcombine.low %v3435_v3, %v3436_v19  ;;  %v11081_v42 = vcombine.low %v3436_v19, %v3437_v28  ;;  %v5572_v19 = vld [vmem:[#allocation2 + $0xac] sm:$0x1] }
 0x31c   : > { %8717 = vmatpush3.bf16.msra.mxu0 %v9437_v35  ;;  %v9471_v35 = vld [vmem:[%s11927_s4 + $0x1d0] sm:$0xff]  }
 0x31d   : > { %8757 = vmatpush3.bf16.msra.mxu1 %v9438_v29  ;;  %8718 = vmatprep.subr.bf16.mxu0 %v9442_v7  ;;  %v9469_v29 = vld [vmem:[%s11927_s4 + $0x488] sm:$0xff]   ;;  %v7863_v7 = vcombine.low %v10860_v33, %v10916_v5  ;;  %v9477_v33 = vld [vmem:[%s11927_s4 + $0x198] sm:$0xff]   ;;  %v7868_v5 = vcombine.low %v10879_v41, %v10940_v22  ;;  %v9481_v41 = vld [vmem:[%s11927_s4 + $0x4e0] sm:$0xff]  }
 0x31e   : > { %8758 = vmatprep.subr.bf16.mxu1 %v9443_v55  ;;  %v11047_v55 = vcombine.low %v3434_v18, %v3435_v3  ;;  %v9482_v22 = vld [vmem:[%s11927_s4 + $0x1a0] sm:$0xff]   ;;  %v3439_v18 = vrot.slane %v10952_v57, 1  ;;  %v9491_v57 = vld [vmem:[%s11927_s4 + $0x4f0] sm:$0xff]  }
 0x31f   : > { %v5570_v3 = vld [vmem:[#allocation2 + $0xa4] sm:$0x1] }
 0x320   : > { %5292 = vmatmul.mubr.bf16.gmra.mrb[40].mxu1 %v10925_v11  ;;  %8719 = vmatpush3.bf16.msra.mxu0 %v9444_v17  ;;  %v9476_v17 = vld [vmem:[%s11927_s4 + $0x4d8] sm:$0xff]  }
 0x321   : > { %8759 = vmatpush3.bf16.msra.mxu1 %v9445_v12  ;;  %8720 = vmatprep.subr.bf16.mxu0 %v9446_v27  ;;  %v9474_v12 = vld [vmem:[%s11927_s4 + $0x490] sm:$0xff]   ;;  %v9483_v27 = vld [vmem:[%s11927_s4 + $0x4a0] sm:$0xff]  }
 0x322   : > { %8760 = vmatprep.subr.bf16.mxu1 %v9447_v21  ;;  %5299 = vmatprep.mubr.bf16.mxu1 %v10989_v38  ;;  %v7870_v21 = vcombine.low %v3437_v28, %v3438_v2 }
 0x324   : > { %8721 = vmatpush3.bf16.msra.mxu0 %v9448_v1  ;;  %v9487_v1 = vld [vmem:[%s11927_s4 + $0x4a8] sm:$0xff]  }
 0x325   : > { %8761 = vmatpush3.bf16.msra.mxu1 %v9449_v40  ;;  %8722 = vmatprep.subr.bf16.mxu0 %v9453_v32  ;;  %v7869_v40 = vcombine.low %v10918_v53, %v10973_v8  ;;  %v11097_v53 = vcombine.low %v11091_v16, %v3333_v6 }
 0x326   : > { %8762 = vmatprep.subr.bf16.mxu1 %v9454_v4  ;;  %v7874_v4 = vcombine.low %v10942_v24, %v11091_v16  ;;  %v9490_v24 = vld [vmem:[%s11927_s4 + $0x1f0] sm:$0xff]  }
 0x327   : > { %v3452_v30 = vrot.slane %v11097_v53, 1  ;;  %v3446_v31 = vshrl.u32 %v11097_v53, 16  ;;  %v3448_v32 = vshll.u32 %v11097_v53, 16  ;;  %v9549_v53 = vld [vmem:[%s11927_s4 + $0x610] sm:$0xff]  }
 0x328   : > { %5300 = vmatmul.mubr.bf16.gmra.mrb[44].mxu1 %v10982_v36  ;;  %8723 = vmatpush3.bf16.msra.mxu0 %v9455_v34  ;;  %v11120_v34 = vcombine.low %v3438_v2, %v3439_v18  ;;  %v11168_v2 = vld [vmem:[#allocation2 + $0xb0] sm:$0xf] }
 0x329   : > { %8763 = vmatpush3.bf16.msra.mxu1 %v9456_v47  ;;  %5405 = vmatprep.mubr.bf16.mxu1 %v7858_v43  ;;  %v7876_v8 = vcombine.low %v3439_v18, %v3452_v30  ;;  %v3450_v47 = vrot.slane %v3448_v32, 1  ;;  %v9493_v43 = vld [vmem:[%s11927_s4 + $0x4b0] sm:$0xff]   ;;  %v9513_v18 = vld [vmem:[%s11927_s4 + $0x218] sm:$0xff]   ;;  %v5578_v32 = vld [vmem:[#allocation2 + $0xc4] sm:$0x1] }
 0x32a   : > { %8764 = vmatprep.subr.bf16.mxu1 %v9458_v37  ;;  %8724 = vmatprep.subr.bf16.mxu0 %v9457_v46  ;;  %v9492_v37 = vld [vmem:[%s11927_s4 + $0x1b0] sm:$0xff]  }
 0x32b   : > { %v11125_v46 = vor.u32 %v3450_v47, %v3446_v31  ;;  %v9514_v47 = vld [vmem:[%s11927_s4 + $0x558] sm:$0xff]  }
 0x32c   : > { %8725 = vmatpush3.bf16.msra.mxu0 %v9459_v52 }
 0x32d   : > { %8765 = vmatpush3.bf16.msra.mxu1 %v9460_v49  ;;  %8790 = vmatprep.subr.bf16.mxu0 %v9462_v44  ;;  %v9494_v49 = vld [vmem:[%s11927_s4 + $0x1f8] sm:$0xff]   ;;  %v7875_v52 = vcombine.low %v10975_v13, %v11125_v46  ;;  %v9500_v13 = vld [vmem:[%s11927_s4 + $0x200] sm:$0xff]  }
 0x32e   : > { %8842 = vmatprep.subr.bf16.mxu1 %v9463_v51  ;;  %v5569_v51 = vld [vmem:[#allocation2 + $0xa0] sm:$0xf]  ;;  %v9496_v44 = vld [vmem:[%s11927_s4 + $0x1b8] sm:$0xff]  }
 0x32f   : > { %5341 = vmatmul.mubr.bf16.vlgmr.msra.gmra.mrb[40].mxu0 %v7855_v62  ;;  %v11144_v62 = vcombine.low %v5569_v51, %v5570_v3 }
 0x330   : > { %5406 = vmatmul.mubr.bf16.vlgmr.msra.gmra.mrb[48].mxu1 %v7857_v59  ;;  %8791 = vmatpush3.bf16.msra.mxu0 %v9464_v61  ;;  %v11138_v61 = vld [vmem:[#allocation2 + $0xa8] sm:$0xf]  ;;  %v9497_v59 = vld [vmem:[%s11927_s4 + $0x4b8] sm:$0xff]  }
 0x331   : > { %8843 = vmatpush3.bf16.msra.mxu1 %v9465_v10  ;;  %8792 = vmatprep.subr.bf16.mxu0 %v9466_v60  ;;  %v11147_v10 = vcombine.low %v11138_v61, %v5572_v19  ;;  %v5630_v60 = vshrl.u32 %v11144_v62, 16  ;;  %v9520_v19 = vld [vmem:[%s11927_s4 + $0x560] sm:$0xff]  }
 0x332   : > { %8844 = vmatprep.subr.bf16.mxu1 %v9467_v0  ;;  %5348 = vmatprep.mubr.bf16.mxu0 %v7862_v26  ;;  %v5632_v0 = vshll.u32 %v11144_v62, 16 }
 0x333   : > { %5413 = vmatprep.mubr.bf16.mxu1 %v7864_v54  ;;  %v5639_v26 = vshll.u32 %v11147_v10, 16  ;;  %v9502_v54 = vld [vmem:[%s11927_s4 + $0x540] sm:$0xff]  }
 0x334   : > { %8793 = vmatpush3.bf16.msra.mxu0 %v9468_v25  ;;  %v5637_v25 = vshrl.u32 %v11147_v10, 16 }
 0x335   : > { %8845 = vmatpush3.bf16.msra.mxu1 %v9469_v29  ;;  %8794 = vmatprep.subr.bf16.mxu0 %v9471_v35  ;;  %v5634_v29 = vrot.slane %v5632_v0, 1  ;;  %v5641_v35 = vrot.slane %v5639_v26, 1  ;;  %v3335_v0 = vld [vmem:[#allocation2 + $0x4c] sm:$0x1]  ;;  %v9521_v26 = vld [vmem:[%s11927_s4 + $0x520] sm:$0xff]  }
 0x336   : > { %8846 = vmatprep.subr.bf16.mxu1 %v9472_v56 }
 0x337   : > { %5349 = vmatmul.mubr.bf16.gmra.mrb[44].mxu0 %v11047_v55  ;;  %v5635_v56 = vor.u32 %v5634_v29, %v5630_v60  ;;  %v11160_v28 = vor.u32 %v5641_v35, %v5637_v25  ;;  %v11258_v29 = vld [vmem:[#allocation2 + $0xd0] sm:$0xf]  ;;  %v5582_v35 = vld [vmem:[#allocation2 + $0xd4] sm:$0x1] }
 0x338   : > { %5414 = vmatmul.mubr.bf16.gmra.mrb[52].mxu1 %v7863_v7  ;;  %8795 = vmatpush3.bf16.msra.mxu0 %v9473_v48  ;;  %v9503_v48 = vld [vmem:[%s11927_s4 + $0x500] sm:$0xff]   ;;  %v8106_v7 = vcombine.low %v5569_v51, %v11138_v61  ;;  %v9515_v51 = vld [vmem:[%s11927_s4 + $0x518] sm:$0xff]  }
 0x339   : > { %8847 = vmatpush3.bf16.msra.mxu1 %v9474_v12  ;;  %8796 = vmatprep.subr.bf16.mxu0 %v9475_v58  ;;  %v5574_v12 = vld [vmem:[#allocation2 + $0xb4] sm:$0x1]  ;;  %v11171_v58 = vld [vmem:[#allocation2 + $0xb8] sm:$0xf] }
 0x33a   : > { %8848 = vmatprep.subr.bf16.mxu1 %v9476_v17  ;;  %5356 = vmatprep.mubr.bf16.mxu0 %v7868_v5  ;;  %v5576_v17 = vld [vmem:[#allocation2 + $0xbc] sm:$0x1]  ;;  %v9505_v5 = vld [vmem:[%s11927_s4 + $0x548] sm:$0xff]   ;;  %v11212_v31 = vcombine.low %v11168_v2, %v11171_v58 }
 0x33b   : > { %5421 = vmatprep.mubr.bf16.mxu1 %v7870_v21  ;;  %v11179_v21 = vcombine.low %v11168_v2, %v5574_v12 }
 0x33c   : > { %8797 = vmatpush3.bf16.msra.mxu0 %v9477_v33  ;;  %v8107_v33 = vcombine.low %v5635_v56, %v11160_v28  ;;  %v11260_v56 = vld [vmem:[#allocation2 + $0xd8] sm:$0xf] }
 0x33d   : > { %8849 = vmatpush3.bf16.msra.mxu1 %v9478_v23  ;;  %8798 = vmatprep.subr.bf16.mxu0 %v9480_v14  ;;  %v11182_v23 = vcombine.low %v11171_v58, %v5576_v17  ;;  %v9509_v14 = vld [vmem:[%s11927_s4 + $0x210] sm:$0xff]   ;;  %v9523_v17 = vld [vmem:[%s11927_s4 + $0x568] sm:$0xff]  }
 0x33e   : > { %8850 = vmatprep.subr.bf16.mxu1 %v9481_v41  ;;  %v5646_v41 = vshll.u32 %v11179_v21, 16 }
 0x33f   : > { %5357 = vmatmul.mubr.bf16.gmra.mrb[48].mxu0 %v11081_v42 }
 0x340   : > { %5422 = vmatmul.mubr.bf16.gmra.mrb[56].mxu1 %v7869_v40  ;;  %8799 = vmatpush3.bf16.msra.mxu0 %v9482_v22  ;;  %v5651_v22 = vshrl.u32 %v11182_v23, 16  ;;  %v5648_v40 = vrot.slane %v5646_v41, 1 }
 0x341   : > { %8851 = vmatpush3.bf16.msra.mxu1 %v9483_v27  ;;  %8800 = vmatprep.subr.bf16.mxu0 %v9484_v9  ;;  %v5653_v27 = vshll.u32 %v11182_v23, 16 }
 0x342   : > { %8852 = vmatprep.subr.bf16.mxu1 %v9485_v20  ;;  %5364 = vmatprep.mubr.bf16.mxu0 %v7874_v4  ;;  %v9511_v20 = vld [vmem:[%s11927_s4 + $0x550] sm:$0xff]  }
 0x343   : > { %5429 = vmatprep.mubr.bf16.mxu1 %v7876_v8  ;;  %v5655_v9 = vrot.slane %v5653_v27, 1  ;;  %v9512_v4 = vld [vmem:[%s11927_s4 + $0x510] sm:$0xff]  }
 0x344   : > { %8801 = vmatpush3.bf16.msra.mxu0 %v9486_v63 }
 0x345   : > { %8853 = vmatpush3.bf16.msra.mxu1 %v9487_v1  ;;  %8802 = vmatprep.subr.bf16.mxu0 %v9490_v24  ;;  %v11200_v63 = vor.u32 %v5655_v9, %v5651_v22  ;;  %v11208_v1 = vld [vmem:[#allocation2 + $0xc0] sm:$0xf]  ;;  %v11214_v24 = vld [vmem:[#allocation2 + $0xc8] sm:$0xf] }
 0x346   : > { %8854 = vmatprep.subr.bf16.mxu1 %v9491_v57  ;;  %v5580_v57 = vld [vmem:[#allocation2 + $0xcc] sm:$0x1] }
 0x347   : > { %5365 = vmatmul.mubr.bf16.gmra.mrb[52].mxu0 %v11120_v34  ;;  %v9524_v9 = vld [vmem:[%s11927_s4 + $0x528] sm:$0xff]  }
 0x348   : > { %5430 = vmatmul.mubr.bf16.gmra.mrb[60].mxu1 %v7875_v52  ;;  %8803 = vmatpush3.bf16.msra.mxu0 %v9492_v37  ;;  %v11225_v37 = vcombine.low %v11208_v1, %v5578_v32 }
 0x349   : > { %8855 = vmatpush3.bf16.msra.mxu1 %v9493_v43  ;;  %8804 = vmatprep.subr.bf16.mxu0 %v9494_v49  ;;  %v11228_v43 = vcombine.low %v11214_v24, %v5580_v57  ;;  %v9518_v49 = vld [vmem:[%s11927_s4 + $0x220] sm:$0xff]   ;;  %v9531_v57 = vld [vmem:[%s11927_s4 + $0x570] sm:$0xff]  }
 0x34a   : > { %8856 = vmatprep.subr.bf16.mxu1 %v9495_v50  ;;  %5470 = vmatprep.mubr.bf16.mxu0 %v10877_v39  ;;  %v9504_v39 = vld [vmem:[%s11927_s4 + $0x208] sm:$0xff]   ;;  %v5660_v50 = vshll.u32 %v11225_v37, 16 }
 0x34b   : > { %6402 = vmatprep.mubr.bf16.mxu1 %v8107_v33  ;;  %v5665_v52 = vshrl.u32 %v11228_v43, 16 }
 0x34c   : > { %8805 = vmatpush3.bf16.msra.mxu0 %v9496_v44  ;;  %v5667_v44 = vshll.u32 %v11228_v43, 16  ;;  %v5662_v3 = vrot.slane %v5660_v50, 1  ;;  %v9533_v50 = vld [vmem:[%s11927_s4 + $0x238] sm:$0xff]  }
 0x34d   : > { %8857 = vmatpush3.bf16.msra.mxu1 %v9497_v59  ;;  %9038 = vmatprep.subr.bf16.mxu0 %v9500_v13 }
 0x34e   : > { %8882 = vmatprep.subr.bf16.mxu1 %v9502_v54  ;;  %v5669_v59 = vrot.slane %v5667_v44, 1  ;;  %v5685_v44 = vrot.slane %v11144_v62, 1  ;;  %v9539_v62 = vld [vmem:[%s11927_s4 + $0x640] sm:$0xff]  }
 0x34f   : > { %5471 = vmatmul.mubr.bf16.vlgmr.msra.gmra.mrb[56].mxu0 %v10868_v45  ;;  %v5644_v45 = vshrl.u32 %v11179_v21, 16 }
 0x350   : > { %9039 = vmatpush3.bf16.msra.mxu0 %v9500_v13  ;;  %5478 = vmatprep.mubr.bf16.mxu0 %v10932_v15  ;;  %v9506_v15 = vld [vmem:[%s11927_s4 + $0x508] sm:$0xff]   ;;  %v11251_v25 = vor.u32 %v5669_v59, %v5665_v52  ;;  %v9534_v52 = vld [vmem:[%s11927_s4 + $0x578] sm:$0xff]  }
 0x351   : > { %9040 = vmatprep.subr.bf16.mxu0 %v9504_v39  ;;  %6403 = vmatmul.mubr.bf16.vlgmr.msra.gmra.mrb[64].mxu1 %v8106_v7  ;;  %v11198_v6 = vor.u32 %v5648_v40, %v5644_v45  ;;  %v9522_v13 = vld [vmem:[%s11927_s4 + $0x228] sm:$0xff]   ;;  %v11268_v7 = vcombine.low %v11258_v29, %v5582_v35  ;;  %v5687_v35 = vrot.slane %v11179_v21, 1  ;;  %v9548_v21 = vld [vmem:[%s11927_s4 + $0x650] sm:$0xff]  }
 0x352   : > { %8883 = vmatpush3.bf16.msra.mxu1 %v9503_v48  ;;  %v11265_v48 = vcombine.low %v11208_v1, %v11214_v24  ;;  %v9541_v59 = vld [vmem:[%s11927_s4 + $0x5c8] sm:$0xff]  }
 0x353   : > { %8884 = vmatprep.subr.bf16.mxu1 %v9505_v5  ;;  %v11218_v8 = vcombine.low %v11198_v6, %v11200_v63  ;;  %v5672_v45 = vshrl.u32 %v11268_v7, 16  ;;  %v5674_v41 = vshll.u32 %v11268_v7, 16 }
 0x354   : > { %9041 = vmatpush3.bf16.msra.mxu0 %v9504_v39  ;;  %v5584_v39 = vld [vmem:[#allocation2 + $0xdc] sm:$0x1] }
 0x355   : > { %9042 = vmatprep.subr.bf16.mxu0 %v9509_v14  ;;  %6410 = vmatprep.mubr.bf16.mxu1 %v11218_v8  ;;  %v11280_v5 = vcombine.low %v11260_v56, %v5584_v39  ;;  %v5676_v40 = vrot.slane %v5674_v41, 1  ;;  %v5690_v41 = vrot.slane %v11228_v43, 1  ;;  %v9577_v43 = vld [vmem:[%s11927_s4 + $0x6a0] sm:$0xff]  }
 0x356   : > { %8885 = vmatpush3.bf16.msra.mxu1 %v9506_v15 }
 0x357   : > { %5479 = vmatmul.mubr.bf16.gmra.mrb[60].mxu0 %v10925_v11  ;;  %8886 = vmatprep.subr.bf16.mxu1 %v9511_v20  ;;  %v5658_v11 = vshrl.u32 %v11225_v37, 16  ;;  %v5679_v27 = vshrl.u32 %v11280_v5, 16  ;;  %v5681_v15 = vshll.u32 %v11280_v5, 16 }
 0x358   : > { %9043 = vmatpush3.bf16.msra.mxu0 %v9509_v14  ;;  %5486 = vmatprep.mubr.bf16.mxu0 %v10989_v38  ;;  %v3334_v38 = vld [vmem:[#allocation2 + $0x48] sm:$0xf]  ;;  %v9529_v14 = vld [vmem:[%s11927_s4 + $0x230] sm:$0xff]  }
 0x359   : > { %9044 = vmatprep.subr.bf16.mxu0 %v9513_v18  ;;  %6411 = vmatmul.mubr.bf16.gmra.mrb[68].mxu1 %v11212_v31  ;;  %v11249_v60 = vor.u32 %v5662_v3, %v5658_v11  ;;  %v11256_v54 = vcombine.low %v3334_v38, %v3335_v0  ;;  %v7877_v32 = vcombine.low %v11091_v16, %v3334_v38  ;;  %v5686_v3 = vrot.slane %v11147_v10, 1  ;;  %v9538_v10 = vld [vmem:[%s11927_s4 + $0x580] sm:$0xff]   ;;  %v9543_v38 = vld [vmem:[%s11927_s4 + $0x648] sm:$0xff]  }
 0x35a   : > { %8887 = vmatpush3.bf16.msra.mxu1 %v9512_v4  ;;  %v5683_v4 = vrot.slane %v5681_v15, 1  ;;  %v11305_v11 = vcombine.low %v11258_v29, %v11260_v56 }
 0x35b   : > { %8888 = vmatprep.subr.bf16.mxu1 %v9514_v47  ;;  %v11272_v12 = vcombine.low %v11249_v60, %v11251_v25  ;;  %v3461_v33 = vshll.u32 %v11256_v54, 16  ;;  %v3465_v0 = vrot.slane %v11256_v54, 1  ;;  %v8111_v39 = vcombine.low %v5686_v3, %v5687_v35 }
 0x35c   : > { %9045 = vmatpush3.bf16.msra.mxu0 %v9513_v18  ;;  %v11294_v18 = vor.u32 %v5676_v40, %v5672_v45  ;;  %v5689_v45 = vrot.slane %v11225_v37, 1  ;;  %v9557_v37 = vld [vmem:[%s11927_s4 + $0x660] sm:$0xff]   ;;  %v9559_v40 = vld [vmem:[%s11927_s4 + $0x5e8] sm:$0xff]  }
 0x35d   : > { %9046 = vmatprep.subr.bf16.mxu0 %v9518_v49  ;;  %6418 = vmatprep.mubr.bf16.mxu1 %v11272_v12  ;;  %v3463_v22 = vrot.slane %v3461_v33, 1  ;;  %v9552_v33 = vld [vmem:[%s11927_s4 + $0x658] sm:$0xff]  }
 0x35e   : > { %8889 = vmatpush3.bf16.msra.mxu1 %v9515_v51  ;;  %v8109_v51 = vcombine.low %v11138_v61, %v11168_v2  ;;  %v9537_v61 = vld [vmem:[%s11927_s4 + $0x5c0] sm:$0xff]   ;;  %v9535_v2 = vld [vmem:[%s11927_s4 + $0x538] sm:$0xff]   ;;  %v11409_v15 = vcombine.low %v5689_v45, %v5690_v41 }
 0x35f   : > { %5487 = vmatmul.mubr.bf16.gmra.mrb[64].mxu0 %v10982_v36  ;;  %8890 = vmatprep.subr.bf16.mxu1 %v9520_v19  ;;  %v3459_v36 = vshrl.u32 %v11256_v54, 16  ;;  %v8108_v19 = vcombine.low %v5685_v44, %v5686_v3  ;;  %v9547_v54 = vld [vmem:[%s11927_s4 + $0x590] sm:$0xff]   ;;  %v9571_v3 = vld [vmem:[%s11927_s4 + $0x678] sm:$0xff]  }
 0x360   : > { %9047 = vmatpush3.bf16.msra.mxu0 %v9518_v49  ;;  %v11301_v49 = vor.u32 %v5683_v4, %v5679_v27  ;;  %v9556_v27 = vld [vmem:[%s11927_s4 + $0x5a0] sm:$0xff]   ;;  %v9561_v4 = vld [vmem:[%s11927_s4 + $0x668] sm:$0xff]   ;;  %v9568_v44 = vld [vmem:[%s11927_s4 + $0x630] sm:$0xff]  }
 0x361   : > { %9048 = vmatprep.subr.bf16.mxu0 %v9522_v13  ;;  %6419 = vmatmul.mubr.bf16.gmra.mrb[72].mxu1 %v11265_v48  ;;  %v3464_v20 = vor.u32 %v3463_v22, %v3459_v36  ;;  %v9550_v36 = vld [vmem:[%s11927_s4 + $0x5d8] sm:$0xff]   ;;  %v11402_v22 = vld [vmem:[#allocation2 + $0xe0] sm:$0xf] }
 0x362   : > { %8891 = vmatpush3.bf16.msra.mxu1 %v9521_v26  ;;  %v11312_v16 = vcombine.low %v11294_v18, %v11301_v49  ;;  %v9542_v26 = vld [vmem:[%s11927_s4 + $0x588] sm:$0xff]  }
 0x363   : > { %8892 = vmatprep.subr.bf16.mxu1 %v9523_v17  ;;  %v7878_v47 = vcombine.low %v11125_v46, %v3464_v20  ;;  %v9532_v46 = vld [vmem:[%s11927_s4 + $0x530] sm:$0xff]   ;;  %v8127_v20 = vcombine.low %v11260_v56, %v11402_v22 }
 0x364   : > { %9049 = vmatpush3.bf16.msra.mxu0 %v9522_v13  ;;  %6426 = vmatprep.mubr.bf16.mxu1 %v11312_v16  ;;  %v8115_v13 = vcombine.low %v11171_v58, %v11208_v1  ;;  %v9546_v58 = vld [vmem:[%s11927_s4 + $0x5d0] sm:$0xff]   ;;  %v9545_v1 = vld [vmem:[%s11927_s4 + $0x608] sm:$0xff]  }
 0x365   : > { %9050 = vmatprep.subr.bf16.mxu0 %v9529_v14  ;;  %5494 = vmatprep.mubr.bf16.mxu0 %v7878_v47  ;;  %v5692_v47 = vrot.slane %v11280_v5, 1  ;;  %v9565_v56 = vld [vmem:[%s11927_s4 + $0x5f0] sm:$0xff]  }
 0x366   : > { %8893 = vmatpush3.bf16.msra.mxu1 %v9524_v9  ;;  %v9558_v9 = vld [vmem:[%s11927_s4 + $0x620] sm:$0xff]  }
 0x367   : > { %5495 = vmatmul.mubr.bf16.gmra.mrb[68].mxu0 %v7877_v32  ;;  %8894 = vmatprep.subr.bf16.mxu1 %v9531_v57  ;;  %v9560_v32 = vld [vmem:[%s11927_s4 + $0x5a8] sm:$0xff]   ;;  %v5691_v57 = vrot.slane %v11268_v7, 1  ;;  %v9567_v7 = vld [vmem:[%s11927_s4 + $0x670] sm:$0xff]  }
 0x368   : > { %9051 = vmatpush3.bf16.msra.mxu0 %v9529_v14  ;;  %9054 = vmatprep.mubr.bf16.mxu0 %v11047_v55  ;;  %v9540_v55 = vld [vmem:[%s11927_s4 + $0x600] sm:$0xff]   ;;  %v9551_v14 = vld [vmem:[%s11927_s4 + $0x598] sm:$0xff]  }
 0x369   : > { %6427 = vmatmul.mubr.bf16.gmra.mrb[76].mxu1 %v11305_v11  ;;  %9052 = vmatprep.subr.bf16.mxu0 %v9533_v50 }
 0x36a   : > { %8895 = vmatpush3.bf16.msra.mxu1 %v9532_v46  ;;  %6467 = vmatprep.mubr.bf16.mxu1 %v8109_v51  ;;  %v9566_v46 = vld [vmem:[%s11927_s4 + $0x5b0] sm:$0xff]   ;;  %v11442_v51 = vcombine.low %v5691_v57, %v5692_v47 }
 0x36b   : > { %8896 = vmatprep.subr.bf16.mxu1 %v9534_v52  ;;  %v9569_v52 = vld [vmem:[%s11927_s4 + $0x5f8] sm:$0xff]  }
 0x36c   : > { %9053 = vmatpush3.bf16.msra.mxu0 %v9533_v50  ;;  %v9564_v50 = vld [vmem:[%s11927_s4 + $0x628] sm:$0xff]  }
 0x36d   : > { %8922 = vmatprep.subr.bf16.mxu0 %v9537_v61  ;;  %v5586_v61 = vld [vmem:[#allocation2 + $0xe4] sm:$0x1] }
 0x36e   : > { %8897 = vmatpush3.bf16.msra.mxu1 %v9535_v2  ;;  %v9570_v2 = vld [vmem:[%s11927_s4 + $0x5b8] sm:$0xff]  }
 0x36f   : > { %9055 = vmatmul.mubr.bf16.vlgmr.msra.gmra.mrb[32].mxu0 %v11081_v42  ;;  %8962 = vmatprep.subr.bf16.mxu1 %v9539_v62  ;;  %v5688_v42 = vrot.slane %v11182_v23, 1  ;;  %v9573_v62 = vld [vmem:[%s11927_s4 + $0x680] sm:$0xff]  }
 0x370   : > { %8923 = vmatpush3.bf16.msra.mxu0 %v9538_v10  ;;  %9058 = vmatprep.mubr.bf16.mxu0 %v11120_v34  ;;  %v7879_v34 = vcombine.low %v3452_v30, %v3465_v0  ;;  %v8121_v30 = vcombine.low %v11214_v24, %v11258_v29  ;;  %v9555_v24 = vld [vmem:[%s11927_s4 + $0x5e0] sm:$0xff]   ;;  %v9554_v29 = vld [vmem:[%s11927_s4 + $0x618] sm:$0xff]   ;;  %v9574_v0 = vld [vmem:[%s11927_s4 + $0x688] sm:$0xff]  }
 0x371   : > { %6468 = vmatmul.mubr.bf16.vlgmr.msra.gmra.mrb[80].mxu1 %v8108_v19  ;;  %8924 = vmatprep.subr.bf16.mxu0 %v9541_v59  ;;  %v11374_v17 = vcombine.low %v5687_v35, %v5688_v42  ;;  %v9572_v10 = vld [vmem:[%s11927_s4 + $0x638] sm:$0xff]   ;;  %v8110_v19 = vcombine.low %v11160_v28, %v11198_v6  ;;  %v11466_v59 = vld [vmem:[#allocation2 + $0xe8] sm:$0xf]  ;;  %v9575_v28 = vld [vmem:[%s11927_s4 + $0x690] sm:$0xff]  }
 0x372   : > { %8963 = vmatpush3.bf16.msra.mxu1 %v9540_v55  ;;  %6475 = vmatprep.mubr.bf16.mxu1 %v8115_v13  ;;  %v8117_v55 = vcombine.low %v5688_v42, %v5689_v45  ;;  %v5588_v13 = vld [vmem:[#allocation2 + $0xec] sm:$0x1]  ;;  %v9576_v35 = vld [vmem:[%s11927_s4 + $0x698] sm:$0xff]   ;;  %v8123_v42 = vcombine.low %v5690_v41, %v5691_v57 }
 0x373   : > { %8964 = vmatprep.subr.bf16.mxu1 %v9543_v38  ;;  %v11471_v38 = vcombine.low %v11402_v22, %v5586_v61 }
 0x374   : > { %8925 = vmatpush3.bf16.msra.mxu0 %v9542_v26  ;;  %v8116_v26 = vcombine.low %v11200_v63, %v11249_v60 }
 0x375   : > { %8926 = vmatprep.subr.bf16.mxu0 %v9546_v58  ;;  %v5701_v23 = vshll.u32 %v11471_v38, 16 }
 0x376   : > { %8965 = vmatpush3.bf16.msra.mxu1 %v9545_v1 }
 0x377   : > { %8966 = vmatprep.subr.bf16.mxu1 %v9548_v21  ;;  %9059 = vmatmul.mubr.bf16.gmra.mrb[36].mxu0 %v7879_v34  ;;  %v5703_v58 = vrot.slane %v5701_v23, 1 }
 0x378   : > { %8927 = vmatpush3.bf16.msra.mxu0 %v9547_v54  ;;  %6532 = vmatprep.mubr.bf16.mxu0 %v8111_v39  ;;  %v5705_v54 = vrot.slane %v11471_v38, 1 }
 0x379   : > { %6476 = vmatmul.mubr.bf16.gmra.mrb[84].mxu1 %v11374_v17  ;;  %8928 = vmatprep.subr.bf16.mxu0 %v9550_v36 }
 0x37a   : > { %8967 = vmatpush3.bf16.msra.mxu1 %v9549_v53  ;;  %6483 = vmatprep.mubr.bf16.mxu1 %v8121_v30 }
 0x37b   : > { %8968 = vmatprep.subr.bf16.mxu1 %v9552_v33  ;;  %v8122_v33 = vcombine.low %v11251_v25, %v11294_v18 }
 0x37c   : > { %8929 = vmatpush3.bf16.msra.mxu0 %v9551_v14 }
 0x37d   : > { %8930 = vmatprep.subr.bf16.mxu0 %v9555_v24 }
 0x37e   : > { %8969 = vmatpush3.bf16.msra.mxu1 %v9554_v29 }
 0x37f   : > { %8970 = vmatprep.subr.bf16.mxu1 %v9557_v37 }
 0x380   : > { %8931 = vmatpush3.bf16.msra.mxu0 %v9556_v27 }
 0x381   : > { %6484 = vmatmul.mubr.bf16.gmra.mrb[88].mxu1 %v11409_v15  ;;  %8932 = vmatprep.subr.bf16.mxu0 %v9559_v40  ;;  %v9579_v40 = vld [vmem:[%s11927_s4 + $0x6b0] sm:$0xff]  }
 0x382   : > { %8971 = vmatpush3.bf16.msra.mxu1 %v9558_v9  ;;  %6491 = vmatprep.mubr.bf16.mxu1 %v8127_v20 }
 0x383   : > { %8972 = vmatprep.subr.bf16.mxu1 %v9561_v4 }
 0x384   : > { %8933 = vmatpush3.bf16.msra.mxu0 %v9560_v32 }
 0x385   : > { %8934 = vmatprep.subr.bf16.mxu0 %v9565_v56 }
 0x386   : > { %8973 = vmatpush3.bf16.msra.mxu1 %v9564_v50  ;;  %v9582_v50 = vld [vmem:[%s11927_s4 + $0x6b8] sm:$0xff]  }
 0x387   : > { %8974 = vmatprep.subr.bf16.mxu1 %v9567_v7 }
 0x388   : > { %8935 = vmatpush3.bf16.msra.mxu0 %v9566_v46 }
 0x389   : > { %6492 = vmatmul.mubr.bf16.gmra.mrb[92].mxu1 %v11442_v51  ;;  %8936 = vmatprep.subr.bf16.mxu0 %v9569_v52 }
 0x38a   : > { %8975 = vmatpush3.bf16.msra.mxu1 %v9568_v44  ;;  %6597 = vmatprep.mubr.bf16.mxu1 %v11218_v8  ;;  %v11477_v8 = vcombine.low %v11466_v59, %v5588_v13 }
 0x38b   : > { %8976 = vmatprep.subr.bf16.mxu1 %v9571_v3 }
 0x38c   : > { %8937 = vmatpush3.bf16.msra.mxu0 %v9570_v2  ;;  %v5714_v6 = vshll.u32 %v11477_v8, 16 }
 0x38d   : > { %9062 = vmatprep.subr.bf16.mxu0 %v9573_v62 }
 0x38e   : > { %8977 = vmatpush3.bf16.msra.mxu1 %v9572_v10  ;;  %v5716_v21 = vrot.slane %v5714_v6, 1 }
 0x38f   : > { %6533 = vmatmul.mubr.bf16.vlgmr.msra.gmra.mrb[72].mxu0 %v8110_v19 }
 0x390   : > { %9063 = vmatpush3.bf16.msra.mxu0 %v9573_v62  ;;  %6540 = vmatprep.mubr.bf16.mxu0 %v8117_v55 }
 0x391   : > { %6598 = vmatmul.mubr.bf16.vlgmr.msra.gmra.mrb[96].mxu1 %v11212_v31  ;;  %9064 = vmatprep.subr.bf16.mxu0 %v9574_v0  ;;  %v5699_v31 = vshrl.u32 %v11471_v38, 16 }
 0x392   : > { %6605 = vmatprep.mubr.bf16.mxu1 %v11272_v12  ;;  %v5712_v12 = vshrl.u32 %v11477_v8, 16 }
 0x393   : > { %v5704_v53 = vor.u32 %v5703_v58, %v5699_v31 }
 0x394   : > { %9065 = vmatpush3.bf16.msra.mxu0 %v9574_v0  ;;  %v5717_v30 = vor.u32 %v5716_v21, %v5712_v12 }
 0x395   : > { %9066 = vmatprep.subr.bf16.mxu0 %v9575_v28  ;;  %v8128_v32 = vcombine.low %v11301_v49, %v5704_v53 }
 0x396   : > { %v8131_v37 = vcombine.low %v5704_v53, %v5717_v30 }
 0x397   : > { %6541 = vmatmul.mubr.bf16.gmra.mrb[76].mxu0 %v8116_v26 }
 0x398   : > { %9067 = vmatpush3.bf16.msra.mxu0 %v9575_v28  ;;  %6548 = vmatprep.mubr.bf16.mxu0 %v8123_v42 }
 0x399   : > { %6606 = vmatmul.mubr.bf16.gmra.mrb[100].mxu1 %v11265_v48  ;;  %9068 = vmatprep.subr.bf16.mxu0 %v9576_v35  ;;  %v8129_v48 = vcombine.low %v5692_v47, %v5705_v54 }
 0x39a   : > { %6613 = vmatprep.mubr.bf16.mxu1 %v11312_v16  ;;  %v9578_v16 = vld [vmem:[%s11927_s4 + $0x6a8] sm:$0xff]  }
 0x39c   : > { %9069 = vmatpush3.bf16.msra.mxu0 %v9576_v35 }
 0x39d   : > { %9070 = vmatprep.subr.bf16.mxu0 %v9577_v43 }
 0x39f   : > { %6549 = vmatmul.mubr.bf16.gmra.mrb[80].mxu0 %v8122_v33 }
 0x3a0   : > { %9071 = vmatpush3.bf16.msra.mxu0 %v9577_v43  ;;  %6556 = vmatprep.mubr.bf16.mxu0 %v8129_v48 }
 0x3a1   : > { %6614 = vmatmul.mubr.bf16.gmra.mrb[104].mxu1 %v11305_v11  ;;  %9072 = vmatprep.subr.bf16.mxu0 %v9578_v16  ;;  %v8130_v11 = vcombine.low %v11402_v22, %v11466_v59 }
 0x3a2   : > { %v8514_v14 = vpop.f32.mrb[0].mxu0  ;;  %6621 = vmatprep.mubr.bf16.mxu1 %v8131_v37 }
 0x3a3   : > { %v8554_v1 = vpop.f32.mrb[0].mxu1  ;;  %v8515_v45 = vpop.f32.mrb[1].mxu0 }
 0x3a4   : > { %v8555_v34 = vpop.f32.mrb[1].mxu1  ;;  %v8516_v41 = vadd.f32 %v8515_v45, %v8514_v14  ;;  %v8517_v24 = vpop.f32.mrb[2].mxu0  ;;  %9073 = vmatpush3.bf16.msra.mxu0 %v9578_v16 }
 0x3a5   : > { %v8556_v63 = vadd.f32 %v8555_v34, %v8554_v1  ;;  %v8557_v60 = vpop.f32.mrb[2].mxu1  ;;  %v8518_v29 = vpop.f32.mrb[3].mxu0  ;;  %9074 = vmatprep.subr.bf16.mxu0 %v9579_v40 }
 0x3a6   : > { %v8558_v39 = vpop.f32.mrb[3].mxu1  ;;  %v8519_v25 = vadd.f32 %v8518_v29, %v8517_v24 }
 0x3a7   : > { %v8559_v36 = vadd.f32 %v8558_v39, %v8557_v60  ;;  %v11510_v27 = vadd.f32 %v8556_v63, %v8516_v41  ;;  %6557 = vmatmul.mubr.bf16.gmra.mrb[84].mxu0 %v8128_v32 }
 0x3a8   : > { %9075 = vmatpush3.bf16.msra.mxu0 %v9579_v40  ;;  %9078 = vmatprep.mubr.bf16.mxu0 %v11374_v17  ;;  %v5718_v17 = vrot.slane %v11477_v8, 1 }
 0x3a9   : > { %v11513_v5 = vadd.f32 %v8559_v36, %v8519_v25  ;;  %6622 = vmatmul.mubr.bf16.gmra.mrb[108].mxu1 %v8130_v11  ;;  %9076 = vmatprep.subr.bf16.mxu0 %v9582_v50 }
 0x3aa   : > { %v8520_v56 = vpop.f32.mrb[4].mxu0  ;;  %v8132_v35 = vcombine.low %v5705_v54, %v5718_v17 }
 0x3ab   : > { %v8560_v18 = vpop.f32.mrb[4].mxu1  ;;  %v8521_v7 = vpop.f32.mrb[5].mxu0 }
 0x3ac   : > { %v8561_v9 = vpop.f32.mrb[5].mxu1  ;;  %v8522_v46 = vadd.f32 %v8521_v7, %v8520_v56  ;;  %v8523_v52 = vpop.f32.mrb[6].mxu0  ;;  %9077 = vmatpush3.bf16.msra.mxu0 %v9582_v50 }
 0x3ad   : > { %v8562_v20 = vadd.f32 %v8561_v9, %v8560_v18  ;;  %v8563_v4 = vpop.f32.mrb[6].mxu1  ;;  %v8524_v44 = vpop.f32.mrb[7].mxu0 }
 0x3ae   : > { %v8564_v57 = vpop.f32.mrb[7].mxu1  ;;  %v8525_v3 = vadd.f32 %v8524_v44, %v8523_v52 }
 0x3af   : > { %v8565_v47 = vadd.f32 %v8564_v57, %v8563_v4  ;;  %v11525_v49 = vadd.f32 %v8562_v20, %v8522_v46  ;;  %9079 = vmatmul.mubr.bf16.vlgmr.msra.gmra.mrb[32].mxu0 %v11409_v15 }
 0x3b0   : > { %9082 = vmatprep.mubr.bf16.mxu0 %v11442_v51 }
 0x3b1   : > { %v11527_v2 = vadd.f32 %v8565_v47, %v8525_v3 }
 0x3b2   : > { %v8526_v55 = vpop.f32.mrb[8].mxu0 }
 0x3b3   : > { %v8566_v61 = vpop.f32.mrb[8].mxu1  ;;  %v8527_v13 = vpop.f32.mrb[9].mxu0 }
 0x3b4   : > { %v8567_v22 = vpop.f32.mrb[9].mxu1  ;;  %v8528_v0 = vadd.f32 %v8527_v13, %v8526_v55  ;;  %v8529_v28 = vpop.f32.mrb[10].mxu0 }
 0x3b5   : > { %v8568_v62 = vadd.f32 %v8567_v22, %v8566_v61  ;;  %v8569_v10 = vpop.f32.mrb[10].mxu1  ;;  %v8530_v23 = vpop.f32.mrb[11].mxu0 }
 0x3b6   : > { %v8570_v19 = vpop.f32.mrb[11].mxu1  ;;  %v8531_v26 = vadd.f32 %v8530_v23, %v8529_v28 }
 0x3b7   : > { %v8571_v59 = vadd.f32 %v8570_v19, %v8569_v10  ;;  %v4548_v6 = vadd.f32 %v8568_v62, %v8528_v0  ;;  %9083 = vmatmul.mubr.bf16.gmra.mrb[36].mxu0 %v8132_v35 }
 0x3b9   : > { %v4551_v31 = vadd.f32 %v8571_v59, %v8531_v26 }
 0x3ba   : > { %v8532_v34 = vpop.f32.mrb[12].mxu0 }
 0x3bb   : > { %v8572_v42 = vpop.f32.mrb[12].mxu1  ;;  %v8533_v8 = vpop.f32.mrb[13].mxu0 }
 0x3bc   : > { %v8573_v58 = vpop.f32.mrb[13].mxu1  ;;  %v8534_v63 = vadd.f32 %v8533_v8, %v8532_v34  ;;  %v8535_v60 = vpop.f32.mrb[14].mxu0 }
 0x3bd   : > { %v8574_v1 = vadd.f32 %v8573_v58, %v8572_v42  ;;  %v8575_v12 = vpop.f32.mrb[14].mxu1  ;;  %v8536_v43 = vpop.f32.mrb[15].mxu0 }
 0x3be   : > { %v8576_v21 = vpop.f32.mrb[15].mxu1  ;;  %v8537_v36 = vadd.f32 %v8536_v43, %v8535_v60 }
 0x3bf   : > { %v8577_v15 = vadd.f32 %v8576_v21, %v8575_v12  ;;  %v4556_v39 = vadd.f32 %v8574_v1, %v8534_v63 }
 0x3c1   : > { %v4559_v54 = vadd.f32 %v8577_v15, %v8537_v36 }
 0x3c2   : > { %v8594_v45 = vpop.f32.mrb[16].mxu0 }
 0x3c3   : > { %v8634_v51 = vpop.f32.mrb[16].mxu1  ;;  %v8595_v48 = vpop.f32.mrb[17].mxu0 }
 0x3c4   : > { %v8635_v53 = vpop.f32.mrb[17].mxu1  ;;  %v8596_v41 = vadd.f32 %v8595_v48, %v8594_v45  ;;  %v8597_v16 = vpop.f32.mrb[18].mxu0 }
 0x3c5   : > { %v8636_v30 = vadd.f32 %v8635_v53, %v8634_v51  ;;  %v8637_v38 = vpop.f32.mrb[18].mxu1  ;;  %v8598_v24 = vpop.f32.mrb[19].mxu0 }
 0x3c6   : > { %v8638_v33 = vpop.f32.mrb[19].mxu1  ;;  %v4597_v37 = vadd.f32 %v8596_v41, %v11510_v27  ;;  %v8599_v25 = vadd.f32 %v8598_v24, %v8597_v16 }
 0x3c7   : > { %v8639_v14 = vadd.f32 %v8638_v33, %v8637_v38 }
 0x3c8   : > { %v4600_v20 = vadd.f32 %v8599_v25, %v11513_v5  ;;  %v4662_v4 = vadd.f32 %v8636_v30, %v4597_v37 }
 0x3ca   : > { %v4665_v47 = vadd.f32 %v8639_v14, %v4600_v20  ;;  %v8600_v11 = vpop.f32.mrb[20].mxu0  ;;  %v9585_v20 = vld [vmem:[%s11929_s6 + $0x4] ss:$16 sps:$4 sm:$0xff]  }
 0x3cb   : > { %v8640_v29 = vpop.f32.mrb[20].mxu1  ;;  %v8601_v56 = vpop.f32.mrb[21].mxu0  ;;  %6976 = vmatprep.subr.bf16.mxu1 %v9585_v20 }
 0x3cc   : > { %v8641_v18 = vpop.f32.mrb[21].mxu1  ;;  %v8602_v50 = vadd.f32 %v8601_v56, %v8600_v11  ;;  %v8603_v7 = vpop.f32.mrb[22].mxu0 }
 0x3cd   : > { %v8642_v40 = vadd.f32 %v8641_v18, %v8640_v29  ;;  %v8643_v9 = vpop.f32.mrb[22].mxu1  ;;  %v8604_v46 = vpop.f32.mrb[23].mxu0 }
 0x3ce   : > { %v8644_v32 = vpop.f32.mrb[23].mxu1  ;;  %v4605_v44 = vadd.f32 %v8602_v50, %v11525_v49  ;;  %v8605_v3 = vadd.f32 %v8604_v46, %v8603_v7 }
 0x3cf   : > { %v8645_v57 = vadd.f32 %v8644_v32, %v8643_v9 }
 0x3d0   : > { %v4608_v62 = vadd.f32 %v8605_v3, %v11527_v2  ;;  %v4670_v10 = vadd.f32 %v8642_v40, %v4605_v44  ;;  %v9591_v44 = vld [vmem:[%s11929_s6 + $0x24] ss:$16 sps:$4 sm:$0xff]   ;;  %v11575_v3 = vld [vmem:[%s11929_s6 + $0x28] ss:$16 sps:$4 sm:$0xff]  }
 0x3d2   : > { %v4673_v59 = vadd.f32 %v8645_v57, %v4608_v62  ;;  %v8606_v55 = vpop.f32.mrb[24].mxu0  ;;  %v9583_v57 = vld [vmem:[%s11929_s6] ss:$16 sps:$4 sm:$0xff]   ;;  %v11592_v62 = vld [vmem:[%s11929_s6 + $0x4c] ss:$16 sps:$4 sm:$0xff]  }
 0x3d3   : > { %v8646_v52 = vpop.f32.mrb[24].mxu1  ;;  %v8607_v13 = vpop.f32.mrb[25].mxu0  ;;  %6977 = vmatpush1.bf16.msra.mxu1 %v9583_v57 }
 0x3d4   : > { %v8647_v27 = vpop.f32.mrb[25].mxu1  ;;  %v8608_v17 = vadd.f32 %v8607_v13, %v8606_v55  ;;  %v8609_v0 = vpop.f32.mrb[26].mxu0  ;;  %6978 = vmatprep.subr.bf16.mxu1 %v9591_v44 }
 0x3d5   : > { %v8648_v61 = vadd.f32 %v8647_v27, %v8646_v52  ;;  %v8649_v22 = vpop.f32.mrb[26].mxu1  ;;  %v8610_v28 = vpop.f32.mrb[27].mxu0  ;;  %v9589_v52 = vld [vmem:[%s11929_s6 + $0x20] ss:$16 sps:$4 sm:$0xff]   ;;  %v11580_v27 = vld [vmem:[%s11929_s6 + $0x2c] ss:$16 sps:$4 sm:$0xff]  }
 0x3d6   : > { %v8650_v5 = vpop.f32.mrb[27].mxu1  ;;  %v4613_v23 = vadd.f32 %v8608_v17, %v4548_v6  ;;  %v8611_v26 = vadd.f32 %v8610_v28, %v8609_v0  ;;  %v9601_v17 = vld [vmem:[%s11929_s6 + $0x60] ss:$16 sps:$4 sm:$0xff]   ;;  %v9603_v0 = vld [vmem:[%s11929_s6 + $0x64] ss:$16 sps:$4 sm:$0xff]  }
 0x3d7   : > { %v8651_v19 = vadd.f32 %v8650_v5, %v8649_v22  ;;  %6979 = vmatpush1.bf16.msra.mxu1 %v9589_v52  ;;  %v9597_v22 = vld [vmem:[%s11929_s6 + $0x44] ss:$16 sps:$4 sm:$0xff]   ;;  %v11600_v5 = vld [vmem:[%s11929_s6 + $0x48] ss:$16 sps:$4 sm:$0xff]  }
 0x3d8   : > { %v4616_v49 = vadd.f32 %v8611_v26, %v4551_v31  ;;  %v4678_v58 = vadd.f32 %v8648_v61, %v4613_v23  ;;  %6980 = vmatprep.subr.bf16.mxu1 %v9597_v22  ;;  %v11613_v23 = vld [vmem:[%s11929_s6 + $0x68] ss:$16 sps:$4 sm:$0xff]   ;;  %v11618_v26 = vld [vmem:[%s11929_s6 + $0x6c] ss:$16 sps:$4 sm:$0xff]   ;;  %v9625_v22 = vld [vmem:[%s11929_s6 + $0xe0] ss:$16 sps:$4 sm:$0xff]  }
 0x3da   : > { %v4681_v15 = vadd.f32 %v8651_v19, %v4616_v49  ;;  %v8612_v2 = vpop.f32.mrb[28].mxu0 }
 0x3db   : > { %v8652_v35 = vpop.f32.mrb[28].mxu1  ;;  %v8613_v8 = vpop.f32.mrb[29].mxu0 }
 0x3dc   : > { %v8653_v42 = vpop.f32.mrb[29].mxu1  ;;  %v8614_v63 = vadd.f32 %v8613_v8, %v8612_v2  ;;  %v8615_v60 = vpop.f32.mrb[30].mxu0 }
 0x3dd   : > { %v8654_v1 = vadd.f32 %v8653_v42, %v8652_v35  ;;  %v8655_v12 = vpop.f32.mrb[30].mxu1  ;;  %v8616_v43 = vpop.f32.mrb[31].mxu0 }
 0x3de   : > { %v8656_v21 = vpop.f32.mrb[31].mxu1  ;;  %v4621_v51 = vadd.f32 %v8614_v63, %v4556_v39  ;;  %v8617_v36 = vadd.f32 %v8616_v43, %v8615_v60 }
 0x3df   : > { %v8657_v34 = vadd.f32 %v8656_v21, %v8655_v12  ;;  %v9607_v12 = vld [vmem:[%s11929_s6 + $0x80] ss:$16 sps:$4 sm:$0xff]   ;;  %v11640_v21 = vld [vmem:[%s11929_s6 + $0x88] ss:$16 sps:$4 sm:$0xff]  }
 0x3e0   : > { %v4624_v6 = vadd.f32 %v8617_v36, %v4559_v54  ;;  %v4686_v38 = vadd.f32 %v8654_v1, %v4621_v51  ;;  %v11632_v1 = vld [vmem:[%s11929_s6 + $0x8c] ss:$16 sps:$4 sm:$0xff]   ;;  %v9615_v36 = vld [vmem:[%s11929_s6 + $0xa4] ss:$16 sps:$4 sm:$0xff]  }
 0x3e2   : > { %v4689_v45 = vadd.f32 %v8657_v34, %v4624_v6 }
 0x3e3   : > { %v8686_v53 = vpop.f32.mrb[32].mxu1 }
 0x3e4   : > { %v8687_v30 = vpop.f32.mrb[33].mxu1 }
 0x3e5   : > { %v8688_v33 = vadd.f32 %v8687_v30, %v8686_v53  ;;  %v8689_v14 = vpop.f32.mrb[34].mxu1  ;;  %v11650_v53 = vld [vmem:[%s11929_s6 + $0xac] ss:$16 sps:$4 sm:$0xff]  }
 0x3e6   : > { %v8690_v31 = vpop.f32.mrb[35].mxu1 }
 0x3e7   : > { %v11538_v48 = vadd.f32 %v8688_v33, %v4662_v4  ;;  %v8691_v41 = vadd.f32 %v8690_v31, %v8689_v14  ;;  %v11552_v4 = vld [vmem:[%s11929_s6 + $0xc] ss:$16 sps:$4 sm:$0xff]  }
 0x3e8   : > { %7049 = vmatprep.subr.bf16.mxu0 %v11552_v4 }
 0x3e9   : > { %v11540_v16 = vadd.f32 %v8691_v41, %v4665_v47  ;;  %v11560_v47 = vld [vmem:[%s11929_s6 + $0x8] ss:$16 sps:$4 sm:$0xff]  }
 0x3ea   : > { %7050 = vmatpush1.bf16.msra.mxu0 %v11560_v47 }
 0x3eb   : > { %v8692_v24 = vpop.f32.mrb[36].mxu1  ;;  %7051 = vmatprep.subr.bf16.mxu0 %v11580_v27 }
 0x3ec   : > { %v8693_v29 = vpop.f32.mrb[37].mxu1 }
 0x3ed   : > { %v8694_v37 = vadd.f32 %v8693_v29, %v8692_v24  ;;  %v8695_v25 = vpop.f32.mrb[38].mxu1  ;;  %v11672_v29 = vld [vmem:[%s11929_s6 + $0xcc] ss:$16 sps:$4 sm:$0xff]  }
 0x3ee   : > { %v8696_v18 = vpop.f32.mrb[39].mxu1  ;;  %7052 = vmatpush1.bf16.msra.mxu0 %v11575_v3 }
 0x3ef   : > { %v11542_v39 = vadd.f32 %v8694_v37, %v4670_v10  ;;  %v8697_v40 = vadd.f32 %v8696_v18, %v8695_v25  ;;  %v9595_v10 = vld [vmem:[%s11929_s6 + $0x40] ss:$16 sps:$4 sm:$0xff]   ;;  %7053 = vmatprep.subr.bf16.mxu0 %v11592_v62 }
 0x3f0   : > { %6981 = vmatpush1.bf16.msra.mxu1 %v9595_v10  ;;  %v9619_v37 = vld [vmem:[%s11929_s6 + $0xc0] ss:$16 sps:$4 sm:$0xff]   ;;  %v11700_v10 = vld [vmem:[%s11929_s6 + $0xe8] ss:$16 sps:$4 sm:$0xff]  }
 0x3f1   : > { %v11544_v9 = vadd.f32 %v8697_v40, %v4673_v59  ;;  %6982 = vmatprep.subr.bf16.mxu1 %v9603_v0  ;;  %v9732_v0 = vmov 0  }
 0x3f2   : > { %7054 = vmatpush1.bf16.msra.mxu0 %v11600_v5  ;;  %7008 = vmatprep.mubr.bf16.mxu1 %v9732_v0 }
 0x3f3   : > { %v8698_v54 = vpop.f32.mrb[40].mxu1  ;;  %7055 = vmatprep.subr.bf16.mxu0 %v11618_v26  ;;  %7081 = vmatprep.mubr.bf16.mxu0 %v9732_v0 }
 0x3f4   : > { %v8699_v32 = vpop.f32.mrb[41].mxu1  ;;  %6983 = vmatpush1.bf16.msra.mxu1 %v9601_v17 }
 0x3f5   : > { %v8700_v11 = vadd.f32 %v8699_v32, %v8698_v54  ;;  %v8701_v56 = vpop.f32.mrb[42].mxu1 }
 0x3f6   : > { %v8702_v50 = vpop.f32.mrb[43].mxu1  ;;  %7056 = vmatpush1.bf16.msra.mxu0 %v11613_v23 }
 0x3f7   : > { %v11564_v7 = vadd.f32 %v8700_v11, %v4678_v58  ;;  %v8703_v46 = vadd.f32 %v8702_v50, %v8701_v56  ;;  %v9609_v58 = vld [vmem:[%s11929_s6 + $0x84] ss:$16 sps:$4 sm:$0xff]   ;;  %7057 = vmatprep.subr.bf16.mxu0 %v11632_v1 }
 0x3f8   : > { %6984 = vmatprep.subr.bf16.mxu1 %v9609_v58  ;;  %v9627_v50 = vld [vmem:[%s11929_s6 + $0xe4] ss:$16 sps:$4 sm:$0xff]  }
 0x3f9   : > { %v11582_v61 = vadd.f32 %v8703_v46, %v4681_v15  ;;  %6985 = vmatpush1.bf16.msra.mxu1 %v9607_v12  ;;  %v11692_v46 = vld [vmem:[%s11929_s6 + $0xec] ss:$16 sps:$4 sm:$0xff]  }
 0x3fa   : > { %7058 = vmatpush1.bf16.msra.mxu0 %v11640_v21  ;;  %6986 = vmatprep.subr.bf16.mxu1 %v9615_v36 }
 0x3fb   : > { %v8704_v19 = vpop.f32.mrb[44].mxu1  ;;  %7059 = vmatprep.subr.bf16.mxu0 %v11650_v53 }
 0x3fc   : > { %v8705_v59 = vpop.f32.mrb[45].mxu1 }
 0x3fd   : > { %v8706_v55 = vadd.f32 %v8705_v59, %v8704_v19  ;;  %v8707_v13 = vpop.f32.mrb[46].mxu1 }
 0x3fe   : > { %v8708_v28 = vpop.f32.mrb[47].mxu1 }
 0x3ff   : > { %v11620_v35 = vadd.f32 %v8706_v55, %v4686_v38  ;;  %v8709_v42 = vadd.f32 %v8708_v28, %v8707_v13  ;;  %v9613_v38 = vld [vmem:[%s11929_s6 + $0xa0] ss:$16 sps:$4 sm:$0xff]  }
 0x400   : > { %6987 = vmatpush1.bf16.msra.mxu1 %v9613_v38 }
 0x401   : > { %v11623_v49 = vadd.f32 %v8709_v42, %v4689_v45  ;;  %v11659_v45 = vld [vmem:[%s11929_s6 + $0xa8] ss:$16 sps:$4 sm:$0xff]  }
 0x402   : > { %v8726_v15 = vpop.f32.mrb[40].mxu0  ;;  %7060 = vmatpush1.bf16.msra.mxu0 %v11659_v45 }
 0x403   : > { %v8766_v2 = vpop.f32.mrb[48].mxu1  ;;  %v8727_v34 = vpop.f32.mrb[41].mxu0  ;;  %7061 = vmatprep.subr.bf16.mxu0 %v11672_v29 }
 0x404   : > { %v8767_v8 = vpop.f32.mrb[49].mxu1  ;;  %v8728_v63 = vadd.f32 %v8727_v34, %v8726_v15  ;;  %v8729_v60 = vpop.f32.mrb[42].mxu0 }
 0x405   : > { %v8768_v43 = vadd.f32 %v8767_v8, %v8766_v2  ;;  %v8769_v51 = vpop.f32.mrb[50].mxu1  ;;  %v8730_v30 = vpop.f32.mrb[43].mxu0 }
 0x406   : > { %v8770_v6 = vpop.f32.mrb[51].mxu1  ;;  %v9109_v33 = vadd.f32 %v11538_v48, %v8728_v63  ;;  %v8731_v14 = vadd.f32 %v8730_v30, %v8729_v60  ;;  %v9621_v48 = vld [vmem:[%s11929_s6 + $0xc4] ss:$16 sps:$4 sm:$0xff]  }
 0x407   : > { %v8771_v31 = vadd.f32 %v8770_v6, %v8769_v51  ;;  %6988 = vmatprep.subr.bf16.mxu1 %v9621_v48 }
 0x408   : > { %v9121_v41 = vadd.f32 %v11540_v16, %v8731_v14  ;;  %v11663_v24 = vadd.f32 %v9109_v33, %v8768_v43  ;;  %v11680_v16 = vld [vmem:[%s11929_s6 + $0xc8] ss:$16 sps:$4 sm:$0xff]   ;;  %6989 = vmatpush1.bf16.msra.mxu1 %v9619_v37 }
 0x409   : > { %7062 = vmatpush1.bf16.msra.mxu0 %v11680_v16  ;;  %6990 = vmatprep.subr.bf16.mxu1 %v9627_v50 }
 0x40a   : > { %v11682_v25 = vadd.f32 %v9121_v41, %v8771_v31  ;;  %v8732_v18 = vpop.f32.mrb[44].mxu0  ;;  %7063 = vmatprep.subr.bf16.mxu0 %v11692_v46 }
 0x40b   : > { %v8772_v40 = vpop.f32.mrb[52].mxu1  ;;  %v8733_v54 = vpop.f32.mrb[45].mxu0 }
 0x40c   : > { %v8773_v20 = vpop.f32.mrb[53].mxu1  ;;  %v8734_v32 = vadd.f32 %v8733_v54, %v8732_v18  ;;  %v8735_v57 = vpop.f32.mrb[46].mxu0  ;;  %6991 = vmatpush1.bf16.msra.mxu1 %v9625_v22 }
 0x40d   : > { %v8774_v11 = vadd.f32 %v8773_v20, %v8772_v40  ;;  %v8775_v56 = vpop.f32.mrb[54].mxu1  ;;  %v8736_v52 = vpop.f32.mrb[47].mxu0  ;;  %7064 = vmatpush1.bf16.msra.mxu0 %v11700_v10  ;;  %9086 = vmatprep.subr.bf16.mxu1 %v11552_v4 }
 0x40e   : > { %v8776_v44 = vpop.f32.mrb[55].mxu1  ;;  %v9103_v19 = vadd.f32 %v11542_v39, %v8734_v32  ;;  %v8737_v59 = vadd.f32 %v8736_v52, %v8735_v57 }
 0x40f   : > { %v8777_v55 = vadd.f32 %v8776_v44, %v8775_v56 }
 0x410   : > { %v9115_v13 = vadd.f32 %v11544_v9, %v8737_v59  ;;  %v9104_v17 = vadd.f32 %v9103_v19, %v8774_v11 }
 0x412   : > { %v9116_v28 = vadd.f32 %v9115_v13, %v8777_v55  ;;  %v8738_v39 = vpop.f32.mrb[48].mxu0 }
 0x413   : > { %v8778_v42 = vpop.f32.mrb[56].mxu1  ;;  %v8739_v58 = vpop.f32.mrb[49].mxu0 }
 0x414   : > { %v8779_v12 = vpop.f32.mrb[57].mxu1  ;;  %v8740_v15 = vadd.f32 %v8739_v58, %v8738_v39  ;;  %v8741_v2 = vpop.f32.mrb[50].mxu0 }
 0x415   : > { %v8780_v34 = vadd.f32 %v8779_v12, %v8778_v42  ;;  %v8781_v8 = vpop.f32.mrb[58].mxu1  ;;  %v8742_v9 = vpop.f32.mrb[51].mxu0 }
 0x416   : > { %v8782_v63 = vpop.f32.mrb[59].mxu1  ;;  %v9133_v60 = vadd.f32 %v11564_v7, %v8740_v15  ;;  %v8743_v43 = vadd.f32 %v8742_v9, %v8741_v2 }
 0x417   : > { %v8783_v4 = vadd.f32 %v8782_v63, %v8781_v8 }
 0x418   : > { %v9145_v51 = vadd.f32 %v11582_v61, %v8743_v43  ;;  %v9134_v36 = vadd.f32 %v9133_v60, %v8780_v34 }
 0x41a   : > { %v9146_v30 = vadd.f32 %v9145_v51, %v8783_v4  ;;  %v8744_v6 = vpop.f32.mrb[52].mxu0 }
 0x41b   : > { %v8745_v38 = vpop.f32.mrb[53].mxu0  ;;  %v8784_v33 = vpop.f32.mrb[60].mxu1 }
 0x41c   : > { %v8746_v14 = vadd.f32 %v8745_v38, %v8744_v6  ;;  %v8747_v31 = vpop.f32.mrb[54].mxu0  ;;  %v8785_v41 = vpop.f32.mrb[61].mxu1 }
 0x41d   : > { %v8748_v48 = vpop.f32.mrb[55].mxu0  ;;  %v8786_v37 = vadd.f32 %v8785_v41, %v8784_v33  ;;  %v8787_v18 = vpop.f32.mrb[62].mxu1 }
 0x41e   : > { %v9127_v40 = vadd.f32 %v11620_v35, %v8746_v14  ;;  %v8749_v54 = vadd.f32 %v8748_v48, %v8747_v31  ;;  %v8788_v20 = vpop.f32.mrb[63].mxu1 }
 0x41f   : > { %v8789_v7 = vadd.f32 %v8788_v20, %v8787_v18 }
 0x420   : > { %v9139_v32 = vadd.f32 %v11623_v49, %v8749_v54  ;;  %v9128_v57 = vadd.f32 %v9127_v40, %v8786_v37 }
 0x422   : > { %v9140_v61 = vadd.f32 %v9139_v32, %v8789_v7  ;;  %v8806_v11 = vpop.f32.mrb[56].mxu0 }
 0x423   : > { %v8807_v56 = vpop.f32.mrb[57].mxu0 }
 0x424   : > { %v8808_v50 = vadd.f32 %v8807_v56, %v8806_v11  ;;  %v8809_v52 = vpop.f32.mrb[58].mxu0  ;;  %v8858_v22 = vpop.f32.mrb[64].mxu1 }
 0x425   : > { %v8810_v44 = vpop.f32.mrb[59].mxu0  ;;  %v8859_v55 = vpop.f32.mrb[65].mxu1 }
 0x426   : > { %v11714_v19 = vadd.f32 %v11663_v24, %v8808_v50  ;;  %v8811_v59 = vadd.f32 %v8810_v44, %v8809_v52  ;;  %v8860_v13 = vadd.f32 %v8859_v55, %v8858_v22  ;;  %v8861_v35 = vpop.f32.mrb[66].mxu1 }
 0x427   : > { %v8862_v42 = vpop.f32.mrb[67].mxu1 }
 0x428   : > { %v11717_v39 = vadd.f32 %v11682_v25, %v8811_v59  ;;  %v8863_v49 = vadd.f32 %v8862_v42, %v8861_v35 }
 0x42a   : > { %v8812_v58 = vpop.f32.mrb[60].mxu0 }
 0x42b   : > { %v8813_v12 = vpop.f32.mrb[61].mxu0 }
 0x42c   : > { %v8814_v15 = vadd.f32 %v8813_v12, %v8812_v58  ;;  %v8815_v2 = vpop.f32.mrb[62].mxu0  ;;  %v8864_v8 = vpop.f32.mrb[68].mxu1 }
 0x42d   : > { %v8816_v34 = vpop.f32.mrb[63].mxu0  ;;  %v8865_v24 = vpop.f32.mrb[69].mxu1 }
 0x42e   : > { %v11719_v9 = vadd.f32 %v9104_v17, %v8814_v15  ;;  %v8817_v63 = vadd.f32 %v8816_v34, %v8815_v2  ;;  %v8866_v60 = vadd.f32 %v8865_v24, %v8864_v8  ;;  %v8867_v43 = vpop.f32.mrb[70].mxu1 }
 0x42f   : > { %v8868_v51 = vpop.f32.mrb[71].mxu1 }
 0x430   : > { %v11721_v4 = vadd.f32 %v9116_v28, %v8817_v63  ;;  %v8869_v6 = vadd.f32 %v8868_v51, %v8867_v43 }
 0x432   : > { %v8818_v25 = vpop.f32.mrb[64].mxu0 }
 0x433   : > { %v8819_v38 = vpop.f32.mrb[65].mxu0 }
 0x434   : > { %v8820_v33 = vadd.f32 %v8819_v38, %v8818_v25  ;;  %v8821_v14 = vpop.f32.mrb[66].mxu0  ;;  %v8870_v37 = vpop.f32.mrb[72].mxu1 }
 0x435   : > { %v8822_v31 = vpop.f32.mrb[67].mxu0  ;;  %v8871_v18 = vpop.f32.mrb[73].mxu1 }
 0x436   : > { %v11723_v41 = vadd.f32 %v9134_v36, %v8820_v33  ;;  %v8823_v48 = vadd.f32 %v8822_v31, %v8821_v14  ;;  %v8872_v40 = vadd.f32 %v8871_v18, %v8870_v37  ;;  %v8873_v54 = vpop.f32.mrb[74].mxu1 }
 0x437   : > { %v8874_v20 = vpop.f32.mrb[75].mxu1 }
 0x438   : > { %v11725_v17 = vadd.f32 %v9146_v30, %v8823_v48  ;;  %v8875_v7 = vadd.f32 %v8874_v20, %v8873_v54 }
 0x43a   : > { %v8824_v28 = vpop.f32.mrb[68].mxu0 }
 0x43b   : > { %v8825_v32 = vpop.f32.mrb[69].mxu0 }
 0x43c   : > { %v8826_v11 = vadd.f32 %v8825_v32, %v8824_v28  ;;  %v8827_v56 = vpop.f32.mrb[70].mxu0  ;;  %v8876_v50 = vpop.f32.mrb[76].mxu1 }
 0x43d   : > { %v8828_v52 = vpop.f32.mrb[71].mxu0  ;;  %v8877_v44 = vpop.f32.mrb[77].mxu1 }
 0x43e   : > { %v11727_v22 = vadd.f32 %v9128_v57, %v8826_v11  ;;  %v8829_v36 = vadd.f32 %v8828_v52, %v8827_v56  ;;  %v8878_v59 = vadd.f32 %v8877_v44, %v8876_v50  ;;  %v8879_v55 = vpop.f32.mrb[78].mxu1 }
 0x43f   : > { %v8880_v35 = vpop.f32.mrb[79].mxu1 }
 0x440   : > { %v11729_v42 = vadd.f32 %v9140_v61, %v8829_v36  ;;  %v8881_v30 = vadd.f32 %v8880_v35, %v8879_v55 }
 0x444   : > { %v8898_v58 = vpop.f32.mrb[80].mxu1 }
 0x445   : > { %v8899_v12 = vpop.f32.mrb[81].mxu1 }
 0x446   : > { %v8900_v15 = vadd.f32 %v8899_v12, %v8898_v58  ;;  %v8901_v2 = vpop.f32.mrb[82].mxu1 }
 0x447   : > { %v8902_v34 = vpop.f32.mrb[83].mxu1 }
 0x448   : > { %v6470_v8 = vadd.f32 %v8900_v15, %v8860_v13  ;;  %v8903_v63 = vadd.f32 %v8902_v34, %v8901_v2 }
 0x44a   : > { %v6473_v24 = vadd.f32 %v8903_v63, %v8863_v49 }
 0x44c   : > { %v8904_v43 = vpop.f32.mrb[84].mxu1 }
 0x44d   : > { %v8905_v51 = vpop.f32.mrb[85].mxu1 }
 0x44e   : > { %v8906_v25 = vadd.f32 %v8905_v51, %v8904_v43  ;;  %v8907_v57 = vpop.f32.mrb[86].mxu1 }
 0x44f   : > { %v8908_v38 = vpop.f32.mrb[87].mxu1 }
 0x450   : > { %v6478_v33 = vadd.f32 %v8906_v25, %v8866_v60  ;;  %v8909_v14 = vadd.f32 %v8908_v38, %v8907_v57 }
 0x452   : > { %v6481_v31 = vadd.f32 %v8909_v14, %v8869_v6 }
 0x454   : > { %v8910_v48 = vpop.f32.mrb[88].mxu1 }
 0x455   : > { %v8911_v61 = vpop.f32.mrb[89].mxu1 }
 0x456   : > { %v8912_v37 = vadd.f32 %v8911_v61, %v8910_v48  ;;  %v8913_v18 = vpop.f32.mrb[90].mxu1 }
 0x457   : > { %v8914_v54 = vpop.f32.mrb[91].mxu1 }
 0x458   : > { %v6486_v20 = vadd.f32 %v8912_v37, %v8872_v40  ;;  %v8915_v28 = vadd.f32 %v8914_v54, %v8913_v18 }
 0x45a   : > { %v6489_v32 = vadd.f32 %v8915_v28, %v8875_v7 }
 0x45c   : > { %v8916_v11 = vpop.f32.mrb[92].mxu1 }
 0x45d   : > { %v8917_v13 = vpop.f32.mrb[93].mxu1 }
 0x45e   : > { %v8918_v56 = vadd.f32 %v8917_v13, %v8916_v11  ;;  %v8919_v49 = vpop.f32.mrb[94].mxu1 }
 0x45f   : > { %v8920_v50 = vpop.f32.mrb[95].mxu1 }
 0x460   : > { %v11731_v52 = vadd.f32 %v8918_v56, %v8878_v59  ;;  %v8921_v44 = vadd.f32 %v8920_v50, %v8919_v49 }
 0x462   : > { %v11733_v36 = vadd.f32 %v8921_v44, %v8881_v30  ;;  %v8938_v60 = vpop.f32.mrb[72].mxu0 }
 0x463   : > { %v8939_v6 = vpop.f32.mrb[73].mxu0 }
 0x464   : > { %v8940_v55 = vadd.f32 %v8939_v6, %v8938_v60  ;;  %v8941_v35 = vpop.f32.mrb[74].mxu0  ;;  %v8978_v58 = vpop.f32.mrb[96].mxu1 }
 0x465   : > { %v8942_v12 = vpop.f32.mrb[75].mxu0  ;;  %v8979_v15 = vpop.f32.mrb[97].mxu1 }
 0x466   : > { %v6535_v40 = vadd.f32 %v8940_v55, %v6470_v8  ;;  %v8943_v2 = vadd.f32 %v8942_v12, %v8941_v35  ;;  %v8980_v7 = vadd.f32 %v8979_v15, %v8978_v58  ;;  %v8981_v34 = vpop.f32.mrb[98].mxu1 }
 0x467   : > { %v8982_v63 = vpop.f32.mrb[99].mxu1 }
 0x468   : > { %v6538_v43 = vadd.f32 %v8943_v2, %v6473_v24  ;;  %v6600_v51 = vadd.f32 %v8980_v7, %v6535_v40  ;;  %v8983_v25 = vadd.f32 %v8982_v63, %v8981_v34 }
 0x46a   : > { %v6603_v59 = vadd.f32 %v8983_v25, %v6538_v43  ;;  %v8944_v57 = vpop.f32.mrb[76].mxu0  ;;  %v9112_v30 = vadd.f32 %v11714_v19, %v6600_v51 }
 0x46b   : > { %v8945_v38 = vpop.f32.mrb[77].mxu0 }
 0x46c   : > { %v8946_v14 = vadd.f32 %v8945_v38, %v8944_v57  ;;  %v8947_v48 = vpop.f32.mrb[78].mxu0  ;;  %v8984_v61 = vpop.f32.mrb[100].mxu1  ;;  %v9124_v37 = vadd.f32 %v11717_v39, %v6603_v59 }
 0x46d   : > { %v8948_v18 = vpop.f32.mrb[79].mxu0  ;;  %v8985_v54 = vpop.f32.mrb[101].mxu1 }
 0x46e   : > { %v6543_v8 = vadd.f32 %v8946_v14, %v6478_v33  ;;  %v8949_v28 = vadd.f32 %v8948_v18, %v8947_v48  ;;  %v8986_v11 = vadd.f32 %v8985_v54, %v8984_v61  ;;  %v8987_v13 = vpop.f32.mrb[102].mxu1 }
 0x46f   : > { %v8988_v56 = vpop.f32.mrb[103].mxu1 }
 0x470   : > { %v6546_v24 = vadd.f32 %v8949_v28, %v6481_v31  ;;  %v6608_v49 = vadd.f32 %v8986_v11, %v6543_v8  ;;  %v8989_v50 = vadd.f32 %v8988_v56, %v8987_v13 }
 0x472   : > { %v6611_v44 = vadd.f32 %v8989_v50, %v6546_v24  ;;  %v8950_v60 = vpop.f32.mrb[80].mxu0  ;;  %v9106_v19 = vadd.f32 %v11719_v9, %v6608_v49  ;;  %v8205_v24 = vld [vmem:[%s11928_s5] ss:$0 sm:$0xff] }
 0x473   : > { %v8951_v6 = vpop.f32.mrb[81].mxu0 }
 0x474   : > { %v8952_v55 = vadd.f32 %v8951_v6, %v8950_v60  ;;  %v8953_v35 = vpop.f32.mrb[82].mxu0  ;;  %v8990_v58 = vpop.f32.mrb[104].mxu1  ;;  %v9118_v39 = vadd.f32 %v11721_v4, %v6611_v44 }
 0x475   : > { %v8954_v12 = vpop.f32.mrb[83].mxu0  ;;  %v8991_v15 = vpop.f32.mrb[105].mxu1 }
 0x476   : > { %v6551_v33 = vadd.f32 %v8952_v55, %v6486_v20  ;;  %v8955_v40 = vadd.f32 %v8954_v12, %v8953_v35  ;;  %v8992_v2 = vadd.f32 %v8991_v15, %v8990_v58  ;;  %v8993_v7 = vpop.f32.mrb[106].mxu1 }
 0x477   : > { %v8994_v34 = vpop.f32.mrb[107].mxu1 }
 0x478   : > { %v6554_v31 = vadd.f32 %v8955_v40, %v6489_v32  ;;  %v6616_v63 = vadd.f32 %v8992_v2, %v6551_v33  ;;  %v8995_v43 = vadd.f32 %v8994_v34, %v8993_v7 }
 0x47a   : > { %v6619_v51 = vadd.f32 %v8995_v43, %v6554_v31  ;;  %v8956_v25 = vpop.f32.mrb[84].mxu0  ;;  %v9136_v9 = vadd.f32 %v11723_v41, %v6616_v63 }
 0x47b   : > { %v8957_v59 = vpop.f32.mrb[85].mxu0 }
 0x47c   : > { %v8958_v57 = vadd.f32 %v8957_v59, %v8956_v25  ;;  %v8959_v38 = vpop.f32.mrb[86].mxu0  ;;  %v8996_v14 = vpop.f32.mrb[108].mxu1  ;;  %v9148_v4 = vadd.f32 %v11725_v17, %v6619_v51 }
 0x47d   : > { %v8960_v48 = vpop.f32.mrb[87].mxu0  ;;  %v8997_v61 = vpop.f32.mrb[109].mxu1 }
 0x47e   : > { %v6559_v20 = vadd.f32 %v8958_v57, %v11731_v52  ;;  %v8961_v18 = vadd.f32 %v8960_v48, %v8959_v38  ;;  %v8998_v54 = vadd.f32 %v8997_v61, %v8996_v14  ;;  %v8999_v8 = vpop.f32.mrb[110].mxu1 }
 0x47f   : > { %v9000_v32 = vpop.f32.mrb[111].mxu1 }
 0x480   : > { %v6562_v28 = vadd.f32 %v8961_v18, %v11733_v36  ;;  %v6624_v11 = vadd.f32 %v8998_v54, %v6559_v20  ;;  %v9001_v13 = vadd.f32 %v9000_v32, %v8999_v8  ;;  %v6763_v18 = vld [vmem:[%s9866_s11 + $0x8] sm:$0xff]  ;;  %v6765_v8 = vld [vmem:[%s9866_s11 + $0x18] sm:$0xff] }
 0x482   : > { %v6627_v56 = vadd.f32 %v9001_v13, %v6562_v28  ;;  %v9080_v41 = vpop.f32.mrb[32].mxu0  ;;  %v9130_v17 = vadd.f32 %v11727_v22, %v6624_v11  ;;  %v6766_v13 = vld [vmem:[%s9866_s11 + $0x20] sm:$0xff] }
 0x483   : > { %v9107_v49 = vadd.f32 %v9106_v19, %v9080_v41  ;;  %v6664_v50 = vpop.f32.mrb[33].mxu0  ;;  %v6768_v41 = vld [vmem:[%s9866_s11 + $0x30] sm:$0xff] }
 0x484   : > { %v9113_v44 = vadd.f32 %v9112_v30, %v6664_v50  ;;  %v9081_v52 = vpop.f32.mrb[34].mxu0  ;;  %v9142_v60 = vadd.f32 %v11729_v42, %v6627_v56 }
 0x485   : > { %v6712_v6 = vadd.f32 %v9107_v49, %v8205_v24  ;;  %v9119_v55 = vadd.f32 %v9118_v39, %v9081_v52  ;;  %v6667_v35 = vpop.f32.mrb[35].mxu0  ;;  %v6767_v52 = vld [vmem:[%s9866_s11 + $0x28] sm:$0xff] }
 0x486   : > { %v6710_v36 = vadd.f32 %v9113_v44, %v8205_v24  ;;  %v9125_v58 = vadd.f32 %v9124_v37, %v6667_v35 }
 0x487   : > { %v6713_v12 = vadd.f32 %v9119_v55, %v8205_v24  ;;  %v6720_v33 = vmax.f32 %v6712_v6, 0.0  ;;  %v6769_v6 = vld [vmem:[%s9866_s11 + $0x38] sm:$0xff] }
 0x488   : > { %v6711_v15 = vadd.f32 %v9125_v58, %v8205_v24  ;;  %v6718_v2 = vmax.f32 %v6710_v36, 0.0 }
 0x489   : > { %v6721_v40 = vmax.f32 %v6713_v12, 0.0 }
 0x48a   : > { %v6719_v7 = vmax.f32 %v6711_v15, 0.0  ;;  %v9084_v34 = vpop.f32.mrb[36].mxu0 }
 0x48b   : > { %v9131_v31 = vadd.f32 %v9130_v17, %v9084_v34  ;;  %v6680_v22 = vpop.f32.mrb[37].mxu0  ;;  %v6727_v19 = vpack.c.bf16 %v6721_v40, %v6720_v33 }
 0x48c   : > { %v6726_v63 = vpack.c.bf16 %v6719_v7, %v6718_v2  ;;  %v9137_v30 = vadd.f32 %v9136_v9, %v6680_v22  ;;  %v9085_v43 = vpop.f32.mrb[38].mxu0 }
 0x48d   : > { %v6716_v51 = vadd.f32 %v9131_v31, %v8205_v24  ;;  %v9143_v42 = vadd.f32 %v9142_v60, %v9085_v43  ;;  %v6683_v25 = vpop.f32.mrb[39].mxu0 }
 0x48e   : > { %v6714_v39 = vadd.f32 %v9137_v30, %v8205_v24  ;;  %v9149_v59 = vadd.f32 %v9148_v4, %v6683_v25  ;;  %7009 = vmatmul.mubr.bf16.vlgmr.msra.gmra.mrb[112].mxu1 %v6726_v63  ;;  %7082 = vmatmul.mubr.bf16.vlgmr.msra.gmra.mrb[88].mxu0 %v6726_v63  ;;  %v6770_v25 = vld [vmem:[%s9866_s11 + $0x40] sm:$0xff] }
 0x48f   : > { %v6717_v37 = vadd.f32 %v9143_v42, %v8205_v24  ;;  %9094 = vmatpush1.bf16.msra.mxu1 %v11560_v47  ;;  %7018 = vmatprep.mubr.bf16.mxu1 %v9732_v0  ;;  %v6724_v38 = vmax.f32 %v6716_v51, 0.0  ;;  %v6796_v47 = vlaneseq }
 0x490   : > { %v6715_v57 = vadd.f32 %v9149_v59, %v8205_v24  ;;  %9087 = vmatprep.subr.bf16.mxu1 %v11580_v27  ;;  %7091 = vmatprep.mubr.bf16.mxu0 %v9732_v0  ;;  %v6722_v14 = vmax.f32 %v6714_v39, 0.0  ;;  %v6772_v59 = vld [vmem:[%s9866_s11 + $0x50] sm:$0xff] }
 0x491   : > { %v6725_v9 = vmax.f32 %v6717_v37, 0.0 }
 0x492   : > { %v6723_v48 = vmax.f32 %v6715_v57, 0.0 }
 0x493   : > { %9095 = vmatpush1.bf16.msra.mxu1 %v11575_v3  ;;  %v6729_v61 = vpack.c.bf16 %v6725_v9, %v6724_v38  ;;  %v6797_v3 = vshrl.u32 %v6796_v47, 7  ;;  %v6771_v9 = vld [vmem:[%s9866_s11 + $0x48] sm:$0xff] }
 0x494   : > { %9088 = vmatprep.subr.bf16.mxu1 %v11592_v62  ;;  %v6728_v4 = vpack.c.bf16 %v6723_v48, %v6722_v14  ;;  %v6773_v48 = vld [vmem:[%s9866_s11 + $0x58] sm:$0xff] }
 0x495   : > { %v6798_v27 = vsub.s32 0, %v6797_v3  ;;  %v6806_v62 = vsub.s32 2, %v6797_v3 }
 0x496   : > { %7019 = vmatmul.mubr.bf16.gmra.mrb[116].mxu1 %v6727_v19  ;;  %7092 = vmatmul.mubr.bf16.gmra.mrb[92].mxu0 %v6727_v19 }
 0x497   : > { %9096 = vmatpush1.bf16.msra.mxu1 %v11600_v5  ;;  %7028 = vmatprep.mubr.bf16.mxu1 %v9732_v0  ;;  %v6794_v5 = vld [vmem:[%s11930_s7] sm:$0xf] }
 0x498   : > { %9089 = vmatprep.subr.bf16.mxu1 %v11618_v26  ;;  %v6810_v26 = vsub.s32 3, %v6797_v3 }
 0x49b   : > { %9097 = vmatpush1.bf16.msra.mxu1 %v11613_v23  ;;  %v6802_v23 = vsub.s32 1, %v6797_v3 }
 0x49c   : > { %9090 = vmatprep.subr.bf16.mxu1 %v11632_v1  ;;  %v11772_v1 = vrot.slane %v6794_v5, %v6798_v27 }
 0x49e   : > { %7029 = vmatmul.mubr.bf16.gmra.mrb[120].mxu1 %v6728_v4 }
 0x49f   : > { %9098 = vmatpush1.bf16.msra.mxu1 %v11640_v21  ;;  %7038 = vmatprep.mubr.bf16.mxu1 %v9732_v0  ;;  %v11774_v21 = vrot.slane %v6794_v5, %v6806_v62  ;;  %v6774_v62 = vld [vmem:[%s9866_s11 + $0x60] sm:$0xff] }
 0x4a0   : > { %9091 = vmatprep.subr.bf16.mxu1 %v11650_v53  ;;  %v11776_v53 = vrot.slane %v6794_v5, %v6802_v23  ;;  %v6776_v23 = vld [vmem:[%s9866_s11 + $0x70] sm:$0xff] }
 0x4a3   : > { %9099 = vmatpush1.bf16.msra.mxu1 %v11659_v45  ;;  %v11778_v45 = vrot.slane %v6794_v5, %v6810_v26 }
 0x4a4   : > { %9092 = vmatprep.subr.bf16.mxu1 %v11672_v29  ;;  %v6762_v29 = vld [vmem:[%s9866_s11] sm:$0xff] }
 0x4a6   : > { %7039 = vmatmul.mubr.bf16.gmra.mrb[124].mxu1 %v6729_v61 }
 0x4a7   : > { %9100 = vmatpush1.bf16.msra.mxu1 %v11680_v16  ;;  %7101 = vmatprep.mubr.bf16.mxu1 %v9732_v0 }
 0x4a8   : > { %9093 = vmatprep.subr.bf16.mxu1 %v11692_v46  ;;  %v6764_v46 = vld [vmem:[%s9866_s11 + $0x10] sm:$0xff] }
 0x4ab   : > { %9101 = vmatpush1.bf16.msra.mxu1 %v11700_v10 }
 0x4ae   : > { %7102 = vmatmul.mubr.bf16.vlgmr.msra.gmra.mrb[128].mxu1 %v6728_v4 }
 0x4af   : > { %7111 = vmatprep.mubr.bf16.mxu1 %v9732_v0 }
 0x4b6   : > { %7112 = vmatmul.mubr.bf16.gmra.mrb[132].mxu1 %v6729_v61 }
 0x561   : > { %v7010_v16 = vpop.f32.mrb[112].mxu1  ;;  %v7083_v10 = vpop.f32.mrb[88].mxu0 }
 0x562   : > { %v7011_v0 = vadd.f32 %v7010_v16, %v11772_v1  ;;  %v7084_v20 = vadd.f32 %v7083_v10, %v11774_v21  ;;  %v7012_v54 = vpop.f32.mrb[113].mxu1  ;;  %v7085_v32 = vpop.f32.mrb[89].mxu0 }
 0x563   : > { %v7013_v28 = vadd.f32 %v7012_v54, %v11776_v53  ;;  %v7086_v11 = vadd.f32 %v7085_v32, %v11778_v45  ;;  %v7014_v56 = vpop.f32.mrb[114].mxu1  ;;  %v7087_v24 = vpop.f32.mrb[90].mxu0 }
 0x564   : > { %v7122_v17 = vadd.f32 %v7011_v0, %v6762_v29  ;;  %v7124_v49 = vadd.f32 %v7084_v20, %v6764_v46  ;;  %v7015_v50 = vadd.f32 %v7014_v56, %v11772_v1  ;;  %v7088_v44 = vadd.f32 %v7087_v24, %v11774_v21  ;;  %v7016_v60 = vpop.f32.mrb[115].mxu1  ;;  %v7089_v55 = vpop.f32.mrb[91].mxu0  ;;  %v6775_v0 = vld [vmem:[%s9866_s11 + $0x68] sm:$0xff] }
 0x565   : > { %v7123_v35 = vadd.f32 %v7013_v28, %v6763_v18  ;;  %v7125_v36 = vadd.f32 %v7086_v11, %v6765_v8  ;;  %v7017_v58 = vadd.f32 %v7016_v60, %v11776_v53  ;;  %v7090_v12 = vadd.f32 %v7089_v55, %v11778_v45  ;;  %v6777_v18 = vld [vmem:[%s9866_s11 + $0x78] sm:$0xff] }
 0x566   : > { %v7154_v15 = vmax.f32 %v7122_v17, 0.0  ;;  %v7156_v33 = vmax.f32 %v7124_v49, 0.0  ;;  %v7126_v40 = vadd.f32 %v7015_v50, %v6766_v13  ;;  %v7128_v2 = vadd.f32 %v7088_v44, %v6768_v41 }
 0x567   : > { %v7155_v7 = vmax.f32 %v7123_v35, 0.0  ;;  %v7157_v34 = vmax.f32 %v7125_v36, 0.0  ;;  %v7127_v31 = vadd.f32 %v7017_v58, %v6767_v52  ;;  %v7129_v22 = vadd.f32 %v7090_v12, %v6769_v6  ;;  %v6778_v58 = vld [vmem:[%s9866_s11 + $0x80] sm:$0xff] }
 0x568   : > { %v7158_v19 = vmax.f32 %v7126_v40, 0.0  ;;  %v7160_v63 = vmax.f32 %v7128_v2, 0.0 }
 0x569   : > { %v8285_v30 = vpack.c.bf16 %v7155_v7, %v7154_v15  ;;  %v8286_v43 = vpack.c.bf16 %v7157_v34, %v7156_v33  ;;  %v7159_v51 = vmax.f32 %v7127_v31, 0.0  ;;  %v7161_v42 = vmax.f32 %v7129_v22, 0.0  ;;  %v7020_v39 = vpop.f32.mrb[116].mxu1  ;;  %v7093_v37 = vpop.f32.mrb[92].mxu0  ;;  %v6779_v33 = vld [vmem:[%s9866_s11 + $0x88] sm:$0xff]  ;;  %v6782_v31 = vld [vmem:[%s9866_s11 + $0xa0] sm:$0xff] }
 0x56a   : > { %v7021_v57 = vadd.f32 %v7020_v39, %v11772_v1  ;;  %v7094_v38 = vadd.f32 %v7093_v37, %v11774_v21  ;;  %v7022_v14 = vpop.f32.mrb[117].mxu1  ;;  %v7095_v61 = vpop.f32.mrb[93].mxu0 }
 0x56b   : > { %7314 = vst [vmem:[%s9873_s29] sm:$0xff] %v8285_v30  ;;  %7315 = vst [vmem:[%s9873_s29 + $0x8] sm:$0xff] %v8286_v43  ;;  %v8287_v4 = vpack.c.bf16 %v7159_v51, %v7158_v19  ;;  %v8288_v47 = vpack.c.bf16 %v7161_v42, %v7160_v63  ;;  %v7023_v3 = vadd.f32 %v7022_v14, %v11776_v53  ;;  %v7024_v5 = vpop.f32.mrb[118].mxu1  ;;  %v7097_v26 = vpop.f32.mrb[94].mxu0  ;;  %v6783_v30 = vld [vmem:[%s9866_s11 + $0xa8] sm:$0xff]  ;;  %v6786_v14 = vld [vmem:[%s9866_s11 + $0xc0] sm:$0xff] }
 0x56c   : > { %v7096_v27 = vadd.f32 %v7095_v61, %v11778_v45  ;;  %v7130_v29 = vadd.f32 %v7021_v57, %v6770_v25  ;;  %v7132_v16 = vadd.f32 %v7094_v38, %v6772_v59  ;;  %v7025_v46 = vadd.f32 %v7024_v5, %v11772_v1  ;;  %v7026_v20 = vpop.f32.mrb[119].mxu1  ;;  %v7099_v54 = vpop.f32.mrb[95].mxu0 }
 0x56d   : > { %v7098_v10 = vadd.f32 %v7097_v26, %v11774_v21  ;;  %7316 = vst [vmem:[%s9873_s29 + $0x10] sm:$0xff] %v8287_v4  ;;  %7317 = vst [vmem:[%s9873_s29 + $0x18] sm:$0xff] %v8288_v47  ;;  %v7131_v8 = vadd.f32 %v7023_v3, %v6771_v9  ;;  %v7027_v28 = vadd.f32 %v7026_v20, %v11776_v53  ;;  %v6787_v4 = vld [vmem:[%s9866_s11 + $0xc8] sm:$0xff] }
 0x56e   : > { %v7133_v32 = vadd.f32 %v7096_v27, %v6773_v48  ;;  %v7100_v11 = vadd.f32 %v7099_v54, %v11778_v45  ;;  %v7162_v13 = vmax.f32 %v7130_v29, 0.0  ;;  %v7164_v56 = vmax.f32 %v7132_v16, 0.0  ;;  %v6791_v29 = vld [vmem:[%s9866_s11 + $0xe8] sm:$0xff] }
 0x56f   : > { %v7134_v41 = vadd.f32 %v7025_v46, %v6774_v62  ;;  %v7136_v24 = vadd.f32 %v7098_v10, %v6776_v23  ;;  %v7163_v17 = vmax.f32 %v7131_v8, 0.0  ;;  %v7135_v50 = vadd.f32 %v7027_v28, %v6775_v0  ;;  %v6790_v62 = vld [vmem:[%s9866_s11 + $0xe0] sm:$0xff] }
 0x570   : > { %v7165_v49 = vmax.f32 %v7133_v32, 0.0  ;;  %v7137_v44 = vadd.f32 %v7100_v11, %v6777_v18  ;;  %v6780_v11 = vld [vmem:[%s9866_s11 + $0x90] sm:$0xff] }
 0x571   : > { %v7166_v52 = vmax.f32 %v7134_v41, 0.0  ;;  %v7168_v60 = vmax.f32 %v7136_v24, 0.0  ;;  %v8289_v6 = vpack.c.bf16 %v7163_v17, %v7162_v13  ;;  %v7167_v35 = vmax.f32 %v7135_v50, 0.0  ;;  %v7030_v12 = vpop.f32.mrb[120].mxu1  ;;  %v6784_v17 = vld [vmem:[%s9866_s11 + $0xb0] sm:$0xff] }
 0x572   : > { %v8290_v55 = vpack.c.bf16 %v7165_v49, %v7164_v56  ;;  %v7169_v36 = vmax.f32 %v7137_v44, 0.0  ;;  %v7031_v15 = vadd.f32 %v7030_v12, %v11772_v1  ;;  %v7032_v40 = vpop.f32.mrb[121].mxu1  ;;  %v6781_v56 = vld [vmem:[%s9866_s11 + $0x98] sm:$0xff] }
 0x573   : > { %7318 = vst [vmem:[%s9873_s29 + $0x20] sm:$0xff] %v8289_v6  ;;  %v8291_v2 = vpack.c.bf16 %v7167_v35, %v7166_v52  ;;  %v7033_v34 = vadd.f32 %v7032_v40, %v11776_v53  ;;  %v7034_v22 = vpop.f32.mrb[122].mxu1  ;;  %v6785_v52 = vld [vmem:[%s9866_s11 + $0xb8] sm:$0xff] }
 0x574   : > { %7319 = vst [vmem:[%s9873_s29 + $0x28] sm:$0xff] %v8290_v55  ;;  %v8292_v7 = vpack.c.bf16 %v7169_v36, %v7168_v60  ;;  %v7138_v19 = vadd.f32 %v7031_v15, %v6778_v58  ;;  %v7035_v63 = vadd.f32 %v7034_v22, %v11772_v1  ;;  %v7036_v43 = vpop.f32.mrb[123].mxu1 }
 0x575   : > { %7320 = vst [vmem:[%s9873_s29 + $0x30] sm:$0xff] %v8291_v2  ;;  %v7139_v51 = vadd.f32 %v7033_v34, %v6779_v33  ;;  %v7037_v42 = vadd.f32 %v7036_v43, %v11776_v53  ;;  %v6788_v2 = vld [vmem:[%s9866_s11 + $0xd0] sm:$0xff] }
 0x576   : > { %7321 = vst [vmem:[%s9873_s29 + $0x38] sm:$0xff] %v8292_v7  ;;  %v7170_v25 = vmax.f32 %v7138_v19, 0.0  ;;  %v7142_v39 = vadd.f32 %v7035_v63, %v6782_v31  ;;  %v6789_v31 = vld [vmem:[%s9866_s11 + $0xd8] sm:$0xff] }
 0x577   : > { %v7171_v59 = vmax.f32 %v7139_v51, 0.0  ;;  %v7143_v37 = vadd.f32 %v7037_v42, %v6783_v30  ;;  %v6792_v30 = vld [vmem:[%s9866_s11 + $0xf0] sm:$0xff] }
 0x578   : > { %v7174_v57 = vmax.f32 %v7142_v39, 0.0 }
 0x579   : > { %v8293_v38 = vpack.c.bf16 %v7171_v59, %v7170_v25  ;;  %v7175_v9 = vmax.f32 %v7143_v37, 0.0  ;;  %v7040_v48 = vpop.f32.mrb[124].mxu1  ;;  %v6793_v25 = vld [vmem:[%s9866_s11 + $0xf8] sm:$0xff] }
 0x57a   : > { %v7041_v61 = vadd.f32 %v7040_v48, %v11772_v1  ;;  %v7042_v47 = vpop.f32.mrb[125].mxu1 }
 0x57b   : > { %7322 = vst [vmem:[%s9873_s29 + $0x40] sm:$0xff] %v8293_v38  ;;  %v8295_v3 = vpack.c.bf16 %v7175_v9, %v7174_v57  ;;  %v7043_v27 = vadd.f32 %v7042_v47, %v11776_v53  ;;  %v7044_v5 = vpop.f32.mrb[126].mxu1 }
 0x57c   : > { %v7146_v23 = vadd.f32 %v7041_v61, %v6786_v14  ;;  %v7045_v26 = vadd.f32 %v7044_v5, %v11772_v1  ;;  %v7046_v16 = vpop.f32.mrb[127].mxu1 }
 0x57d   : > { %7324 = vst [vmem:[%s9873_s29 + $0x50] sm:$0xff] %v8295_v3  ;;  %v7147_v46 = vadd.f32 %v7043_v27, %v6787_v4  ;;  %v7047_v10 = vadd.f32 %v7046_v16, %v11776_v53 }
 0x57e   : > { %v7178_v0 = vmax.f32 %v7146_v23, 0.0  ;;  %v7150_v20 = vadd.f32 %v7045_v26, %v6790_v62 }
 0x57f   : > { %v7179_v18 = vmax.f32 %v7147_v46, 0.0  ;;  %v7151_v54 = vadd.f32 %v7047_v10, %v6791_v29 }
 0x580   : > { %v7182_v8 = vmax.f32 %v7150_v20, 0.0 }
 0x581   : > { %v8297_v32 = vpack.c.bf16 %v7179_v18, %v7178_v0  ;;  %v7183_v28 = vmax.f32 %v7151_v54, 0.0  ;;  %v7103_v1 = vpop.f32.mrb[128].mxu1 }
 0x582   : > { %v7104_v13 = vadd.f32 %v7103_v1, %v11774_v21  ;;  %v7105_v41 = vpop.f32.mrb[129].mxu1 }
 0x583   : > { %7326 = vst [vmem:[%s9873_s29 + $0x60] sm:$0xff] %v8297_v32  ;;  %v8299_v24 = vpack.c.bf16 %v7183_v28, %v7182_v8  ;;  %v7106_v53 = vadd.f32 %v7105_v41, %v11778_v45  ;;  %v7107_v49 = vpop.f32.mrb[130].mxu1 }
 0x584   : > { %v7140_v50 = vadd.f32 %v7104_v13, %v6780_v11  ;;  %v7108_v44 = vadd.f32 %v7107_v49, %v11774_v21  ;;  %v7109_v60 = vpop.f32.mrb[131].mxu1 }
 0x585   : > { %7328 = vst [vmem:[%s9873_s29 + $0x70] sm:$0xff] %v8299_v24  ;;  %v7141_v6 = vadd.f32 %v7106_v53, %v6781_v56  ;;  %v7110_v55 = vadd.f32 %v7109_v60, %v11778_v45 }
 0x586   : > { %v7172_v35 = vmax.f32 %v7140_v50, 0.0  ;;  %v7144_v36 = vadd.f32 %v7108_v44, %v6784_v17 }
 0x587   : > { %v7173_v58 = vmax.f32 %v7141_v6, 0.0  ;;  %v7145_v12 = vadd.f32 %v7110_v55, %v6785_v52 }
 0x588   : > { %v7176_v15 = vmax.f32 %v7144_v36, 0.0 }
 0x589   : > { %v8294_v33 = vpack.c.bf16 %v7173_v58, %v7172_v35  ;;  %v7177_v40 = vmax.f32 %v7145_v12, 0.0  ;;  %v7113_v7 = vpop.f32.mrb[132].mxu1 }
 0x58a   : > { %v7114_v34 = vadd.f32 %v7113_v7, %v11774_v21  ;;  %v7115_v22 = vpop.f32.mrb[133].mxu1 }
 0x58b   : > { %7323 = vst [vmem:[%s9873_s29 + $0x48] sm:$0xff] %v8294_v33  ;;  %v8296_v19 = vpack.c.bf16 %v7177_v40, %v7176_v15  ;;  %v7116_v63 = vadd.f32 %v7115_v22, %v11778_v45  ;;  %v7117_v43 = vpop.f32.mrb[134].mxu1 }
 0x58c   : > { %v7148_v51 = vadd.f32 %v7114_v34, %v6788_v2  ;;  %v7118_v42 = vadd.f32 %v7117_v43, %v11774_v21  ;;  %v7119_v39 = vpop.f32.mrb[135].mxu1 }
 0x58d   : > { %7325 = vst [vmem:[%s9873_s29 + $0x58] sm:$0xff] %v8296_v19  ;;  %v7149_v59 = vadd.f32 %v7116_v63, %v6789_v31  ;;  %v7120_v37 = vadd.f32 %v7119_v39, %v11778_v45 }
 0x58e   : > { %v7180_v57 = vmax.f32 %v7148_v51, 0.0  ;;  %v7152_v38 = vadd.f32 %v7118_v42, %v6792_v30 }
 0x58f   : > { %v7181_v9 = vmax.f32 %v7149_v59, 0.0  ;;  %v7153_v14 = vadd.f32 %v7120_v37, %v6793_v25 }
 0x590   : > { %v7184_v48 = vmax.f32 %v7152_v38, 0.0 }
 0x591   : > { %v8298_v61 = vpack.c.bf16 %v7181_v9, %v7180_v57  ;;  %v7185_v4 = vmax.f32 %v7153_v14, 0.0 }
 0x593   : > { %7327 = vst [vmem:[%s9873_s29 + $0x68] sm:$0xff] %v8298_v61  ;;  %v8300_v21 = vpack.c.bf16 %v7185_v4, %v7184_v48 }
 0x595   : > { %7329 = vst [vmem:[%s9873_s29 + $0x78] sm:$0xff] %v8300_v21 }
 0x596   : > { %9644 = shalt.err (!%p9641_p12)
}
 0x597   : > { %s9645_s29 = scalar_lea.hbm %s11863_s23, 2048  ;;  %s9649_s22 = scalar_lea.hbm %s11931_s8, 16384 }
 0x598   : > { %p9646_p13 = scmp.ne.s32.totalorder %s11863_s23, %s9645_s29  ;;  %p9650_p2 = scmp.lt.u32.totalorder %s11863_s23, %s11931_s8 }
 0x599   : > { %p9651_p3 = scmp.lt.u32.totalorder %s9649_s22, %s9645_s29  ;;  %p9653_p6 = scmp.lt.u32.totalorder %s9645_s29, %s11863_s23 }
 0x59a   : > { %p9647_p0 = pnand %p9646_p13, %p9834_p5 }
 0x59b   : > { %p9652_p4 = por %p9651_p3, %p9650_p2 }
 0x59c   : > { %p9648_p1 = pneg %p9647_p0 }
 0x59d   : > { %p9654_p8 = por %p9653_p6, %p9652_p4 }
 0x59f   : > { %p9655_p9 = pnand %p9654_p8, %p9648_p1 }
 0x5a1   : > { %9658 = shalt.err (!%p9655_p9)
}
 0x5a2   : > { %s9734_s26 = smov 256   ;;  %s9735_s13 = smov 16  }
 0x5a3   : > { %9167 = dma.vmem_to_hbm [thread:$0]  (%p9834_p5), %s11865_s16, 2048, %s11863_s23, %s11871_s24, %s9734_s26, %s9734_s26, %s9735_s13  }
 0x5a4 PF: > { %p9173_p10 = scmp.ge.s32.totalorder %s9725_s12, 2  ;;  %s7361_s11 = sand.u32 1, %s9697_s27  }
 0x5a5   : > { %s7362_s30 = scalar_lea.sflag [#allocation4], %s7361_s11 }
 0x5a6   : > { %p9170_p11 = pnand %p9173_p10, %p9840_p7 }
 0x5a8   : > { %9692 = dma.done.wait (!%p9170_p11), %s7362_s30, 2048  }
 0x5a9   : > { %9694 = vsyncadd (!%p9170_p11), %s7362_s30, 4294965248  ;;  %s21_s12 = sadd.s32 1, %s9725_s12   ;;  %s11951_s17 = sld [smem:[#allocation6_spill]] }
 0x5aa   : > { %p18_p12 = scmp.ge.s32.totalorder %s21_s12, 10   ;;  %s11952_s29 = sld [smem:[#allocation11_spill]] }
 0x5ab   : > { %s11953_s30 = sld [smem:[#allocation7_spill]]  ;;  %s11954_s9 = sld [smem:[#allocation8_spill]] }
 0x5ac   : > { %s11955_s10 = sld [smem:[#allocation9_spill]]  ;;  %s11956_s11 = sld [smem:[#allocation10_spill]] }
 0x5ad   : > { %s11957_s27 = smov %s9701_s28  ;;  %20 = sbr.rel (!%p18_p12) target bundleno = 5 (0x5), region = 116 }
 0x5af   : > { %s11958_s28 = smov %s11951_s17 }
 0x5b4   :  { %7367 = vsyncpa [#allocation4], 1 }
 0x5b5   :  { %7369 = vsyncpa [#allocation4 + $0x1], 1 }

</bundles_post_ra>
